<compile_context>
chip_gen: v5e
topology: v5e:2x2
jax: 0.10.0
libtpu: 0.0.40
codegen_flags: <defaults>
</compile_context>

<pallas_src>
import functools

import jax
import jax.numpy as jnp
import numpy as np
from jax.experimental import pallas as pl
from jax.experimental.pallas import tpu as pltpu

EPS = 1e-5


# -----------------------------------------------------------------------------
# Fused kernel: conv1+bn1+relu -> conv2+bn2 -> +identity -> relu
# -----------------------------------------------------------------------------
def _basic_block_kernel(xpad_ref, w1_ref, b1_ref, w2_ref, b2_ref, o_ref,
                        out1_ref, *, H, W, Cin, Cout, Cout_p):
    nb = xpad_ref.shape[0]
    M = nb * H * W

    def patches(xt, C):
        # In-kernel im2col: 9 shifted bf16 slices concatenated on the lane dim
        # -> (M, 9*C) patch matrix -> one MXU dot with contraction depth 9*C.
        taps = [xt[:, ky:ky + H, kx:kx + W, :]
                for ky in range(3) for kx in range(3)]
        return jnp.concatenate(taps, axis=-1).reshape(M, 9 * C)

    x = xpad_ref[...]                                     # (nb, H+2, W+2, Cin) bf16

    # ---- conv1 (+ folded BN1) + ReLU ----------------------------------------
    a1 = jnp.dot(patches(x, Cin), w1_ref[...],
                 preferred_element_type=jnp.float32)      # (M, Cout_p) f32
    h1 = jnp.maximum(a1 + b1_ref[...], 0.0)

    # Stage out1 in VMEM with a zero spatial halo so conv2 runs in the same
    # grid step (the intermediate never goes to HBM).
    out1_ref[...] = jnp.zeros_like(out1_ref)
    out1_ref[:, 1:H + 1, 1:W + 1, :] = (
        h1[:, :Cout].astype(jnp.bfloat16).reshape(nb, H, W, Cout))

    # ---- conv2 (+ folded BN2) + identity residual + ReLU --------------------
    a2 = jnp.dot(patches(out1_ref[...], Cout), w2_ref[...],
                 preferred_element_type=jnp.float32)      # (M, Cout_p) f32
    out = a2 + b2_ref[...]

    # Identity residual reused from the resident x tile (inplanes == planes).
    res = x[:, 1:H + 1, 1:W + 1, :].reshape(M, Cin).astype(jnp.float32)
    if Cout_p > Cin:
        res = jnp.concatenate(
            [res, jnp.zeros((M, Cout_p - Cin), jnp.float32)], axis=-1)
    out = out + res

    o_ref[...] = jnp.maximum(out, 0.0).astype(o_ref.dtype)


# -----------------------------------------------------------------------------
# Wrapper helpers
# -----------------------------------------------------------------------------
def _round_up(v, m):
    return (v + m - 1) // m * m


def _pick_band(N, hw, target_rows=4096):
    """Batch items per grid step.

    Constraints: nb divides N; nb*hw (output tile rows) is a multiple of 8;
    keep >= 2 grid steps when N >= 2 (v7x has 2 TensorCores sharding the
    'parallel' axis); nb*hw <= target_rows so per-step buffers stay well under
    the scoped-VMEM budget on every generation (incl. v7x's 64 MiB VMEM).
    """
    cands = [d for d in range(1, N + 1)
             if N % d == 0 and (d * hw) % 8 == 0
             and not (N >= 2 and N // d < 2)]
    if not cands:
        # Single full-extent block (always a legal BlockSpec); see TODO above.
        return N, N * hw
    fitting = [d for d in cands if d * hw <= target_rows]
    nb = max(fitting) if fitting else min(cands)
    return nb, nb * hw


def _fold_bn_into_weights(w_oihw, gamma, beta, mean, var, cout_p):
    """Fold inference BN into the conv: returns ((9*Cin, cout_p) bf16 weights
    laid out to match the in-kernel patch (row = (ky*3+kx)*Cin + ci) and a
    (1, cout_p) f32 bias; Cout is zero-padded to cout_p lanes."""
    cout, cin = w_oihw.shape[0], w_oihw.shape[1]
    scale = gamma / jnp.sqrt(var + EPS)
    bias = beta - mean * scale
    w = jnp.transpose(w_oihw, (2, 3, 1, 0))               # (ky, kx, ci, co)
    w = (w * scale[None, None, None, :]).reshape(9 * cin, cout)
    w = jnp.pad(w, ((0, 0), (0, cout_p - cout))).astype(jnp.bfloat16)
    b = jnp.pad(bias, (0, cout_p - cout)).reshape(1, cout_p).astype(jnp.float32)
    return w, b


# -----------------------------------------------------------------------------
# Parameters and BasicBlock forward
# -----------------------------------------------------------------------------
def init_basic_block_params(key, inplanes, planes):
    ks = jax.random.split(key, 10)

    def conv_init(kk, cout, cin):  # kaiming-uniform-ish, deterministic
        bound = 1.0 / np.sqrt(cin * 9)
        return jax.random.uniform(kk, (cout, cin, 3, 3), jnp.float32, -bound, bound)

    return {
        "conv1_w": conv_init(ks[0], planes, inplanes),          # OIHW
        "conv2_w": conv_init(ks[1], planes, planes),            # OIHW
        "bn1_gamma": 1.0 + 0.1 * jax.random.normal(ks[2], (planes,), jnp.float32),
        "bn1_beta": 0.1 * jax.random.normal(ks[3], (planes,), jnp.float32),
        "bn1_mean": 0.05 * jax.random.normal(ks[4], (planes,), jnp.float32),
        "bn1_var": 1.0 + 0.1 * jax.random.uniform(ks[5], (planes,), jnp.float32),
        "bn2_gamma": 1.0 + 0.1 * jax.random.normal(ks[6], (planes,), jnp.float32),
        "bn2_beta": 0.1 * jax.random.normal(ks[7], (planes,), jnp.float32),
        "bn2_mean": 0.05 * jax.random.normal(ks[8], (planes,), jnp.float32),
        "bn2_var": 1.0 + 0.1 * jax.random.uniform(ks[9], (planes,), jnp.float32),
    }


def basic_block_forward(params, x_nchw, stride=1):
    """BasicBlock.forward (moeflag=False, downsample=None):
       relu(bn1(conv1(x))) -> bn2(conv2(.)) -> += x -> relu."""
    if stride != 1:
        raise NotImplementedError(
            "Pallas BasicBlock supports stride=1 / identity residual only "
            "(downsample=None).")

    x = jnp.transpose(x_nchw, (0, 2, 3, 1))                 # NCHW -> NHWC
    N, H, W, Cin = x.shape
    planes = params["conv1_w"].shape[0]
    if planes != Cin:
        raise NotImplementedError(
            "identity residual requires inplanes == planes (downsample=None).")
    Cout_p = _round_up(planes, 128)

    w1, b1 = _fold_bn_into_weights(params["conv1_w"], params["bn1_gamma"],
                                   params["bn1_beta"], params["bn1_mean"],
                                   params["bn1_var"], Cout_p)
    w2, b2 = _fold_bn_into_weights(params["conv2_w"], params["bn2_gamma"],
                                   params["bn2_beta"], params["bn2_mean"],
                                   params["bn2_var"], Cout_p)

    # Spatially padded (halo=1), channels-last, bf16 in HBM.
    xp = jnp.pad(x.astype(jnp.bfloat16), ((0, 0), (1, 1), (1, 1), (0, 0)))
    Hp, Wp = H + 2, W + 2

    nb, tm = _pick_band(N, H * W)
    grid = (N // nb,)
    M_total = N * H * W

    kernel = functools.partial(_basic_block_kernel, H=H, W=W,
                               Cin=Cin, Cout=planes, Cout_p=Cout_p)

    cost = pl.CostEstimate(
        flops=int(2 * M_total * 9 * Cin * planes
                  + 2 * M_total * 9 * planes * planes),
        transcendentals=0,
        bytes_accessed=int(xp.size * 2 + w1.size * 2 + w2.size * 2
                           + (b1.size + b2.size) * 4 + M_total * Cout_p * 2))

    out_p = pl.pallas_call(
        kernel,
        out_shape=jax.ShapeDtypeStruct((M_total, Cout_p), jnp.bfloat16),
        grid=grid,
        in_specs=[
            pl.BlockSpec((nb, Hp, Wp, Cin), lambda i: (i, 0, 0, 0)),
            pl.BlockSpec((9 * Cin, Cout_p), lambda i: (0, 0)),
            pl.BlockSpec((1, Cout_p), lambda i: (0, 0)),
            pl.BlockSpec((9 * planes, Cout_p), lambda i: (0, 0)),
            pl.BlockSpec((1, Cout_p), lambda i: (0, 0)),
        ],
        out_specs=pl.BlockSpec((tm, Cout_p), lambda i: (i, 0)),
        scratch_shapes=[pltpu.VMEM((nb, Hp, Wp, planes), jnp.bfloat16)],
        compiler_params=pltpu.CompilerParams(
            dimension_semantics=("parallel",)),
        cost_estimate=cost,
    )(xp, w1, b1, w2, b2)

    out = out_p[:, :planes].reshape(N, H, W, planes)
    return jnp.transpose(out, (0, 3, 1, 2)).astype(x_nchw.dtype)   # back to NCHW


# -----------------------------------------------------------------------------
# Pure-JAX reference (mirrors the PyTorch forward, eval-mode BN)
# -----------------------------------------------------------------------------
def reference_forward(params, x_nchw):
    def conv(x, w):
        return jax.lax.conv_general_dilated(
            x, w, (1, 1), "SAME", dimension_numbers=("NCHW", "OIHW", "NCHW"))

    def bn(x, g, b, m, v):
        g = g[None, :, None, None]
        b = b[None, :, None, None]
        m = m[None, :, None, None]
        v = v[None, :, None, None]
        return g * (x - m) / jnp.sqrt(v + EPS) + b

    out = jax.nn.relu(bn(conv(x_nchw, params["conv1_w"]),
                         params["bn1_gamma"], params["bn1_beta"],
                         params["bn1_mean"], params["bn1_var"]))
    out = bn(conv(out, params["conv2_w"]),
             params["bn2_gamma"], params["bn2_beta"],
             params["bn2_mean"], params["bn2_var"])
    return jax.nn.relu(out + x_nchw)


if __name__ == "__main__":
    key = jax.random.PRNGKey(0)
    kp, kx = jax.random.split(key)
    N, inplanes, planes, H, W = 2, 4, 4, 16, 16

    params = init_basic_block_params(kp, inplanes, planes)
    x = jax.random.normal(kx, (N, inplanes, H, W), jnp.float32)

    fwd = jax.jit(basic_block_forward)
    out = jax.block_until_ready(fwd(params, x))

    ref = reference_forward(params, x)
    assert out.shape == ref.shape == (N, planes, H, W)
    # bf16 activations/weights/output in the Pallas path -> loose tolerance.
    np.testing.assert_allclose(np.asarray(out), np.asarray(ref), rtol=5e-2, atol=5e-2)
    print("KERNEL_OK")
</pallas_src>

<mosaic_0001>
module attributes {stable_mosaic.version = 11 : i64} {
  func.func @_basic_block_kernel(%arg0: i32, %arg1: memref<1x18x18x4xbf16, #tpu.memory_space<vmem>>, %arg2: memref<36x128xbf16, #tpu.memory_space<vmem>>, %arg3: memref<1x128xf32, #tpu.memory_space<vmem>>, %arg4: memref<36x128xbf16, #tpu.memory_space<vmem>>, %arg5: memref<1x128xf32, #tpu.memory_space<vmem>>, %arg6: memref<256x128xbf16, #tpu.memory_space<vmem>>, %arg7: memref<1x18x18x4xbf16, #tpu.memory_space<vmem>>) attributes {dimension_semantics = [#tpu.dimension_semantics<parallel>], iteration_bounds = array<i64: 2>, scalar_prefetch = 0 : i64, scratch_operands = 1 : i64, tpu.core_type = #tpu.core_type<tc>, window_params = [{transform_indices = @transform_0, window_bounds = array<i64: 1, 18, 18, 4>}, {pipeline_mode = #tpu.pipeline_mode<synchronous>, transform_indices = @transform_1, window_bounds = array<i64: 36, 128>}, {pipeline_mode = #tpu.pipeline_mode<synchronous>, transform_indices = @transform_2, window_bounds = array<i64: 1, 128>}, {pipeline_mode = #tpu.pipeline_mode<synchronous>, transform_indices = @transform_3, window_bounds = array<i64: 36, 128>}, {pipeline_mode = #tpu.pipeline_mode<synchronous>, transform_indices = @transform_4, window_bounds = array<i64: 1, 128>}, {transform_indices = @transform_5, window_bounds = array<i64: 256, 128>}]} {
    %c0 = arith.constant 0 : index
    %c0_0 = arith.constant 0 : index
    %c0_1 = arith.constant 0 : index
    %c0_2 = arith.constant 0 : index
    %0 = vector.load %arg1[%c0, %c0_0, %c0_1, %c0_2] : memref<1x18x18x4xbf16, #tpu.memory_space<vmem>>, vector<1x18x18x4xbf16>
    %1 = vector.extract_strided_slice %0 {offsets = [0, 0, 0, 0], sizes = [1, 16, 16, 4], strides = [1, 1, 1, 1]} : vector<1x18x18x4xbf16> to vector<1x16x16x4xbf16>
    %2 = vector.extract_strided_slice %0 {offsets = [0, 0, 1, 0], sizes = [1, 16, 16, 4], strides = [1, 1, 1, 1]} : vector<1x18x18x4xbf16> to vector<1x16x16x4xbf16>
    %3 = vector.extract_strided_slice %0 {offsets = [0, 0, 2, 0], sizes = [1, 16, 16, 4], strides = [1, 1, 1, 1]} : vector<1x18x18x4xbf16> to vector<1x16x16x4xbf16>
    %4 = vector.extract_strided_slice %0 {offsets = [0, 1, 0, 0], sizes = [1, 16, 16, 4], strides = [1, 1, 1, 1]} : vector<1x18x18x4xbf16> to vector<1x16x16x4xbf16>
    %5 = vector.extract_strided_slice %0 {offsets = [0, 1, 1, 0], sizes = [1, 16, 16, 4], strides = [1, 1, 1, 1]} : vector<1x18x18x4xbf16> to vector<1x16x16x4xbf16>
    %6 = vector.extract_strided_slice %0 {offsets = [0, 1, 2, 0], sizes = [1, 16, 16, 4], strides = [1, 1, 1, 1]} : vector<1x18x18x4xbf16> to vector<1x16x16x4xbf16>
    %7 = vector.extract_strided_slice %0 {offsets = [0, 2, 0, 0], sizes = [1, 16, 16, 4], strides = [1, 1, 1, 1]} : vector<1x18x18x4xbf16> to vector<1x16x16x4xbf16>
    %8 = vector.extract_strided_slice %0 {offsets = [0, 2, 1, 0], sizes = [1, 16, 16, 4], strides = [1, 1, 1, 1]} : vector<1x18x18x4xbf16> to vector<1x16x16x4xbf16>
    %9 = vector.extract_strided_slice %0 {offsets = [0, 2, 2, 0], sizes = [1, 16, 16, 4], strides = [1, 1, 1, 1]} : vector<1x18x18x4xbf16> to vector<1x16x16x4xbf16>
    %10 = tpu.concatenate %1, %2, %3, %4, %5, %6, %7, %8, %9 in 3 : vector<1x16x16x4xbf16>, vector<1x16x16x4xbf16>, vector<1x16x16x4xbf16>, vector<1x16x16x4xbf16>, vector<1x16x16x4xbf16>, vector<1x16x16x4xbf16>, vector<1x16x16x4xbf16>, vector<1x16x16x4xbf16>, vector<1x16x16x4xbf16> -> vector<1x16x16x36xbf16>
    %11 = vector.shape_cast %10 : vector<1x16x16x36xbf16> to vector<256x36xbf16>
    %c0_3 = arith.constant 0 : index
    %c0_4 = arith.constant 0 : index
    %12 = vector.load %arg2[%c0_3, %c0_4] : memref<36x128xbf16, #tpu.memory_space<vmem>>, vector<36x128xbf16>
    %cst = arith.constant dense<0.000000e+00> : vector<256x128xf32>
    %13 = tpu.matmul %11, %12, %cst {dimension_numbers = #tpu.dot_dimension_numbers<[1], [0], [0], [1], [0, 0, 1, 1], [], []>} : vector<256x36xbf16>, vector<36x128xbf16>, vector<256x128xf32> -> vector<256x128xf32>
    %c0_5 = arith.constant 0 : index
    %c0_6 = arith.constant 0 : index
    %14 = vector.load %arg3[%c0_5, %c0_6] : memref<1x128xf32, #tpu.memory_space<vmem>>, vector<1x128xf32>
    %15 = vector.broadcast %14 : vector<1x128xf32> to vector<256x128xf32>
    %16 = arith.addf %13, %15 : vector<256x128xf32>
    %cst_7 = arith.constant 0.000000e+00 : f32
    %17 = vector.broadcast %cst_7 : f32 to vector<256x128xf32>
    %18 = arith.maximumf %16, %17 : vector<256x128xf32>
    %cst_8 = arith.constant 0.000000e+00 : bf16
    %19 = vector.broadcast %cst_8 : bf16 to vector<1x18x18x4xbf16>
    %c0_9 = arith.constant 0 : index
    %c0_10 = arith.constant 0 : index
    %c0_11 = arith.constant 0 : index
    %c0_12 = arith.constant 0 : index
    %20 = vector.load %arg7[%c0_9, %c0_10, %c0_11, %c0_12] : memref<1x18x18x4xbf16, #tpu.memory_space<vmem>>, vector<1x18x18x4xbf16>
    tpu.vector_store %arg7[%c0_9, %c0_10, %c0_11, %c0_12], %19 {strides = array<i32>} : memref<1x18x18x4xbf16, #tpu.memory_space<vmem>>, vector<1x18x18x4xbf16>,
    %21 = vector.extract_strided_slice %18 {offsets = [0, 0], sizes = [256, 4], strides = [1, 1]} : vector<256x128xf32> to vector<256x4xf32>
    %22 = arith.truncf %21 : vector<256x4xf32> to vector<256x4xbf16>
    %23 = vector.shape_cast %22 : vector<256x4xbf16> to vector<1x16x16x4xbf16>
    %c0_13 = arith.constant 0 : index
    %c1 = arith.constant 1 : index
    %c1_14 = arith.constant 1 : index
    %c0_15 = arith.constant 0 : index
    %24 = vector.load %arg7[%c0_13, %c1, %c1_14, %c0_15] : memref<1x18x18x4xbf16, #tpu.memory_space<vmem>>, vector<1x16x16x4xbf16>
    tpu.vector_store %arg7[%c0_13, %c1, %c1_14, %c0_15], %23 {strides = array<i32>} : memref<1x18x18x4xbf16, #tpu.memory_space<vmem>>, vector<1x16x16x4xbf16>,
    %c0_16 = arith.constant 0 : index
    %c0_17 = arith.constant 0 : index
    %c0_18 = arith.constant 0 : index
    %c0_19 = arith.constant 0 : index
    %25 = vector.load %arg7[%c0_16, %c0_17, %c0_18, %c0_19] : memref<1x18x18x4xbf16, #tpu.memory_space<vmem>>, vector<1x18x18x4xbf16>
    %26 = vector.extract_strided_slice %25 {offsets = [0, 0, 0, 0], sizes = [1, 16, 16, 4], strides = [1, 1, 1, 1]} : vector<1x18x18x4xbf16> to vector<1x16x16x4xbf16>
    %27 = vector.extract_strided_slice %25 {offsets = [0, 0, 1, 0], sizes = [1, 16, 16, 4], strides = [1, 1, 1, 1]} : vector<1x18x18x4xbf16> to vector<1x16x16x4xbf16>
    %28 = vector.extract_strided_slice %25 {offsets = [0, 0, 2, 0], sizes = [1, 16, 16, 4], strides = [1, 1, 1, 1]} : vector<1x18x18x4xbf16> to vector<1x16x16x4xbf16>
    %29 = vector.extract_strided_slice %25 {offsets = [0, 1, 0, 0], sizes = [1, 16, 16, 4], strides = [1, 1, 1, 1]} : vector<1x18x18x4xbf16> to vector<1x16x16x4xbf16>
    %30 = vector.extract_strided_slice %25 {offsets = [0, 1, 1, 0], sizes = [1, 16, 16, 4], strides = [1, 1, 1, 1]} : vector<1x18x18x4xbf16> to vector<1x16x16x4xbf16>
    %31 = vector.extract_strided_slice %25 {offsets = [0, 1, 2, 0], sizes = [1, 16, 16, 4], strides = [1, 1, 1, 1]} : vector<1x18x18x4xbf16> to vector<1x16x16x4xbf16>
    %32 = vector.extract_strided_slice %25 {offsets = [0, 2, 0, 0], sizes = [1, 16, 16, 4], strides = [1, 1, 1, 1]} : vector<1x18x18x4xbf16> to vector<1x16x16x4xbf16>
    %33 = vector.extract_strided_slice %25 {offsets = [0, 2, 1, 0], sizes = [1, 16, 16, 4], strides = [1, 1, 1, 1]} : vector<1x18x18x4xbf16> to vector<1x16x16x4xbf16>
    %34 = vector.extract_strided_slice %25 {offsets = [0, 2, 2, 0], sizes = [1, 16, 16, 4], strides = [1, 1, 1, 1]} : vector<1x18x18x4xbf16> to vector<1x16x16x4xbf16>
    %35 = tpu.concatenate %26, %27, %28, %29, %30, %31, %32, %33, %34 in 3 : vector<1x16x16x4xbf16>, vector<1x16x16x4xbf16>, vector<1x16x16x4xbf16>, vector<1x16x16x4xbf16>, vector<1x16x16x4xbf16>, vector<1x16x16x4xbf16>, vector<1x16x16x4xbf16>, vector<1x16x16x4xbf16>, vector<1x16x16x4xbf16> -> vector<1x16x16x36xbf16>
    %36 = vector.shape_cast %35 : vector<1x16x16x36xbf16> to vector<256x36xbf16>
    %c0_20 = arith.constant 0 : index
    %c0_21 = arith.constant 0 : index
    %37 = vector.load %arg4[%c0_20, %c0_21] : memref<36x128xbf16, #tpu.memory_space<vmem>>, vector<36x128xbf16>
    %cst_22 = arith.constant dense<0.000000e+00> : vector<256x128xf32>
    %38 = tpu.matmul %36, %37, %cst_22 {dimension_numbers = #tpu.dot_dimension_numbers<[1], [0], [0], [1], [0, 0, 1, 1], [], []>} : vector<256x36xbf16>, vector<36x128xbf16>, vector<256x128xf32> -> vector<256x128xf32>
    %c0_23 = arith.constant 0 : index
    %c0_24 = arith.constant 0 : index
    %39 = vector.load %arg5[%c0_23, %c0_24] : memref<1x128xf32, #tpu.memory_space<vmem>>, vector<1x128xf32>
    %40 = vector.broadcast %39 : vector<1x128xf32> to vector<256x128xf32>
    %41 = arith.addf %38, %40 : vector<256x128xf32>
    %42 = vector.extract_strided_slice %0 {offsets = [0, 1, 1, 0], sizes = [1, 16, 16, 4], strides = [1, 1, 1, 1]} : vector<1x18x18x4xbf16> to vector<1x16x16x4xbf16>
    %43 = vector.shape_cast %42 : vector<1x16x16x4xbf16> to vector<256x4xbf16>
    %44 = arith.extf %43 : vector<256x4xbf16> to vector<256x4xf32>
    %cst_25 = arith.constant 0.000000e+00 : f32
    %45 = vector.broadcast %cst_25 : f32 to vector<256x124xf32>
    %46 = tpu.concatenate %44, %45 in 1 : vector<256x4xf32>, vector<256x124xf32> -> vector<256x128xf32>
    %47 = arith.addf %41, %46 : vector<256x128xf32>
    %cst_26 = arith.constant 0.000000e+00 : f32
    %48 = vector.broadcast %cst_26 : f32 to vector<256x128xf32>
    %49 = arith.maximumf %47, %48 : vector<256x128xf32>
    %50 = arith.truncf %49 : vector<256x128xf32> to vector<256x128xbf16>
    %c0_27 = arith.constant 0 : index
    %c0_28 = arith.constant 0 : index
    %51 = vector.load %arg6[%c0_27, %c0_28] : memref<256x128xbf16, #tpu.memory_space<vmem>>, vector<256x128xbf16>
    tpu.vector_store %arg6[%c0_27, %c0_28], %50 {strides = array<i32>} : memref<256x128xbf16, #tpu.memory_space<vmem>>, vector<256x128xbf16>,
    return
  }
  func.func @transform_0(%arg0: i32) -> (i32, i32, i32, i32) {
    %c0_i32 = arith.constant 0 : i32
    %c0_i32_0 = arith.constant 0 : i32
    %c0_i32_1 = arith.constant 0 : i32
    %c0_i32_2 = arith.constant 0 : i32
    return %arg0, %c0_i32, %c0_i32_0, %c0_i32_1 : i32, i32, i32, i32
  }
  func.func @transform_1(%arg0: i32) -> (i32, i32) {
    %c0_i32 = arith.constant 0 : i32
    %c0_i32_0 = arith.constant 0 : i32
    %c0_i32_1 = arith.constant 0 : i32
    return %c0_i32, %c0_i32_0 : i32, i32
  }
  func.func @transform_2(%arg0: i32) -> (i32, i32) {
    %c0_i32 = arith.constant 0 : i32
    %c0_i32_0 = arith.constant 0 : i32
    %c0_i32_1 = arith.constant 0 : i32
    return %c0_i32, %c0_i32_0 : i32, i32
  }
  func.func @transform_3(%arg0: i32) -> (i32, i32) {
    %c0_i32 = arith.constant 0 : i32
    %c0_i32_0 = arith.constant 0 : i32
    %c0_i32_1 = arith.constant 0 : i32
    return %c0_i32, %c0_i32_0 : i32, i32
  }
  func.func @transform_4(%arg0: i32) -> (i32, i32) {
    %c0_i32 = arith.constant 0 : i32
    %c0_i32_0 = arith.constant 0 : i32
    %c0_i32_1 = arith.constant 0 : i32
    return %c0_i32, %c0_i32_0 : i32, i32
  }
  func.func @transform_5(%arg0: i32) -> (i32, i32) {
    %c0_i32 = arith.constant 0 : i32
    %c0_i32_0 = arith.constant 0 : i32
    return %arg0, %c0_i32 : i32, i32
  }
}

</mosaic_0001>

<bundles_post_ra>
// kernel: basic_block_forward.1
= control target key start
LH: loop header
LB: loop body
LE: loop exit
PB: predicated region body
PF: predicated region fallthrough
CT: control target
= control target key end

     0   :  { %s4169_s18 = smov 0   ;;  %s6250_s0 = inlined_call_operand.vmem [shape: bf16[2,18,18,4], index: 0, kind: input, shape index: {}]   ;;  %s6251_s1 = inlined_call_operand.vmem [shape: bf16[36,128], index: 1, kind: input, shape index: {}]   ;;  %s6252_s2 = inlined_call_operand.vmem [shape: f32[1,128], index: 2, kind: input, shape index: {}]   ;;  %s6253_s3 = inlined_call_operand.vmem [shape: bf16[36,128], index: 3, kind: input, shape index: {}]   ;;  %s6254_s4 = inlined_call_operand.vmem [shape: f32[1,128], index: 4, kind: input, shape index: {}]   ;;  %s6255_s5 = inlined_call_operand.vmem [shape: bf16[512,128], index: 5, kind: output, shape index: {}]  }
   0x1 LB: > { %s4175_s19 = sadd.s32 4294967295, %s4128_s18   ;;  %p3727_p0 = scmp.ge.s32.totalorder %s4128_s18, 1  ;;  %s4128_s18 = sphi %s4169_s18, %s15_s18  }
   0x2   : > { %p187_p1 = scmp.lt.s32.totalorder %s4128_s18, 3 }
   0x4   : > { %p188_p2 = pnand %p3727_p0, %p187_p1 }
   0x6   : > { %191 = sbr.rel (%p188_p2) target bundleno = 1191 (0x4a7), region = 40 }
   0xb   : > { %p215_p3 = scmp.lt.s32.totalorder %s4175_s19, 1  ;;  %vm6258_vm0 = vsmask.f32 7424  ;;  %s4130_s25 = smov 4   ;;  %vm6257_vm1 = vcmask 1046528   ;;  %vm6256_vm2 = vcmask 1041408  }
   0xc   : > { %s4131_s26 = smov 8   ;;  %s4132_s27 = smov 12   ;;  %vm953_vm3 = vcmask 31744   ;;  %vm1019_vm4 = vcmask 97280   ;;  %vm986_vm5 = vcmask 64512   ;;  %vm1052_vm6 = vcmask 130048  }
   0xd   : > { %s216_s20 = scalar_select %p215_p3, %s4175_s19, 1  ;;  %vm1085_vm7 = vcmask 162816   ;;  %vm1118_vm8 = vcmask 195584   ;;  %vm1151_vm9 = vcmask 228352   ;;  %vm1184_vm10 = vcmask 261120  }
   0xe   : > { %s4133_s28 = smov 16   ;;  %s4134_s29 = smov 28   ;;  %vm1241_vm11 = vcmask 293888   ;;  %vm1399_vm12 = vcmask 27648   ;;  %vm1402_vm13 = vcmask 24576  }
   0xf   : > { %s4066_s21 = smul.u32 216, %s216_s20  ;;  %s4135_s30 = smov 24   ;;  %vm1812_vm14 = vsmask.f32 7938 }
  0x10   : > { %s4136_s6 = smov 20   ;;  %s4137_s7 = smov 32   ;;  %vm5051_vm15 = vmand %vm1399_vm12, %vm1812_vm14  ;;  %vm1487_vm14 = vsmask.f32 256 }
  0x11   : > { %s4184_s24 = scalar_lea.vmem %s6250_s0, %s4066_s21 }
  0x12   : > { %v4187_v0 = vld [vmem:[%s4184_s24 + $0x30] sm:$0xff]  ;;  %v241_v1 = vld [vmem:[%s4184_s24 + $0x38] sm:$0x1]  ;;  %v235_v4 = vld [vmem:[%s4184_s24 + $0x20] sm:$0x1] }
  0x13   : > { %v4191_v2 = vld [vmem:[%s4184_s24 + $0x18] sm:$0xff]  ;;  %v381_v3 = vunpack.c.l.b16 %v241_v1  ;;  %v4195_v5 = vld [vmem:[%s4184_s24] sm:$0xff]  ;;  %v229_v6 = vld [vmem:[%s4184_s24 + $0x8] sm:$0x1]  ;;  %v459_v7 = vshrl.u32 %v4187_v0, 16  ;;  %v461_v8 = vshll.u32 %v4187_v0, 16  ;;  %v379_v9 = vunpack.c.l.b16 %v235_v4 }
  0x14   : > { %v435_v10 = vshrl.u32 %v4191_v2, 16  ;;  %v244_v11 = vld [vmem:[%s4184_s24 + $0x44] sm:$0x1]  ;;  %v437_v13 = vshll.u32 %v4191_v2, 16  ;;  %v377_v14 = vunpack.c.l.b16 %v229_v6  ;;  %v411_v15 = vshrl.u32 %v4195_v5, 16  ;;  %v4207_v16 = vld [vmem:[%s4184_s24 + $0x3c] sm:$0xff] }
  0x15   : > { %v4202_v12 = vpack.c.b16 %v381_v3, %v381_v3  ;;  %v463_v17 = vrot.slane %v461_v8, 1  ;;  %v4209_v18 = vpack.c.b16 %v379_v9, %v379_v9  ;;  %v413_v19 = vshll.u32 %v4195_v5, 16  ;;  %v238_v25 = vld [vmem:[%s4184_s24 + $0x2c] sm:$0x1]  ;;  %v4221_v30 = vld [vmem:[%s4184_s24 + $0x24] sm:$0xff]  ;;  %v4254_v59 = vld [vmem:[%s4184_s24 + $0x54] sm:$0xff] }
  0x16   : > { %v382_v20 = vunpack.c.l.b16 %v244_v11  ;;  %v439_v22 = vrot.slane %v437_v13, 1  ;;  %v4213_v23 = vpack.c.b16 %v377_v14, %v377_v14  ;;  %v471_v24 = vshrl.u32 %v4207_v16, 16  ;;  %v4227_v39 = vld [vmem:[%s4184_s24 + $0xc] sm:$0xff]  ;;  %v232_v40 = vld [vmem:[%s4184_s24 + $0x14] sm:$0x1]  ;;  %v4235_v45 = vld [vmem:[%s4184_s24 + $0x60] sm:$0xff] }
  0x17   : > { %v466_v21 = vshll.u32 %v4202_v12, 16  ;;  %v464_v26 = vor.u32 %v463_v17, %v459_v7  ;;  %v442_v27 = vshll.u32 %v4209_v18, 16  ;;  %v415_v28 = vrot.slane %v413_v19, 1  ;;  %v253_v46 = vld [vmem:[%s4184_s24 + $0x68] sm:$0x1] }
  0x18   : > { %v4218_v29 = vpack.c.b16 %v382_v20, %v382_v20  ;;  %v440_v32 = vor.u32 %v439_v22, %v435_v10  ;;  %v418_v33 = vshll.u32 %v4213_v23, 16  ;;  %v473_v34 = vshll.u32 %v4207_v16, 16  ;;  %v250_v60 = vld [vmem:[%s4184_s24 + $0x5c] sm:$0x1]  ;;  %v4267_v8 = vld [vmem:[%s4184_s24 + $0x48] sm:$0xff] }
  0x19   : > { %v468_v31 = vrot.slane %v466_v21, 1  ;;  %v444_v35 = vrot.slane %v442_v27, 1  ;;  %v416_v36 = vor.u32 %v415_v28, %v411_v15  ;;  %v380_v38 = vunpack.c.l.b16 %v238_v25  ;;  %v247_v9 = vld [vmem:[%s4184_s24 + $0x50] sm:$0x1]  ;;  %v262_v21 = vld [vmem:[%s4184_s24 + $0x8c] sm:$0x1] }
  0x1a   : > { %v478_v37 = vshll.u32 %v4218_v29, 16  ;;  %v420_v42 = vrot.slane %v418_v33, 1  ;;  %v475_v43 = vrot.slane %v473_v34, 1  ;;  %v447_v44 = vshrl.u32 %v4221_v30, 16  ;;  %v4281_v27 = vld [vmem:[%s4184_s24 + $0x84] sm:$0xff]  ;;  %v4288_v34 = vld [vmem:[%s4184_s24 + $0x78] sm:$0xff] }
  0x1b   : > { %v4231_v41 = vsel %vm6258_vm0, %v464_v26, %v468_v31  ;;  %v4241_v47 = vsel %vm6258_vm0, %v440_v32, %v444_v35  ;;  %v4243_v49 = vpack.c.b16 %v380_v38, %v380_v38  ;;  %v449_v50 = vshll.u32 %v4221_v30, 16 }
  0x1c   : > { %610 = vrot.lane.b32.xlu2 %v4231_v41, %s4130_s25  ;;  %v480_v48 = vrot.slane %v478_v37, 1  ;;  %606 = vrot.lane.b32.xlu1 %v4241_v47, %s4130_s25  ;;  %v421_v51 = vsel %vm6258_vm0, %v416_v36, %v420_v42  ;;  %v476_v52 = vor.u32 %v475_v43, %v471_v24  ;;  %v378_v53 = vunpack.c.l.b16 %v232_v40  ;;  %v259_v40 = vld [vmem:[%s4184_s24 + $0x80] sm:$0x1] }
  0x1d   : > { %v423_v54 = vshrl.u32 %v4227_v39, 16  ;;  %602 = vrot.lane.b32.xlu0 %v421_v51, %s4130_s25  ;;  %v451_v55 = vrot.slane %v449_v50, 1  ;;  %v454_v56 = vshll.u32 %v4243_v49, 16  ;;  %v425_v57 = vshll.u32 %v4227_v39, 16 }
  0x1e   : > { %v385_v58 = vunpack.c.l.b16 %v253_v46  ;;  %v4258_v61 = vsel %vm6258_vm0, %v476_v52, %v480_v48  ;;  %v4260_v62 = vpack.c.b16 %v378_v53, %v378_v53  ;;  %v507_v63 = vshrl.u32 %v4235_v45, 16  ;;  %v4307_v52 = vld [vmem:[%s4184_s24 + $0x6c] sm:$0xff]  ;;  %v256_v53 = vld [vmem:[%s4184_s24 + $0x74] sm:$0x1] }
  0x1f   : > { %v509_v1 = vshll.u32 %v4235_v45, 16  ;;  %v452_v3 = vor.u32 %v451_v55, %v447_v44  ;;  %v456_v4 = vrot.slane %v454_v56, 1  ;;  %v427_v6 = vrot.slane %v425_v57, 1 }
  0x20   : > { %v4264_v7 = vpack.c.b16 %v385_v58, %v385_v58  ;;  %v430_v10 = vshll.u32 %v4260_v62, 16  ;;  %v384_v13 = vunpack.c.l.b16 %v250_v60  ;;  %v495_v14 = vshrl.u32 %v4254_v59, 16  ;;  %v4315_v58 = vld [vmem:[%s4184_s24 + $0xa8] sm:$0xff] }
  0x21   : > { %v511_v11 = vrot.slane %v509_v1, 1  ;;  %v4273_v15 = vsel %vm6258_vm0, %v452_v3, %v456_v4  ;;  %v428_v17 = vor.u32 %v427_v6, %v423_v54  ;;  %v497_v20 = vshll.u32 %v4254_v59, 16  ;;  %v271_v4 = vld [vmem:[%s4184_s24 + $0xb0] sm:$0x1] }
  0x22   : > { %v514_v19 = vshll.u32 %v4264_v7, 16  ;;  %v432_v22 = vrot.slane %v430_v10, 1  ;;  %v4278_v25 = vpack.c.b16 %v384_v13, %v384_v13  ;;  %v383_v26 = vunpack.c.l.b16 %v247_v9 }
  0x23   : > { %v512_v24 = vor.u32 %v511_v11, %v507_v63  ;;  %v499_v31 = vrot.slane %v497_v20, 1  ;;  %v483_v32 = vshrl.u32 %v4267_v8, 16  ;;  %v485_v33 = vshll.u32 %v4267_v8, 16  ;;  %v4331_v20 = vld [vmem:[%s4184_s24 + $0x9c] sm:$0xff] }
  0x24   : > { %612 = vrot.lane.b32.xlu2 %v4258_v61, %s4130_s25  ;;  %v516_v28 = vrot.slane %v514_v19, 1  ;;  %608 = vrot.lane.b32.xlu1 %v4273_v15, %s4130_s25  ;;  %v4293_v35 = vsel %vm6258_vm0, %v428_v17, %v432_v22  ;;  %v502_v36 = vshll.u32 %v4278_v25, 16  ;;  %v4296_v37 = vpack.c.b16 %v383_v26, %v383_v26 }
  0x25   : > { %v388_v38 = vunpack.c.l.b16 %v262_v21  ;;  %604 = vrot.lane.b32.xlu0 %v4293_v35, %s4130_s25  ;;  %v500_v42 = vor.u32 %v499_v31, %v495_v14  ;;  %v487_v43 = vrot.slane %v485_v33, 1  ;;  %v543_v44 = vshrl.u32 %v4281_v27, 16  ;;  %v268_v21 = vld [vmem:[%s4184_s24 + $0xa4] sm:$0x1] }
  0x26   : > { %v504_v46 = vrot.slane %v502_v36, 1  ;;  %v490_v48 = vshll.u32 %v4296_v37, 16  ;;  %v545_v51 = vshll.u32 %v4281_v27, 16  ;;  %v4311_v54 = vsel %vm6258_vm0, %v512_v24, %v516_v28 }
  0x27   : > { %v4303_v50 = vpack.c.b16 %v388_v38, %v388_v38  ;;  %v488_v55 = vor.u32 %v487_v43, %v483_v32  ;;  %v387_v56 = vunpack.c.l.b16 %v259_v40  ;;  %v533_v57 = vshll.u32 %v4288_v34, 16  ;;  %v4348_v43 = vld [vmem:[%s4184_s24 + $0x90] sm:$0xff] }
  0x28   : > { %v492_v60 = vrot.slane %v490_v48, 1  ;;  %v547_v63 = vrot.slane %v545_v51, 1  ;;  %v531_v3 = vshrl.u32 %v4288_v34, 16  ;;  %v4321_v6 = vsel %vm6258_vm0, %v500_v42, %v504_v46 }
  0x29   : > { %v550_v1 = vshll.u32 %v4303_v50, 16  ;;  %v4323_v9 = vpack.c.b16 %v387_v56, %v387_v56  ;;  %v535_v10 = vrot.slane %v533_v57, 1  ;;  %v386_v11 = vunpack.c.l.b16 %v256_v53 }
  0x2a   : > { %v4326_v13 = vsel %vm6258_vm0, %v488_v55, %v492_v60  ;;  %v548_v14 = vor.u32 %v547_v63, %v543_v44  ;;  %v519_v17 = vshrl.u32 %v4307_v52, 16  ;;  %v521_v19 = vshll.u32 %v4307_v52, 16  ;;  %v265_v44 = vld [vmem:[%s4184_s24 + $0x98] sm:$0x1] }
  0x2b   : > { %v552_v22 = vrot.slane %v550_v1, 1  ;;  %v538_v24 = vshll.u32 %v4323_v9, 16  ;;  %v4337_v26 = vpack.c.b16 %v386_v11, %v386_v11  ;;  %v391_v28 = vunpack.c.l.b16 %v271_v4 }
  0x2c   : > { %618 = vrot.lane.b32.xlu2 %v4311_v54, %s4130_s25  ;;  %616 = vrot.lane.b32.xlu1 %v4321_v6, %s4130_s25  ;;  %v536_v31 = vor.u32 %v535_v10, %v531_v3  ;;  %v523_v32 = vrot.slane %v521_v19, 1  ;;  %v581_v33 = vshll.u32 %v4315_v58, 16  ;;  %v390_v42 = vunpack.c.l.b16 %v268_v21 }
  0x2d   : > { %614 = vrot.lane.b32.xlu0 %v4326_v13, %s4130_s25  ;;  %v540_v36 = vrot.slane %v538_v24, 1  ;;  %v526_v38 = vshll.u32 %v4337_v26, 16  ;;  %v4345_v40 = vpack.c.b16 %v391_v28, %v391_v28  ;;  %v569_v48 = vshll.u32 %v4331_v20, 16 }
  0x2e   : > { %v524_v46 = vor.u32 %v523_v32, %v519_v17  ;;  %v4353_v51 = vsel %vm6258_vm0, %v548_v14, %v552_v22  ;;  %v579_v55 = vshrl.u32 %v4315_v58, 16  ;;  %v4356_v56 = vpack.c.b16 %v390_v42, %v390_v42  ;;  %v274_v14 = vld [vmem:[%s4184_s24 + $0xbc] sm:$0x1]  ;;  %v4373_v22 = vld [vmem:[%s4184_s24 + $0xb4] sm:$0xff] }
  0x2f   : > { %v528_v53 = vrot.slane %v526_v38, 1  ;;  %v583_v57 = vrot.slane %v581_v33, 1  ;;  %v586_v60 = vshll.u32 %v4345_v40, 16  ;;  %v567_v63 = vshrl.u32 %v4331_v20, 16 }
  0x30   : > { %v389_v1 = vunpack.c.l.b16 %v265_v44  ;;  %v4361_v3 = vsel %vm6258_vm0, %v536_v31, %v540_v36  ;;  %v571_v4 = vrot.slane %v569_v48, 1  ;;  %v574_v10 = vshll.u32 %v4356_v56, 16 }
  0x31   : > { %v557_v11 = vshll.u32 %v4348_v43, 16  ;;  %v4367_v17 = vsel %vm6258_vm0, %v524_v46, %v528_v53  ;;  %v555_v21 = vshrl.u32 %v4348_v43, 16  ;;  %v584_v28 = vor.u32 %v583_v57, %v579_v55 }
  0x32   : > { %v4369_v19 = vpack.c.b16 %v389_v1, %v389_v1  ;;  %v588_v31 = vrot.slane %v586_v60, 1  ;;  %v392_v33 = vunpack.c.l.b16 %v274_v14  ;;  %v572_v36 = vor.u32 %v571_v4, %v567_v63 }
  0x33   : > { %v559_v24 = vrot.slane %v557_v11, 1  ;;  %v576_v38 = vrot.slane %v574_v10, 1  ;;  %v593_v48 = vshll.u32 %v4373_v22, 16  ;;  %v591_v60 = vshrl.u32 %v4373_v22, 16 }
  0x34   : > { %624 = vrot.lane.b32.xlu2 %v4353_v51, %s4130_s25  ;;  %622 = vrot.lane.b32.xlu1 %v4361_v3, %s4130_s25  ;;  %v562_v32 = vshll.u32 %v4369_v19, 16  ;;  %v4382_v46 = vpack.c.b16 %v392_v33, %v392_v33  ;;  %v4386_v53 = vsel %vm6258_vm0, %v584_v28, %v588_v31  ;;  %v638_v4 = vrot.slane %v4227_v39, 1 }
  0x35   : > { %620 = vrot.lane.b32.xlu0 %v4367_v17, %s4130_s25  ;;  %v560_v42 = vor.u32 %v559_v24, %v555_v21  ;;  %v4389_v55 = vsel %vm6258_vm0, %v572_v36, %v576_v38  ;;  %v595_v1 = vrot.slane %v593_v48, 1  ;;  %v639_v10 = vrot.slane %v4260_v62, 1 }
  0x36   : > { %v564_v44 = vrot.slane %v562_v32, 1  ;;  %v598_v63 = vshll.u32 %v4382_v46, 16  ;;  %v635_v11 = vrot.slane %v4195_v5, 1  ;;  %v636_v14 = vrot.slane %v4213_v23, 1 }
  0x37   : > { %v596_v21 = vor.u32 %v595_v1, %v591_v60  ;;  %v4407_v28 = vsel %vm6257_vm1, %v638_v4, %v639_v10  ;;  %v647_v62 = vrot.slane %v4187_v0, 1  ;;  %v648_v23 = vrot.slane %v4202_v12, 1 }
  0x38   : > { %v4392_v57 = vsel %vm6258_vm0, %v560_v42, %v564_v44  ;;  %v600_v24 = vrot.slane %v598_v63, 1  ;;  %v637_v31 = vsel %vm6257_vm1, %v635_v11, %v636_v14  ;;  %v644_v33 = vrot.slane %v4221_v30, 1 }
  0x39   : > { %v645_v36 = vrot.slane %v4243_v49, 1  ;;  %v641_v38 = vrot.slane %v4191_v2, 1  ;;  %v642_v42 = vrot.slane %v4209_v18, 1  ;;  %v4425_v44 = vsel %vm6257_vm1, %v647_v62, %v648_v23 }
  0x3a   : > { %v4411_v32 = vsel %vm6258_vm0, %v596_v21, %v600_v24  ;;  %v656_v12 = vrot.slane %v4254_v59, 1  ;;  %v657_v49 = vrot.slane %v4278_v25, 1  ;;  %v653_v18 = vrot.slane %v4267_v8, 1 }
  0x3b   : > { %v4428_v48 = vsel %vm6257_vm1, %v644_v33, %v645_v36  ;;  %v4431_v60 = vsel %vm6257_vm1, %v641_v38, %v642_v42  ;;  %v654_v1 = vrot.slane %v4296_v37, 1  ;;  %v650_v63 = vrot.slane %v4207_v16, 1 }
  0x3c   : > { %630 = vrot.lane.b32.xlu2 %v4386_v53, %s4130_s25  ;;  %628 = vrot.lane.b32.xlu1 %v4389_v55, %s4130_s25  ;;  %v651_v4 = vrot.slane %v4218_v29, 1  ;;  %v4446_v10 = vsel %vm6257_vm1, %v656_v12, %v657_v49  ;;  %v665_v25 = vrot.slane %v4288_v34, 1  ;;  %v666_v37 = vrot.slane %v4323_v9, 1 }
  0x3d   : > { %626 = vrot.lane.b32.xlu0 %v4392_v57, %s4130_s25  ;;  %v4449_v11 = vsel %vm6257_vm1, %v653_v18, %v654_v1  ;;  %v662_v29 = vrot.slane %v4307_v52, 1  ;;  %v663_v21 = vrot.slane %v4337_v26, 1  ;;  %v659_v24 = vrot.slane %v4235_v45, 1 }
  0x3e   : > { %v4452_v14 = vsel %vm6257_vm1, %v650_v63, %v651_v4  ;;  %v4467_v62 = vsel %vm6257_vm1, %v665_v25, %v666_v37  ;;  %v674_v9 = vrot.slane %v4331_v20, 1  ;;  %v675_v26 = vrot.slane %v4356_v56, 1 }
  0x3f   : > { %v4470_v23 = vsel %vm6257_vm1, %v662_v29, %v663_v21  ;;  %v672_v36 = vrot.slane %v4369_v19, 1  ;;  %v668_v38 = vrot.slane %v4281_v27, 1  ;;  %v669_v42 = vrot.slane %v4303_v50, 1 }
  0x40   : > { %v4488_v12 = vsel %vm6257_vm1, %v674_v9, %v675_v26  ;;  %v680_v50 = vrot.slane %v4373_v22, 1  ;;  %v681_v56 = vrot.slane %v4382_v46, 1  ;;  %v677_v19 = vrot.slane %v4315_v58, 1 }
  0x41   : > { %v4494_v18 = vsel %vm6257_vm1, %v668_v38, %v669_v42  ;;  %v678_v1 = vrot.slane %v4345_v40, 1 }
  0x42   : > { %v4507_v63 = vsel %vm6257_vm1, %v680_v50, %v681_v56 }
  0x43   : > { %v4510_v4 = vsel %vm6257_vm1, %v677_v19, %v678_v1 }
  0x44   : > { %685 = vrot.lane.b32.xlu2 %v4407_v28, %s4131_s26  ;;  %683 = vrot.lane.b32.xlu1 %v637_v31, %s4131_s26  ;;  %v660_v31 = vrot.slane %v4264_v7, 1  ;;  %v671_v7 = vrot.slane %v4348_v43, 1 }
  0x45   : > { %632 = vrot.lane.b32.xlu0 %v4411_v32, %s4130_s25 }
  0x46   : > { %v4473_v33 = vsel %vm6257_vm1, %v659_v24, %v660_v31  ;;  %v4491_v49 = vsel %vm6257_vm1, %v671_v7, %v672_v36  ;;  %v4579_v36 = vld [vmem:[%s4184_s24 + $0xc0] sm:$0xff] }
  0x4c   : > { %691 = vrot.lane.b32.xlu2 %v4425_v44, %s4131_s26  ;;  %689 = vrot.lane.b32.xlu1 %v4428_v48, %s4131_s26 }
  0x4d   : > { %687 = vrot.lane.b32.xlu0 %v4431_v60, %s4131_s26 }
  0x54   : > { %697 = vrot.lane.b32.xlu2 %v4446_v10, %s4131_s26  ;;  %695 = vrot.lane.b32.xlu1 %v4449_v11, %s4131_s26 }
  0x55   : > { %693 = vrot.lane.b32.xlu0 %v4452_v14, %s4131_s26 }
  0x5c   : > { %703 = vrot.lane.b32.xlu2 %v4467_v62, %s4131_s26  ;;  %701 = vrot.lane.b32.xlu1 %v4470_v23, %s4131_s26 }
  0x5d   : > { %699 = vrot.lane.b32.xlu0 %v4473_v33, %s4131_s26 }
  0x64   : > { %709 = vrot.lane.b32.xlu2 %v4488_v12, %s4131_s26  ;;  %707 = vrot.lane.b32.xlu1 %v4491_v49, %s4131_s26 }
  0x65   : > { %705 = vrot.lane.b32.xlu0 %v4494_v18, %s4131_s26 }
  0x6c   : > { %720 = vrot.lane.b32.xlu2 %v4227_v39, %s4132_s27  ;;  %713 = vrot.lane.b32.xlu1 %v4507_v63, %s4131_s26 }
  0x6d   : > { %711 = vrot.lane.b32.xlu0 %v4510_v4, %s4131_s26 }
  0x74   : > { %726 = vrot.lane.b32.xlu2 %v4187_v0, %s4132_s27  ;;  %724 = vrot.lane.b32.xlu1 %v4221_v30, %s4132_s27 }
  0x75   : > { %722 = vrot.lane.b32.xlu0 %v4191_v2, %s4132_s27 }
  0x76   : > { %v4524_v40 = vpop.permute.xlu2 %610 }
  0x7c   : > { %732 = vrot.lane.b32.xlu2 %v4254_v59, %s4132_s27  ;;  %730 = vrot.lane.b32.xlu1 %v4267_v8, %s4132_s27 }
  0x7d   : > { %728 = vrot.lane.b32.xlu0 %v4207_v16, %s4132_s27 }
  0x7e   : > { %v4532_v46 = vpop.permute.xlu2 %612 }
  0x84   : > { %738 = vrot.lane.b32.xlu2 %v4288_v34, %s4132_s27  ;;  %736 = vrot.lane.b32.xlu1 %v4307_v52, %s4132_s27 }
  0x85   : > { %734 = vrot.lane.b32.xlu0 %v4235_v45, %s4132_s27 }
  0x86   : > { %v4540_v25 = vpop.permute.xlu2 %618 }
  0x8c   : > { %744 = vrot.lane.b32.xlu2 %v4331_v20, %s4132_s27  ;;  %742 = vrot.lane.b32.xlu1 %v4348_v43, %s4132_s27 }
  0x8d   : > { %740 = vrot.lane.b32.xlu0 %v4281_v27, %s4132_s27 }
  0x8e   : > { %v4548_v37 = vpop.permute.xlu2 %624  ;;  %v4550_v29 = vpop.permute.xlu1 %606 }
  0x8f   : > { %6259 = vst [vmem:[#allocation3_spill] sm:$0xff] %v4548_v37  ;;  %v4552_v21 = vpop.permute.xlu0 %602 }
  0x94   : > { %767 = vrot.lane.b32.xlu2 %v4293_v35, %s4133_s28  ;;  %748 = vrot.lane.b32.xlu1 %v4373_v22, %s4132_s27 }
  0x95   : > { %746 = vrot.lane.b32.xlu0 %v4315_v58, %s4132_s27 }
  0x96   : > { %v4560_v24 = vpop.permute.xlu2 %630  ;;  %v4562_v31 = vpop.permute.xlu1 %608 }
  0x97   : > { %6260 = vst [vmem:[#allocation4_spill] sm:$0xff] %v4560_v24  ;;  %v4564_v9 = vpop.permute.xlu0 %604 }
  0x9c   : > { %886 = vrot.lane.b32.xlu2 %v4241_v47, %s4134_s29  ;;  %839 = vrot.lane.b32.xlu1 %v4191_v2, %s4135_s30 }
  0x9d   : > { %802 = vrot.lane.b32.xlu0 %v4407_v28, %s4136_s6 }
  0x9e   : > { %v4572_v35 = vpop.permute.xlu2 %685  ;;  %v4574_v26 = vpop.permute.xlu1 %616 }
  0x9f   : > { %6261 = vst [vmem:[#allocation5_spill] sm:$0xff] %v4574_v26  ;;  %v4576_v7 = vpop.permute.xlu0 %614 }
  0xa4   : > { %769 = vrot.lane.b32.xlu2 %v4241_v47, %s4133_s28  ;;  %750 = vrot.lane.b32.xlu1 %v4579_v36, %s4132_s27 }
  0xa5   : > { %921 = vrot.lane.b32.xlu0 %v4431_v60, %s4137_s7 }
  0xa6   : > { %v4587_v38 = vpop.permute.xlu2 %691  ;;  %v4589_v28 = vpop.permute.xlu1 %622 }
  0xa7   : > { %6262 = vst [vmem:[#allocation6_spill] sm:$0xff] %v4589_v28  ;;  %v4591_v42 = vpop.permute.xlu0 %620 }
  0xac   : > { %888 = vrot.lane.b32.xlu2 %v4273_v15, %s4134_s29  ;;  %841 = vrot.lane.b32.xlu1 %v4221_v30, %s4135_s30 }
  0xad   : > { %804 = vrot.lane.b32.xlu0 %v4431_v60, %s4136_s6 }
  0xae   : > { %v4599_v47 = vpop.permute.xlu2 %697  ;;  %v4601_v50 = vpop.permute.xlu1 %628 }
  0xaf   : > { %6263 = vst [vmem:[#allocation7_spill] sm:$0xff] %v4599_v47  ;;  %v4603_v56 = vpop.permute.xlu0 %626 }
  0xb0   : > { %6264 = vst [vmem:[#allocation8_spill] sm:$0xff] %v4601_v50 }
  0xb1   : > { %6265 = vst [vmem:[#allocation9_spill] sm:$0xff] %v4603_v56 }
  0xb4   : > { %806 = vrot.lane.b32.xlu2 %v4428_v48, %s4136_s6  ;;  %771 = vrot.lane.b32.xlu1 %v4273_v15, %s4133_s28 }
  0xb5   : > { %923 = vrot.lane.b32.xlu0 %v4428_v48, %s4137_s7 }
  0xb6   : > { %v4611_v19 = vpop.permute.xlu2 %703  ;;  %v4613_v1 = vpop.permute.xlu1 %683 }
  0xb7   : > { %6266 = vst [vmem:[#allocation10_spill] sm:$0xff] %v4611_v19  ;;  %v4615_v60 = vpop.permute.xlu0 %632 }
  0xb8   : > { %6267 = vst [vmem:[#allocation11_spill] sm:$0xff] %v4615_v60 }
  0xbc   : > { %925 = vrot.lane.b32.xlu2 %v4425_v44, %s4137_s7  ;;  %890 = vrot.lane.b32.xlu1 %v4231_v41, %s4134_s29 }
  0xbd   : > { %843 = vrot.lane.b32.xlu0 %v4187_v0, %s4135_s30 }
  0xbe   : > { %v4623_v24 = vpop.permute.xlu2 %709  ;;  %v4625_v15 = vpop.permute.xlu1 %689 }
  0xbf   : > { %6268 = vst [vmem:[#allocation12_spill] sm:$0xff] %v4623_v24  ;;  %v4627_v48 = vpop.permute.xlu0 %687 }
  0xc4   : > { %845 = vrot.lane.b32.xlu2 %v4207_v16, %s4135_s30  ;;  %808 = vrot.lane.b32.xlu1 %v4425_v44, %s4136_s6 }
  0xc5   : > { %773 = vrot.lane.b32.xlu0 %v4231_v41, %s4133_s28 }
  0xc6   : > { %v4635_v60 = vpop.permute.xlu2 %720  ;;  %v4637_v50 = vpop.permute.xlu1 %695 }
  0xc7   : > { %v4639_v56 = vpop.permute.xlu0 %693 }
  0xcc   : > { %775 = vrot.lane.b32.xlu2 %v4258_v61, %s4133_s28  ;;  %927 = vrot.lane.b32.xlu1 %v4452_v14, %s4137_s7 }
  0xcd   : > { %892 = vrot.lane.b32.xlu0 %v4258_v61, %s4134_s29 }
  0xce   : > { %v4647_v24 = vpop.permute.xlu2 %726  ;;  %v4649_v44 = vpop.permute.xlu1 %701 }
  0xcf   : > { %6269 = vst [vmem:[#allocation13_spill] sm:$0xff] %v4649_v44  ;;  %v4651_v41 = vpop.permute.xlu0 %699 }
  0xd4   : > { %894 = vrot.lane.b32.xlu2 %v4326_v13, %s4134_s29  ;;  %847 = vrot.lane.b32.xlu1 %v4267_v8, %s4135_s30 }
  0xd5   : > { %810 = vrot.lane.b32.xlu0 %v4452_v14, %s4136_s6 }
  0xd6   : > { %v4659_v37 = vpop.permute.xlu2 %732  ;;  %v4661_v19 = vpop.permute.xlu1 %707 }
  0xd7   : > { %6270 = vst [vmem:[#allocation14_spill] sm:$0xff] %v4661_v19  ;;  %v4663_v61 = vpop.permute.xlu0 %705 }
  0xd8   : > { %6271 = vst [vmem:[#allocation15_spill] sm:$0xff] %v4663_v61 }
  0xdc   : > { %812 = vrot.lane.b32.xlu2 %v4449_v11, %s4136_s6  ;;  %777 = vrot.lane.b32.xlu1 %v4326_v13, %s4133_s28 }
  0xdd   : > { %929 = vrot.lane.b32.xlu0 %v4449_v11, %s4137_s7 }
  0xde   : > { %v4671_v28 = vpop.permute.xlu2 %738  ;;  %v4673_v47 = vpop.permute.xlu1 %713 }
  0xdf   : > { %6272 = vst [vmem:[#allocation16_spill] sm:$0xff] %v4671_v28  ;;  %v4675_v14 = vpop.permute.xlu0 %711 }
  0xe0   : > { %6273 = vst [vmem:[#allocation17_spill] sm:$0xff] %v4673_v47  ;;  %v1221_v47 = vld [vmem:[%s6251_s1 + $0x10] sm:$0x3] }
  0xe1   : > { %6274 = vst [vmem:[#allocation18_spill] sm:$0xff] %v4675_v14  ;;  %v1235_v14 = vunpack.c.l.b16 %v1221_v47 }
  0xe3   : > { %v1238_v61 = vpack.c.b16 %v1235_v14, %v1235_v14 }
  0xe4   : > { %931 = vrot.lane.b32.xlu2 %v4446_v10, %s4137_s7  ;;  %896 = vrot.lane.b32.xlu1 %v4321_v6, %s4134_s29 }
  0xe5   : > { %849 = vrot.lane.b32.xlu0 %v4254_v59, %s4135_s30 }
  0xe6   : > { %v4683_v19 = vpop.permute.xlu2 %744  ;;  %v4685_v13 = vpop.permute.xlu1 %724 }
  0xe7   : > { %6275 = vst [vmem:[#allocation19_spill] sm:$0xff] %v4683_v19  ;;  %v4687_v11 = vpop.permute.xlu0 %722  ;;  %v1276_v19 = vsel %vm6256_vm2, %v1238_v61, 0  ;;  %vm1488_vm2 = vsmask.f32 4368 }
  0xe8   : > { %1283 = vmatpush.bf16.msra.mxu0 %v1276_v19  ;;  %4060 = vmatpush.bf16.msra.mxu2 %v1276_v19 }
  0xec   : > { %814 = vrot.lane.b32.xlu2 %v4446_v10, %s4136_s6  ;;  %783 = vrot.lane.b32.xlu1 %v4367_v17, %s4133_s28  ;;  %v3944_v10 = vld [vmem:[%s6251_s1 + $0x8] sm:$0xff] }
  0xed   : > { %779 = vrot.lane.b32.xlu0 %v4321_v6, %s4133_s28  ;;  %1284 = vmatpush.bf16.msra.mxu0 %v3944_v10  ;;  %v3943_v6 = vld [vmem:[%s6251_s1] sm:$0xff] }
  0xee   : > { %v768_v59 = vpop.permute.xlu2 %767  ;;  %v4699_v28 = vpop.permute.xlu1 %730  ;;  %4061 = vmatpush.bf16.msra.mxu2 %v3944_v10 }
  0xef   : > { %v4701_v44 = vpop.permute.xlu0 %728 }
  0xf1   : > { %1285 = vmatpush.bf16.msra.mxu0 %v3943_v6 }
  0xf2   : > { %4062 = vmatpush.bf16.msra.mxu2 %v3943_v6 }
  0xf4   : > { %855 = vrot.lane.b32.xlu2 %v4288_v34, %s4135_s30  ;;  %851 = vrot.lane.b32.xlu1 %v4235_v45, %s4135_s30 }
  0xf5   : > { %818 = vrot.lane.b32.xlu0 %v4470_v23, %s4136_s6 }
  0xf6   : > { %v887_v47 = vpop.permute.xlu2 %886  ;;  %v4715_v19 = vpop.permute.xlu1 %736 }
  0xf7   : > { %v4717_v61 = vpop.permute.xlu0 %734 }
  0xf8   : > { %6276 = vst [vmem:[#allocation20_spill] sm:$0xff] %v4717_v61 }
  0xfc   : > { %933 = vrot.lane.b32.xlu2 %v4473_v33, %s4137_s7  ;;  %902 = vrot.lane.b32.xlu1 %v4361_v3, %s4134_s29 }
  0xfd   : > { %898 = vrot.lane.b32.xlu0 %v4311_v54, %s4134_s29 }
  0xfe   : > { %v770_v34 = vpop.permute.xlu2 %769  ;;  %v4725_v14 = vpop.permute.xlu1 %742 }
  0xff   : > { %6277 = vst [vmem:[#allocation21_spill] sm:$0xff] %v4725_v14  ;;  %v4727_v10 = vpop.permute.xlu0 %740 }
 0x100   : > { %6278 = vst [vmem:[#allocation22_spill] sm:$0xff] %v4727_v10 }
 0x104   : > { %785 = vrot.lane.b32.xlu2 %v4361_v3, %s4133_s28  ;;  %781 = vrot.lane.b32.xlu1 %v4311_v54, %s4133_s28  ;;  %v955_v54 = vsel %vm953_vm3, %v4195_v5, %v4552_v21 }
 0x105   : > { %937 = vrot.lane.b32.xlu0 %v4467_v62, %s4137_s7 }
 0x106   : > { %v889_v6 = vpop.permute.xlu2 %888  ;;  %v4735_v61 = vpop.permute.xlu1 %748 }
 0x107   : > { %6279 = vst [vmem:[#allocation23_spill] sm:$0xff] %v4735_v61  ;;  %v4737_v26 = vpop.permute.xlu0 %746  ;;  %v988_v61 = vsel %vm986_vm5, %v955_v54, %v4613_v1 }
 0x108   : > { %6280 = vst [vmem:[#allocation24_spill] sm:$0xff] %v4737_v26  ;;  %v1021_v14 = vsel %vm1019_vm4, %v988_v61, %v4635_v60 }
 0x10c   : > { %853 = vrot.lane.b32.xlu2 %v4307_v52, %s4135_s30  ;;  %820 = vrot.lane.b32.xlu1 %v4467_v62, %s4136_s6  ;;  %v1054_v62 = vsel %vm1052_vm6, %v1021_v14, %v768_v59 }
 0x10d   : > { %816 = vrot.lane.b32.xlu0 %v4473_v33, %s4136_s6 }
 0x10e   : > { %v807_v3 = vpop.permute.xlu2 %806  ;;  %v840_v26 = vpop.permute.xlu1 %839 }
 0x10f   : > { %v803_v10 = vpop.permute.xlu0 %802 }
 0x110   : > { %v1087_v5 = vsel %vm1085_vm7, %v1054_v62, %v803_v10 }
 0x111   : > { %v1120_v33 = vsel %vm1118_vm8, %v1087_v5, %v840_v26 }
 0x112   : > { %v1153_v59 = vsel %vm1151_vm9, %v1120_v33, %v887_v47 }
 0x114   : > { %904 = vrot.lane.b32.xlu2 %v4353_v51, %s4134_s29  ;;  %900 = vrot.lane.b32.xlu1 %v4367_v17, %s4134_s29 }
 0x115   : > { %857 = vrot.lane.b32.xlu0 %v4281_v27, %s4135_s30  ;;  %v957_v27 = vsel %vm953_vm3, %v4227_v39, %v4564_v9 }
 0x116   : > { %v4761_v21 = vpop.permute.xlu1 %750  ;;  %v926_v1 = vpop.permute.xlu2 %925  ;;  %v990_v17 = vsel %vm986_vm5, %v957_v27, %v4572_v35 }
 0x117   : > { %v922_v60 = vpop.permute.xlu0 %921  ;;  %v1023_v47 = vsel %vm1019_vm4, %v990_v17, %v4687_v11 }
 0x118   : > { %v1186_v61 = vsel %vm1184_vm10, %v1153_v59, %v922_v60 }
 0x119   : > { %3811 = vmatmul.msk.bf16.vlgmr.msra.gmra.mxu0 %vm1241_vm11, %v1186_v61 }
 0x11c   : > { %787 = vrot.lane.b32.xlu2 %v4353_v51, %s4133_s28  ;;  %939 = vrot.lane.b32.xlu1 %v4494_v18, %s4137_s7  ;;  %v1056_v51 = vsel %vm1052_vm6, %v1023_v47, %v770_v34  ;;  %v959_v34 = vsel %vm953_vm3, %v4191_v2, %v4550_v29 }
 0x11d   : > { %935 = vrot.lane.b32.xlu0 %v4470_v23, %s4137_s7 }
 0x11e   : > { %v842_v26 = vpop.permute.xlu1 %841  ;;  %v846_v10 = vpop.permute.xlu2 %845 }
 0x11f   : > { %v805_v14 = vpop.permute.xlu0 %804 }
 0x120   : > { %v1089_v54 = vsel %vm1085_vm7, %v1056_v51, %v805_v14  ;;  %v758_v51 = vshll.u32 %v4579_v36, 16 }
 0x121   : > { %v1122_v39 = vsel %vm1118_vm8, %v1089_v54, %v842_v26 }
 0x122   : > { %v1155_v35 = vsel %vm1151_vm9, %v1122_v39, %v889_v6 }
 0x124   : > { %906 = vrot.lane.b32.xlu2 %v4392_v57, %s4134_s29  ;;  %859 = vrot.lane.b32.xlu1 %v4348_v43, %s4135_s30  ;;  %v992_v43 = vsel %vm986_vm5, %v959_v34, %v4627_v48 }
 0x125   : > { %822 = vrot.lane.b32.xlu0 %v4494_v18, %s4136_s6  ;;  %v1025_v18 = vsel %vm1019_vm4, %v992_v43, %v4685_v13 }
 0x126   : > { %v772_v23 = vpop.permute.xlu1 %771  ;;  %v776_v62 = vpop.permute.xlu2 %775 }
 0x127   : > { %v924_v9 = vpop.permute.xlu0 %923  ;;  %v1058_v6 = vsel %vm1052_vm6, %v1025_v18, %v772_v23 }
 0x128   : > { %v1188_v11 = vsel %vm1184_vm10, %v1155_v35, %v924_v9  ;;  %v1091_v29 = vsel %vm1085_vm7, %v1058_v6, %v807_v3  ;;  %v961_v3 = vsel %vm953_vm3, %v4221_v30, %v4562_v31 }
 0x129   : > { %3812 = vmatmul.msk.bf16.gmra.mxu0 %vm1241_vm11, %v1188_v11  ;;  %v994_v59 = vsel %vm986_vm5, %v961_v3, %v4625_v15 }
 0x12c   : > { %824 = vrot.lane.b32.xlu2 %v4491_v49, %s4136_s6  ;;  %789 = vrot.lane.b32.xlu1 %v4392_v57, %s4133_s28 }
 0x12d   : > { %941 = vrot.lane.b32.xlu0 %v4491_v49, %s4137_s7 }
 0x12e   : > { %v891_v5 = vpop.permute.xlu1 %890  ;;  %v895_v57 = vpop.permute.xlu2 %894 }
 0x12f   : > { %v844_v2 = vpop.permute.xlu0 %843 }
 0x130   : > { %v1124_v33 = vsel %vm1118_vm8, %v1091_v29, %v844_v2 }
 0x131   : > { %v1157_v49 = vsel %vm1151_vm9, %v1124_v33, %v891_v5  ;;  %v280_v5 = vld [vmem:[%s4184_s24 + $0xd4] sm:$0x1]  ;;  %v3942_v33 = vld [vmem:[%s4184_s24 + $0xcc] sm:$0xff] }
 0x132   : > { %v1190_v60 = vsel %vm1184_vm10, %v1157_v49, %v926_v1  ;;  %v965_v49 = vsel %vm953_vm3, %v4207_v16, %v4532_v46 }
 0x134   : > { %943 = vrot.lane.b32.xlu2 %v4488_v12, %s4137_s7  ;;  %908 = vrot.lane.b32.xlu1 %v4389_v55, %s4134_s29 }
 0x135   : > { %861 = vrot.lane.b32.xlu0 %v4331_v20, %s4135_s30  ;;  %v1027_v20 = vsel %vm1019_vm4, %v994_v59, %v4647_v24  ;;  %v277_v24 = vld [vmem:[%s4184_s24 + $0xc8] sm:$0x1] }
 0x136   : > { %v809_v48 = vpop.permute.xlu1 %808  ;;  %v813_v30 = vpop.permute.xlu2 %812  ;;  %v753_v47 = vunpack.c.l.b16 %v277_v24 }
 0x137   : > { %v774_v13 = vpop.permute.xlu0 %773 }
 0x138   : > { %v1060_v1 = vsel %vm1052_vm6, %v1027_v20, %v774_v13  ;;  %v754_v14 = vpack.c.b16 %v753_v47, %v753_v47  ;;  %v877_v20 = vshll.u32 %v3942_v33, 16 }
 0x139   : > { %3813 = vmatmul.msk.bf16.gmra.mxu0 %vm1241_vm11, %v1190_v60 }
 0x13a   : > { %v800_v43 = vrot.slane %v754_v14, 1 }
 0x13c   : > { %863 = vrot.lane.b32.xlu2 %v4315_v58, %s4135_s30  ;;  %826 = vrot.lane.b32.xlu1 %v4488_v12, %s4136_s6  ;;  %v1093_v58 = vsel %vm1085_vm7, %v1060_v1, %v809_v48 }
 0x13d   : > { %791 = vrot.lane.b32.xlu0 %v4389_v55, %s4133_s28  ;;  %v1126_v15 = vsel %vm1118_vm8, %v1093_v58, %v846_v10 }
 0x13e   : > { %v928_v61 = vpop.permute.xlu1 %927  ;;  %v4841_v26 = vpop.permute.xlu2 %931 }
 0x13f   : > { %v893_v31 = vpop.permute.xlu0 %892 }
 0x140   : > { %v1159_v12 = vsel %vm1151_vm9, %v1126_v15, %v893_v31 }
 0x141   : > { %v1192_v17 = vsel %vm1184_vm10, %v1159_v12, %v928_v61  ;;  %v879_v61 = vrot.slane %v877_v20, 1 }
 0x144   : > { %793 = vrot.lane.b32.xlu2 %v4386_v53, %s4133_s28  ;;  %945 = vrot.lane.b32.xlu1 %v4510_v4, %s4137_s7 }
 0x145   : > { %910 = vrot.lane.b32.xlu0 %v4386_v53, %s4134_s29  ;;  %v963_v53 = vsel %vm953_vm3, %v4187_v0, %v4524_v40  ;;  %v756_v0 = vshrl.u32 %v4579_v36, 16  ;;  %v760_v40 = vrot.slane %v758_v51, 1 }
 0x146   : > { %v848_v55 = vpop.permute.xlu1 %847  ;;  %v996_v10 = vsel %vm986_vm5, %v963_v53, %v4587_v38  ;;  %v4861_v35 = vpop.permute.xlu2 %814  ;;  %v967_v53 = vsel %vm953_vm3, %v4267_v8, %v4576_v7 }
 0x147   : > { %v811_v27 = vpop.permute.xlu0 %810  ;;  %v1029_v39 = vsel %vm1019_vm4, %v996_v10, %v4701_v44  ;;  %v761_v44 = vor.u32 %v760_v40, %v756_v0 }
 0x149   : > { %3814 = vmatmul.msk.bf16.gmra.mxu0 %vm1241_vm11, %v1192_v17 }
 0x14c   : > { %912 = vrot.lane.b32.xlu2 %v4411_v32, %s4134_s29  ;;  %865 = vrot.lane.b32.xlu1 %v4373_v22, %s4135_s30  ;;  %v1062_v22 = vsel %vm1052_vm6, %v1029_v39, %v776_v62  ;;  %v799_v62 = vrot.slane %v4579_v36, 1 }
 0x14d   : > { %828 = vrot.lane.b32.xlu0 %v4510_v4, %s4136_s6  ;;  %v1095_v9 = vsel %vm1085_vm7, %v1062_v22, %v811_v27  ;;  %v763_v4 = vshll.u32 %v754_v14, 16  ;;  %v1000_v14 = vsel %vm986_vm5, %v967_v53, %v4637_v50 }
 0x14e   : > { %v778_v54 = vpop.permute.xlu1 %777  ;;  %v1128_v38 = vsel %vm1118_vm8, %v1095_v9, %v848_v55  ;;  %v856_v13 = vpop.permute.xlu2 %855  ;;  %v1033_v10 = vsel %vm1019_vm4, %v1000_v14, %v4659_v37 }
 0x14f   : > { %v930_v23 = vpop.permute.xlu0 %929  ;;  %v765_v11 = vrot.slane %v763_v4, 1  ;;  %v1161_v6 = vsel %vm1151_vm9, %v1128_v38, %v895_v57  ;;  %v998_v57 = vsel %vm986_vm5, %v965_v49, %v4639_v56  ;;  %v875_v56 = vshrl.u32 %v3942_v33, 16  ;;  %v6284_v49 = vld [vmem:[#allocation16_spill] sm:$0xff] }
 0x150   : > { %v1194_v2 = vsel %vm1184_vm10, %v1161_v6, %v930_v23  ;;  %v1031_v48 = vsel %vm1019_vm4, %v998_v57, %v4699_v28  ;;  %v918_v28 = vrot.slane %v3942_v33, 1  ;;  %v6281_v6 = vld [vmem:[#allocation5_spill] sm:$0xff] }
 0x151   : > { %v766_v29 = vsel %vm6258_vm0, %v761_v44, %v765_v11  ;;  %v1064_v60 = vsel %vm1052_vm6, %v1031_v48, %v778_v54  ;;  %v880_v12 = vor.u32 %v879_v61, %v875_v56 }
 0x152   : > { %v1097_v46 = vsel %vm1085_vm7, %v1064_v60, %v813_v30 }
 0x154   : > { %830 = vrot.lane.b32.xlu2 %v4507_v63, %s4136_s6  ;;  %795 = vrot.lane.b32.xlu1 %v4411_v32, %s4133_s28  ;;  %v801_v32 = vsel %vm6257_vm1, %v799_v62, %v800_v43  ;;  %v973_v62 = vsel %vm953_vm3, %v4307_v52, %v4591_v42  ;;  %v6285_v42 = vld [vmem:[#allocation20_spill] sm:$0xff] }
 0x155   : > { %947 = vrot.lane.b32.xlu0 %v4507_v63, %s4137_s7  ;;  %v872_v63 = vunpack.c.l.b16 %v280_v5 }
 0x156   : > { %v897_v34 = vpop.permute.xlu1 %896  ;;  %v934_v24 = vpop.permute.xlu2 %933 }
 0x157   : > { %v850_v18 = vpop.permute.xlu0 %849  ;;  %v873_v59 = vpack.c.b16 %v872_v63, %v872_v63 }
 0x158   : > { %v1130_v1 = vsel %vm1118_vm8, %v1097_v46, %v850_v18  ;;  %v4086_v18 = vld [vmem:[%s4184_s24 + $0x54] sm:$0xff] }
 0x159   : > { %3815 = vmatmul.msk.bf16.gmra.mxu0 %vm1241_vm11, %v1194_v2  ;;  %v882_v31 = vshll.u32 %v873_v59, 16  ;;  %v919_v58 = vrot.slane %v873_v59, 1  ;;  %v969_v5 = vsel %vm953_vm3, %v4086_v18, %v6281_v6  ;;  %v6282_v2 = vld [vmem:[#allocation13_spill] sm:$0xff] }
 0x15b   : > { %v884_v55 = vrot.slane %v882_v31, 1  ;;  %v920_v17 = vsel %vm6257_vm1, %v918_v28, %v919_v58  ;;  %v5009_v28 = vld [vmem:[%s6252_s2] ss:$0 sm:$0xff]  ;;  %v4087_v58 = vld [vmem:[%s4184_s24 + $0x78] sm:$0xff]  ;;  %vm5079_vm1 = vmor %vm1487_vm14, %vm1488_vm2  ;;  %vm6301_vm2 = vsmask.f32 7424 }
 0x15c   : > { %949 = vrot.lane.b32.xlu2 %v801_v32, %s4137_s7  ;;  %914 = vrot.lane.b32.xlu1 %v766_v29, %s4134_s29 }
 0x15d   : > { %867 = vrot.lane.b32.xlu0 %v4579_v36, %s4135_s30  ;;  %v1163_v36 = vsel %vm1151_vm9, %v1130_v1, %v897_v34  ;;  %v885_v47 = vsel %vm6258_vm0, %v880_v12, %v884_v55  ;;  %v6287_v55 = vld [vmem:[#allocation10_spill] sm:$0xff]  ;;  %vm5087_vm0 = vmand %vm1402_vm13, %vm1487_vm14 }
 0x15e   : > { %v784_v3 = vpop.permute.xlu1 %783  ;;  %v1196_v27 = vsel %vm1184_vm10, %v1163_v36, %v4841_v26  ;;  %v971_v26 = vsel %vm953_vm3, %v4235_v45, %v4540_v25  ;;  %v786_v7 = vpop.permute.xlu2 %785  ;;  %vm6306_vm14 = vmmov %vm6301_vm2 }
 0x15f   : > { %v780_v16 = vpop.permute.xlu0 %779  ;;  %v1004_v39 = vsel %vm986_vm5, %v971_v26, %v4651_v41 }
 0x160   : > { %v1066_v23 = vsel %vm1052_vm6, %v1033_v10, %v780_v16  ;;  %v1037_v8 = vsel %vm1019_vm4, %v1004_v39, %v4715_v19 }
 0x161   : > { %v1070_v50 = vsel %vm1052_vm6, %v1037_v8, %v784_v3  ;;  %v1099_v22 = vsel %vm1085_vm7, %v1066_v23, %v4861_v35  ;;  %v4138_v35 = vmov 0  }
 0x162   : > { %1404 = vst.msk [vmem:[#allocation2 + $0xc] sm:$0xf] %vm1399_vm12, %v4138_v35 }
 0x163   : > { %1400 = vst.msk [vmem:[#allocation2] sm:$0xf] %vm1399_vm12, %v4138_v35 }
 0x164   : > { %869 = vrot.lane.b32.xlu2 %v3942_v33, %s4135_s30  ;;  %832 = vrot.lane.b32.xlu1 %v801_v32, %s4136_s6  ;;  %1401 = vst.msk [vmem:[#allocation2 + $0x4] sm:$0xf] %vm1399_vm12, %v4138_v35  ;;  %v6283_v33 = vld [vmem:[#allocation7_spill] sm:$0xff] }
 0x165   : > { %797 = vrot.lane.b32.xlu0 %v766_v29, %s4133_s28  ;;  %1405 = vst.msk [vmem:[#allocation2 + $0x10] sm:$0xf] %vm1399_vm12, %v4138_v35  ;;  %v1006_v29 = vsel %vm986_vm5, %v973_v62, %v6282_v2  ;;  %v1002_v63 = vsel %vm986_vm5, %v969_v5, %v6283_v33  ;;  %v6293_v5 = vld [vmem:[#allocation21_spill] sm:$0xff] }
 0x166   : > { %v852_v15 = vpop.permute.xlu1 %851  ;;  %v854_v38 = vpop.permute.xlu2 %853  ;;  %1407 = vst.msk [vmem:[#allocation2 + $0x18] sm:$0xf] %vm1399_vm12, %v4138_v35  ;;  %v1039_v52 = vsel %vm1019_vm4, %v1006_v29, %v6284_v49  ;;  %v1035_v57 = vsel %vm1019_vm4, %v1002_v63, %v6285_v42 }
 0x167   : > { %v819_v30 = vpop.permute.xlu0 %818  ;;  %v1132_v25 = vsel %vm1118_vm8, %v1099_v22, %v852_v15  ;;  %1408 = vst.msk [vmem:[#allocation2 + $0x1c] sm:$0xf] %vm1399_vm12, %v4138_v35  ;;  %v1072_v48 = vsel %vm1052_vm6, %v1039_v52, %v786_v7  ;;  %v6286_v15 = vld [vmem:[#allocation6_spill] sm:$0xff] }
 0x168   : > { %v1103_v45 = vsel %vm1085_vm7, %v1070_v50, %v819_v30  ;;  %1410 = vst.msk [vmem:[#allocation2 + $0x24] sm:$0xf] %vm1399_vm12, %v4138_v35  ;;  %v975_v12 = vsel %vm953_vm3, %v4087_v58, %v6286_v15 }
 0x169   : > { %3816 = vmatmul.msk.bf16.gmra.mxu0 %vm1241_vm11, %v1196_v27  ;;  %v1136_v9 = vsel %vm1118_vm8, %v1103_v45, %v856_v13  ;;  %1411 = vst.msk [vmem:[#allocation2 + $0x28] sm:$0xf] %vm1399_vm12, %v4138_v35 }
 0x16a   : > { %1413 = vst.msk [vmem:[#allocation2 + $0x30] sm:$0xf] %vm1399_vm12, %v4138_v35 }
 0x16b   : > { %1414 = vst.msk [vmem:[#allocation2 + $0x34] sm:$0xf] %vm1399_vm12, %v4138_v35 }
 0x16c   : > { %951 = vrot.lane.b32.xlu1 %v920_v17, %s4137_s7  ;;  %1416 = vst.msk [vmem:[#allocation2 + $0x3c] sm:$0xf] %vm1399_vm12, %v4138_v35  ;;  %v6288_v17 = vld [vmem:[#allocation22_spill] sm:$0xff] }
 0x16d   : > { %916 = vrot.lane.b32.xlu0 %v885_v47, %s4134_s29  ;;  %1417 = vst.msk [vmem:[#allocation2 + $0x40] sm:$0xf] %vm1399_vm12, %v4138_v35 }
 0x16e   : > { %v903_v51 = vpop.permute.xlu1 %902  ;;  %v905_v34 = vpop.permute.xlu2 %904  ;;  %1419 = vst.msk [vmem:[#allocation2 + $0x48] sm:$0xf] %vm1399_vm12, %v4138_v35 }
 0x16f   : > { %v899_v54 = vpop.permute.xlu0 %898  ;;  %v1169_v0 = vsel %vm1151_vm9, %v1136_v9, %v903_v51  ;;  %1420 = vst.msk [vmem:[#allocation2 + $0x4c] sm:$0xf] %vm1399_vm12, %v4138_v35 }
 0x170   : > { %v1165_v37 = vsel %vm1151_vm9, %v1132_v25, %v899_v54  ;;  %1422 = vst.msk [vmem:[#allocation2 + $0x54] sm:$0xf] %vm1399_vm12, %v4138_v35 }
 0x171   : > { %v1198_v19 = vsel %vm1184_vm10, %v1165_v37, %v934_v24  ;;  %1423 = vst.msk [vmem:[#allocation2 + $0x58] sm:$0xf] %vm1399_vm12, %v4138_v35  ;;  %v1008_v24 = vsel %vm986_vm5, %v975_v12, %v6287_v55  ;;  %v3945_v55 = vld [vmem:[#allocation2] sm:$0xff] }
 0x172   : > { %1425 = vst.msk [vmem:[#allocation2 + $0x60] sm:$0xf] %vm1399_vm12, %v4138_v35  ;;  %v1041_v47 = vsel %vm1019_vm4, %v1008_v24, %v6288_v17 }
 0x173   : > { %1426 = vst.msk [vmem:[#allocation2 + $0x64] sm:$0xf] %vm1399_vm12, %v4138_v35 }
 0x174   : > { %1428 = vst.msk [vmem:[#allocation2 + $0x6c] sm:$0xf] %vm1399_vm12, %v4138_v35 }
 0x175   : > { %1429 = vst.msk [vmem:[#allocation2 + $0x70] sm:$0xf] %vm1399_vm12, %v4138_v35 }
 0x176   : > { %v782_v41 = vpop.permute.xlu1 %781  ;;  %1431 = vst.msk [vmem:[#allocation2 + $0x78] sm:$0xf] %vm1399_vm12, %v4138_v35  ;;  %v788_v1 = vpop.permute.xlu2 %787 }
 0x177   : > { %v938_v40 = vpop.permute.xlu0 %937  ;;  %v1068_v13 = vsel %vm1052_vm6, %v1035_v57, %v782_v41  ;;  %1432 = vst.msk [vmem:[#allocation2 + $0x7c] sm:$0xf] %vm1399_vm12, %v4138_v35  ;;  %v1074_v51 = vsel %vm1052_vm6, %v1041_v47, %v788_v1 }
 0x178   : > { %v1202_v4 = vsel %vm1184_vm10, %v1169_v0, %v938_v40  ;;  %1434 = vst.msk [vmem:[#allocation2 + $0x84] sm:$0xf] %vm1399_vm12, %v4138_v35  ;;  %v1814_v0 = vld [vmem:[#allocation2 + $0xc] sm:$0xf] }
 0x179   : > { %3817 = vmatmul.msk.bf16.gmra.mxu0 %vm1241_vm11, %v1198_v19  ;;  %3819 = vmatmul.msk.bf16.vlgmr.msra.gmra.mxu2 %vm1241_vm11, %v1202_v4  ;;  %1435 = vst.msk [vmem:[#allocation2 + $0x88] sm:$0xf] %vm1399_vm12, %v4138_v35 }
 0x17a   : > { %1437 = vst.msk [vmem:[#allocation2 + $0x90] sm:$0xf] %vm1399_vm12, %v4138_v35 }
 0x17b   : > { %1438 = vst.msk [vmem:[#allocation2 + $0x94] sm:$0xf] %vm1399_vm12, %v4138_v35 }
 0x17c   : > { %1440 = vst.msk [vmem:[#allocation2 + $0x9c] sm:$0xf] %vm1399_vm12, %v4138_v35 }
 0x17d   : > { %1441 = vst.msk [vmem:[#allocation2 + $0xa0] sm:$0xf] %vm1399_vm12, %v4138_v35 }
 0x17e   : > { %v821_v44 = vpop.permute.xlu1 %820  ;;  %1443 = vst.msk [vmem:[#allocation2 + $0xa8] sm:$0xf] %vm1399_vm12, %v4138_v35  ;;  %v907_v26 = vpop.permute.xlu2 %906 }
 0x17f   : > { %v817_v11 = vpop.permute.xlu0 %816  ;;  %v1105_v60 = vsel %vm1085_vm7, %v1072_v48, %v821_v44  ;;  %1444 = vst.msk [vmem:[#allocation2 + $0xac] sm:$0xf] %vm1399_vm12, %v4138_v35  ;;  %v6291_v44 = vld [vmem:[#allocation3_spill] sm:$0xff] }
 0x180   : > { %v1101_v3 = vsel %vm1085_vm7, %v1068_v13, %v817_v11  ;;  %1446 = vst.msk [vmem:[#allocation2 + $0xb4] sm:$0xf] %vm1399_vm12, %v4138_v35 }
 0x181   : > { %v1134_v20 = vsel %vm1118_vm8, %v1101_v3, %v854_v38  ;;  %1447 = vst.msk [vmem:[#allocation2 + $0xb8] sm:$0xf] %vm1399_vm12, %v4138_v35  ;;  %v4088_v38 = vld [vmem:[%s4184_s24 + $0x84] sm:$0xff] }
 0x182   : > { %1449 = vst.msk [vmem:[#allocation2 + $0xc0] sm:$0xf] %vm1399_vm12, %v4138_v35  ;;  %v977_v11 = vsel %vm953_vm3, %v4088_v38, %v6291_v44 }
 0x183   : > { %1450 = vst.msk [vmem:[#allocation2 + $0xc4] sm:$0xf] %vm1399_vm12, %v4138_v35 }
 0x184   : > { %1452 = vst.msk [vmem:[#allocation2 + $0xcc] sm:$0xf] %vm1399_vm12, %v4138_v35 }
 0x185   : > { %1453 = vst.msk [vmem:[#allocation2 + $0xd0] sm:$0xf] %vm1399_vm12, %v4138_v35 }
 0x186   : > { %v901_v43 = vpop.permute.xlu1 %900  ;;  %1406 = vst.msk [vmem:[#allocation2 + $0x14] sm:$0x1] %vm1402_vm13, %v4138_v35 }
 0x187   : > { %v858_v32 = vpop.permute.xlu0 %857  ;;  %v1167_v56 = vsel %vm1151_vm9, %v1134_v20, %v901_v43  ;;  %1403 = vst.msk [vmem:[#allocation2 + $0x8] sm:$0x1] %vm1402_vm13, %v4138_v35  ;;  %v825_v43 = vpop.permute.xlu2 %824 }
 0x188   : > { %v1138_v59 = vsel %vm1118_vm8, %v1105_v60, %v858_v32  ;;  %1409 = vst.msk [vmem:[#allocation2 + $0x20] sm:$0x1] %vm1402_vm13, %v4138_v35 }
 0x189   : > { %v1171_v46 = vsel %vm1151_vm9, %v1138_v59, %v905_v34  ;;  %1412 = vst.msk [vmem:[#allocation2 + $0x2c] sm:$0x1] %vm1402_vm13, %v4138_v35  ;;  %v6292_v34 = vld [vmem:[#allocation15_spill] sm:$0xff] }
 0x18a   : > { %1415 = vst.msk [vmem:[#allocation2 + $0x38] sm:$0x1] %vm1402_vm13, %v4138_v35  ;;  %v1010_v62 = vsel %vm986_vm5, %v977_v11, %v6292_v34 }
 0x18b   : > { %1418 = vst.msk [vmem:[#allocation2 + $0x44] sm:$0x1] %vm1402_vm13, %v4138_v35  ;;  %v1043_v2 = vsel %vm1019_vm4, %v1010_v62, %v6293_v5 }
 0x18c   : > { %1421 = vst.msk [vmem:[#allocation2 + $0x50] sm:$0x1] %vm1402_vm13, %v4138_v35 }
 0x18d   : > { %1424 = vst.msk [vmem:[#allocation2 + $0x5c] sm:$0x1] %vm1402_vm13, %v4138_v35  ;;  %v1820_v60 = vld [vmem:[#allocation2 + $0x14] sm:$0x1] }
 0x18e   : > { %v940_v16 = vpop.permute.xlu1 %939  ;;  %1427 = vst.msk [vmem:[#allocation2 + $0x68] sm:$0x1] %vm1402_vm13, %v4138_v35 }
 0x18f   : > { %v936_v61 = vpop.permute.xlu0 %935  ;;  %v1204_v31 = vsel %vm1184_vm10, %v1171_v46, %v940_v16  ;;  %1430 = vst.msk [vmem:[#allocation2 + $0x74] sm:$0x1] %vm1402_vm13, %v4138_v35  ;;  %v944_v58 = vpop.permute.xlu2 %943 }
 0x190   : > { %v1200_v36 = vsel %vm1184_vm10, %v1167_v56, %v936_v61  ;;  %3820 = vmatmul.msk.bf16.gmra.mxu2 %vm1241_vm11, %v1204_v31  ;;  %1433 = vst.msk [vmem:[#allocation2 + $0x80] sm:$0x1] %vm1402_vm13, %v4138_v35 }
 0x191   : > { %3818 = vmatmul.msk.bf16.gmra.mxu0 %vm1241_vm11, %v1200_v36  ;;  %1436 = vst.msk [vmem:[#allocation2 + $0x8c] sm:$0x1] %vm1402_vm13, %v4138_v35  ;;  %v1930_v36 = vld [vmem:[#allocation2 + $0x8] sm:$0x1] }
 0x192   : > { %1439 = vst.msk [vmem:[#allocation2 + $0x98] sm:$0x1] %vm1402_vm13, %v4138_v35  ;;  %v2078_v24 = vunpack.c.l.b16 %v1930_v36 }
 0x193   : > { %1442 = vst.msk [vmem:[#allocation2 + $0xa4] sm:$0x1] %vm1402_vm13, %v4138_v35 }
 0x194   : > { %1445 = vst.msk [vmem:[#allocation2 + $0xb0] sm:$0x1] %vm1402_vm13, %v4138_v35 }
 0x195   : > { %1448 = vst.msk [vmem:[#allocation2 + $0xbc] sm:$0x1] %vm1402_vm13, %v4138_v35 }
 0x196   : > { %v1287_v30 = vpop.f32.mrf.mxu0  ;;  %v860_v27 = vpop.permute.xlu1 %859  ;;  %1451 = vst.msk [vmem:[#allocation2 + $0xc8] sm:$0x1] %vm1402_vm13, %v4138_v35 }
 0x197   : > { %v1288_v53 = vadd.f32 %v5009_v28, %v1287_v30  ;;  %v823_v14 = vpop.permute.xlu0 %822  ;;  %1454 = vst.msk [vmem:[#allocation2 + $0xd4] sm:$0x1] %vm1402_vm13, %v4138_v35  ;;  %vm6302_vm13 = vmmov %vm6301_vm2 }
 0x198   : > { %v1107_v54 = vsel %vm1085_vm7, %v1074_v51, %v823_v14  ;;  %v5112_v14 = vpack.c.b16 %v2078_v24, %v2078_v24  ;;  %v2113_v51 = vshll.u32 %v3945_v55, 16 }
 0x199   : > { %v1367_v10 = vmax.f32 %v1288_v53, 0.0  ;;  %v1140_v23 = vsel %vm1118_vm8, %v1107_v54, %v860_v27 }
 0x19a   : > { %v1173_v9 = vsel %vm1151_vm9, %v1140_v23, %v907_v26  ;;  %v1823_v26 = vld [vmem:[#allocation2 + $0x18] sm:$0xf] }
 0x19b   : > { %v1455_v39 = vpack.c.bf16 %v1367_v10, %v1367_v10 }
 0x19d   : > { %v1491_v8 = vshrl.u32 %v1455_v39, 16  ;;  %v1494_v45 = vshll.u32 %v1455_v39, 16 }
 0x19e   : > { %v1289_v7 = vpop.f32.mrf.mxu0  ;;  %v790_v50 = vpop.permute.xlu1 %789 }
 0x19f   : > { %v1493_v22 = vrot.slane %v1491_v8, 7  ;;  %v1290_v25 = vadd.f32 %v5009_v28, %v1289_v7  ;;  %v942_v37 = vpop.permute.xlu0 %941  ;;  %v1076_v32 = vsel %vm1052_vm6, %v1043_v2, %v790_v50  ;;  %v4089_v8 = vld [vmem:[%s4184_s24 + $0x90] sm:$0xff]  ;;  %v6298_v7 = vld [vmem:[#allocation9_spill] sm:$0xff]  ;;  %v864_v2 = vpop.permute.xlu2 %863 }
 0x1a0   : > { %v1206_v40 = vsel %vm1184_vm10, %v1173_v9, %v942_v37  ;;  %v1109_v3 = vsel %vm1085_vm7, %v1076_v32, %v825_v43  ;;  %v979_v50 = vsel %vm953_vm3, %v4089_v8, %v6298_v7  ;;  %v6299_v37 = vld [vmem:[#allocation14_spill] sm:$0xff]  ;;  %v6303_v8 = vld [vmem:[#allocation8_spill] sm:$0xff] }
 0x1a1   : > { %v1496_v19 = vor.u32 %v1494_v45, %v1493_v22  ;;  %v1368_v4 = vmax.f32 %v1290_v25, 0.0  ;;  %3821 = vmatmul.msk.bf16.gmra.mxu2 %vm1241_vm11, %v1206_v40  ;;  %v1497_v59 = vrot.slane %v1493_v22, 4  ;;  %v2111_v22 = vshrl.u32 %v3945_v55, 16 }
 0x1a2   : > { %v2115_v45 = vrot.slane %v2113_v51, 1  ;;  %v2118_v25 = vshll.u32 %v5112_v14, 16  ;;  %v1012_v9 = vsel %vm986_vm5, %v979_v50, %v6299_v37 }
 0x1a3   : > { %v1815_v18 = vsel %vm5051_vm15, %v1496_v19, %v1814_v0  ;;  %v1456_v6 = vpack.c.bf16 %v1368_v4, %v1368_v4  ;;  %v6300_v4 = vld [vmem:[#allocation19_spill] sm:$0xff] }
 0x1a4   : > { %1816 = vst [vmem:[#allocation2 + $0xc] sm:$0xf] %v1815_v18  ;;  %v1045_v38 = vsel %vm1019_vm4, %v1012_v9, %v6300_v4  ;;  %v2116_v11 = vor.u32 %v2115_v45, %v2111_v22  ;;  %v2120_v35 = vrot.slane %v2118_v25, 1  ;;  %v6304_v25 = vld [vmem:[#allocation12_spill] sm:$0xff] }
 0x1a5   : > { %v1499_v29 = vshrl.u32 %v1456_v6, 16  ;;  %v1502_v52 = vshll.u32 %v1456_v6, 16 }
 0x1a6   : > { %v1292_v33 = vpop.f32.mrf.mxu0  ;;  %v909_v57 = vpop.permute.xlu1 %908  ;;  %v2121_v5 = vsel %vm6301_vm2, %v2116_v11, %v2120_v35 }
 0x1a7   : > { %v1501_v49 = vrot.slane %v1499_v29, 7  ;;  %v1293_v42 = vadd.f32 %v5009_v28, %v1292_v33  ;;  %v862_v48 = vpop.permute.xlu0 %861  ;;  %2302 = vrot.lane.b32.xlu2 %v2121_v5, %s4130_s25 }
 0x1a8   : > { %v1142_v1 = vsel %vm1118_vm8, %v1109_v3, %v862_v48 }
 0x1a9   : > { %v1504_v20 = vor.u32 %v1502_v52, %v1501_v49  ;;  %v1506_v16 = vrot.slane %v1501_v49, 4  ;;  %v1369_v46 = vmax.f32 %v1293_v42, 0.0  ;;  %v1175_v12 = vsel %vm1151_vm9, %v1142_v1, %v909_v57  ;;  %v1827_v42 = vld [vmem:[#allocation2 + $0x20] sm:$0x1] }
 0x1aa   : > { %v1208_v10 = vsel %vm1184_vm10, %v1175_v12, %v944_v58 }
 0x1ab   : > { %v1505_v56 = vsel %vm5079_vm1, %v1497_v59, %v1504_v20  ;;  %v1821_v61 = vsel %vm5087_vm0, %v1506_v16, %v1820_v60  ;;  %v1457_v31 = vpack.c.bf16 %v1369_v46, %v1369_v46 }
 0x1ac   : > { %1817 = vst.msk [vmem:[#allocation2 + $0x10] sm:$0xf] %vm1399_vm12, %v1505_v56 }
 0x1ad   : > { %1822 = vst [vmem:[#allocation2 + $0x14] sm:$0x1] %v1821_v61  ;;  %v1508_v15 = vshrl.u32 %v1457_v31, 16  ;;  %v1511_v30 = vshll.u32 %v1457_v31, 16 }
 0x1ae   : > { %v1294_v27 = vpop.f32.mrf.mxu0  ;;  %v827_v23 = vpop.permute.xlu1 %826 }
 0x1af   : > { %v1510_v17 = vrot.slane %v1508_v15, 7  ;;  %v1295_v47 = vadd.f32 %v5009_v28, %v1294_v27  ;;  %v792_v53 = vpop.permute.xlu0 %791 }
 0x1b0   : > { %v1078_v62 = vsel %vm1052_vm6, %v1045_v38, %v792_v53  ;;  %v1830_v53 = vld [vmem:[#allocation2 + $0x24] sm:$0xf] }
 0x1b1   : > { %v1513_v54 = vor.u32 %v1511_v30, %v1510_v17  ;;  %v1370_v39 = vmax.f32 %v1295_v47, 0.0  ;;  %3822 = vmatmul.msk.bf16.gmra.mxu2 %vm1241_vm11, %v1208_v10  ;;  %v1514_v52 = vrot.slane %v1510_v17, 4  ;;  %v1111_v57 = vsel %vm1085_vm7, %v1078_v62, %v827_v23  ;;  %v4090_v23 = vld [vmem:[%s4184_s24 + $0x9c] sm:$0xff] }
 0x1b2   : > { %v1144_v15 = vsel %vm1118_vm8, %v1111_v57, %v864_v2  ;;  %v981_v7 = vsel %vm953_vm3, %v4090_v23, %v6303_v8  ;;  %v1834_v2 = vld [vmem:[#allocation2 + $0x2c] sm:$0x1] }
 0x1b3   : > { %v1824_v0 = vsel %vm5051_vm15, %v1513_v54, %v1823_v26  ;;  %v1458_v40 = vpack.c.bf16 %v1370_v39, %v1370_v39  ;;  %v5130_v19 = vld [vmem:[#allocation2 + $0xc] sm:$0xff]  ;;  %v794_v26 = vpop.permute.xlu2 %793  ;;  %v1014_v37 = vsel %vm986_vm5, %v981_v7, %v6304_v25 }
 0x1b4   : > { %1825 = vst [vmem:[#allocation2 + $0x18] sm:$0xf] %v1824_v0  ;;  %v1933_v44 = vld [vmem:[#allocation2 + $0x14] sm:$0x1]  ;;  %v2125_v6 = vshll.u32 %v5130_v19, 16  ;;  %v2123_v60 = vshrl.u32 %v5130_v19, 16 }
 0x1b5   : > { %v1516_v34 = vshrl.u32 %v1458_v40, 16  ;;  %v2079_v43 = vunpack.c.l.b16 %v1933_v44  ;;  %v1519_v32 = vshll.u32 %v1458_v40, 16  ;;  %v6305_v0 = vld [vmem:[#allocation24_spill] sm:$0xff] }
 0x1b6   : > { %v1297_v18 = vpop.f32.mrf.mxu0  ;;  %v2127_v3 = vrot.slane %v2125_v6, 1  ;;  %v946_v36 = vpop.permute.xlu1 %945  ;;  %v1047_v40 = vsel %vm1019_vm4, %v1014_v37, %v6305_v0 }
 0x1b7   : > { %v1518_v29 = vrot.slane %v1516_v34, 7  ;;  %v1298_v33 = vadd.f32 %v5009_v28, %v1297_v18  ;;  %v5138_v49 = vpack.c.b16 %v2079_v43, %v2079_v43  ;;  %v911_v48 = vpop.permute.xlu0 %910  ;;  %v1080_v11 = vsel %vm1052_vm6, %v1047_v40, %v794_v26  ;;  %v6307_v26 = vld [vmem:[#allocation4_spill] sm:$0xff] }
 0x1b8   : > { %v2128_v1 = vor.u32 %v2127_v3, %v2123_v60  ;;  %v1177_v55 = vsel %vm1151_vm9, %v1144_v15, %v911_v48 }
 0x1b9   : > { %v1521_v59 = vor.u32 %v1519_v32, %v1518_v29  ;;  %v1523_v20 = vrot.slane %v1518_v29, 4  ;;  %v1371_v16 = vmax.f32 %v1298_v33, 0.0  ;;  %v2130_v46 = vshll.u32 %v5138_v49, 16 }
 0x1ba   : > { %v1210_v51 = vsel %vm1184_vm10, %v1177_v55, %v946_v36 }
 0x1bb   : > { %v1522_v56 = vsel %vm5079_vm1, %v1514_v52, %v1521_v59  ;;  %v1828_v61 = vsel %vm5087_vm0, %v1523_v20, %v1827_v42  ;;  %v1459_v31 = vpack.c.bf16 %v1371_v16, %v1371_v16  ;;  %v2132_v58 = vrot.slane %v2130_v46, 1  ;;  %v913_v57 = vpop.permute.xlu2 %912 }
 0x1bc   : > { %1826 = vst.msk [vmem:[#allocation2 + $0x1c] sm:$0xf] %vm1399_vm12, %v1522_v56 }
 0x1bd   : > { %1829 = vst [vmem:[#allocation2 + $0x20] sm:$0x1] %v1828_v61  ;;  %v1525_v12 = vshrl.u32 %v1459_v31, 16  ;;  %v5152_v24 = vsel %vm6302_vm13, %v2128_v1, %v2132_v58  ;;  %v1528_v17 = vshll.u32 %v1459_v31, 16  ;;  %vm6312_vm13 = vmmov %vm6301_vm2 }
 0x1be   : > { %2304 = vrot.lane.b32.xlu0 %v5152_v24, %s4130_s25  ;;  %v1299_v30 = vpop.f32.mrf.mxu0  ;;  %v866_v38 = vpop.permute.xlu1 %865 }
 0x1bf   : > { %v1527_v27 = vrot.slane %v1525_v12, 7  ;;  %v1300_v47 = vadd.f32 %v5009_v28, %v1299_v30  ;;  %v829_v39 = vpop.permute.xlu0 %828 }
 0x1c0   : > { %v1113_v29 = vsel %vm1085_vm7, %v1080_v11, %v829_v39 }
 0x1c1   : > { %v1530_v10 = vor.u32 %v1528_v17, %v1527_v27  ;;  %v1372_v54 = vmax.f32 %v1300_v47, 0.0  ;;  %3823 = vmatmul.msk.bf16.gmra.mxu2 %vm1241_vm11, %v1210_v51  ;;  %v1531_v5 = vrot.slane %v1527_v27, 4  ;;  %v1146_v1 = vsel %vm1118_vm8, %v1113_v29, %v866_v38  ;;  %v1837_v27 = vld [vmem:[#allocation2 + $0x30] sm:$0xf]  ;;  %v4091_v51 = vld [vmem:[%s4184_s24 + $0xa8] sm:$0xff] }
 0x1c2   : > { %v1179_v58 = vsel %vm1151_vm9, %v1146_v1, %v913_v57 }
 0x1c3   : > { %v1831_v50 = vsel %vm5051_vm15, %v1530_v10, %v1830_v53  ;;  %v1460_v22 = vpack.c.bf16 %v1372_v54, %v1372_v54  ;;  %v5164_v45 = vld [vmem:[#allocation2 + $0x18] sm:$0xff]  ;;  %v983_v10 = vsel %vm953_vm3, %v4091_v51, %v6307_v26  ;;  %v6308_v54 = vld [vmem:[#allocation18_spill] sm:$0xff]  ;;  %v831_v8 = vpop.permute.xlu2 %830 }
 0x1c4   : > { %1832 = vst [vmem:[#allocation2 + $0x24] sm:$0xf] %v1831_v50  ;;  %v1936_v9 = vld [vmem:[#allocation2 + $0x20] sm:$0x1]  ;;  %v2137_v34 = vshll.u32 %v5164_v45, 16  ;;  %v2135_v32 = vshrl.u32 %v5164_v45, 16  ;;  %v1016_v39 = vsel %vm986_vm5, %v983_v10, %v6308_v54 }
 0x1c5   : > { %v1533_v4 = vshrl.u32 %v1460_v22, 16  ;;  %v2080_v44 = vunpack.c.l.b16 %v1936_v9  ;;  %v1536_v43 = vshll.u32 %v1460_v22, 16  ;;  %v6309_v22 = vld [vmem:[#allocation23_spill] sm:$0xff]  ;;  %v6311_v10 = vld [vmem:[#allocation17_spill] sm:$0xff] }
 0x1c6   : > { %v1302_v35 = vpop.f32.mrf.mxu0  ;;  %v2139_v33 = vrot.slane %v2137_v34, 1  ;;  %v796_v55 = vpop.permute.xlu1 %795  ;;  %v1049_v25 = vsel %vm1019_vm4, %v1016_v39, %v6309_v22  ;;  %v6310_v51 = vld [vmem:[#allocation11_spill] sm:$0xff] }
 0x1c7   : > { %v1535_v62 = vrot.slane %v1533_v4, 7  ;;  %v1303_v18 = vadd.f32 %v5009_v28, %v1302_v35  ;;  %v5173_v6 = vpack.c.b16 %v2080_v44, %v2080_v44  ;;  %v948_v56 = vpop.permute.xlu0 %947  ;;  %v1082_v9 = vsel %vm1052_vm6, %v1049_v25, %v796_v55  ;;  %v1844_v55 = vld [vmem:[#allocation2 + $0x3c] sm:$0xf] }
 0x1c8   : > { %v2140_v3 = vor.u32 %v2139_v33, %v2135_v32  ;;  %v1212_v17 = vsel %vm1184_vm10, %v1179_v58, %v948_v56 }
 0x1c9   : > { %v1538_v52 = vor.u32 %v1536_v43, %v1535_v62  ;;  %v1540_v42 = vrot.slane %v1535_v62, 4  ;;  %v1373_v48 = vmax.f32 %v1303_v18, 0.0  ;;  %v2142_v60 = vshll.u32 %v5173_v6, 16  ;;  %v1841_v18 = vld [vmem:[#allocation2 + $0x38] sm:$0x1] }
 0x1ca   : > { %v1115_v43 = vsel %vm1085_vm7, %v1082_v9, %v831_v8 }
 0x1cb   : > { %v1539_v59 = vsel %vm5079_vm1, %v1531_v5, %v1538_v52  ;;  %v1835_v20 = vsel %vm5087_vm0, %v1540_v42, %v1834_v2  ;;  %v1461_v16 = vpack.c.bf16 %v1373_v48, %v1373_v48  ;;  %v2144_v46 = vrot.slane %v2142_v60, 1  ;;  %v950_v1 = vpop.permute.xlu2 %949 }
 0x1cc   : > { %1833 = vst.msk [vmem:[#allocation2 + $0x28] sm:$0xf] %vm1399_vm12, %v1539_v59 }
 0x1cd   : > { %1836 = vst [vmem:[#allocation2 + $0x2c] sm:$0x1] %v1835_v20  ;;  %v1542_v61 = vshrl.u32 %v1461_v16, 16  ;;  %v5185_v31 = vsel %vm6306_vm14, %v2140_v3, %v2144_v46  ;;  %v1545_v12 = vshll.u32 %v1461_v16, 16  ;;  %vm6313_vm14 = vmmov %vm6301_vm2 }
 0x1ce   : > { %2306 = vrot.lane.b32.xlu1 %v5185_v31, %s4130_s25  ;;  %v1304_v36 = vpop.f32.mrf.mxu0  ;;  %v915_v52 = vpop.permute.xlu1 %914 }
 0x1cf   : > { %v1544_v15 = vrot.slane %v1542_v61, 7  ;;  %v1305_v30 = vadd.f32 %v5009_v28, %v1304_v36  ;;  %v868_v4 = vpop.permute.xlu0 %867 }
 0x1d0   : > { %v1148_v57 = vsel %vm1118_vm8, %v1115_v43, %v868_v4 }
 0x1d1   : > { %v1547_v47 = vor.u32 %v1545_v12, %v1544_v15  ;;  %v1374_v53 = vmax.f32 %v1305_v30, 0.0  ;;  %3824 = vmatmul.msk.bf16.gmra.mxu2 %vm1241_vm11, %v1212_v17  ;;  %v1548_v29 = vrot.slane %v1544_v15, 4  ;;  %v1181_v46 = vsel %vm1151_vm9, %v1148_v57, %v915_v52 }
 0x1d3   : > { %v1838_v23 = vsel %vm5051_vm15, %v1547_v47, %v1837_v27  ;;  %v1462_v7 = vpack.c.bf16 %v1374_v53, %v1374_v53  ;;  %v5200_v50 = vld [vmem:[#allocation2 + $0x24] sm:$0xff]  ;;  %v1214_v27 = vsel %vm1184_vm10, %v1181_v46, %v950_v1  ;;  %v4092_v53 = vld [vmem:[%s4184_s24 + $0xb4] sm:$0xff] }
 0x1d4   : > { %1839 = vst [vmem:[#allocation2 + $0x30] sm:$0xf] %v1838_v23  ;;  %v1939_v37 = vld [vmem:[#allocation2 + $0x2c] sm:$0x1]  ;;  %v2149_v44 = vshll.u32 %v5200_v50, 16  ;;  %v2147_v5 = vshrl.u32 %v5200_v50, 16  ;;  %v985_v26 = vsel %vm953_vm3, %v4092_v53, %v6310_v51 }
 0x1d5   : > { %v1550_v0 = vshrl.u32 %v1462_v7, 16  ;;  %v2081_v40 = vunpack.c.l.b16 %v1939_v37  ;;  %v1553_v35 = vshll.u32 %v1462_v7, 16  ;;  %v1018_v54 = vsel %vm986_vm5, %v985_v26, %v6311_v10 }
 0x1d6   : > { %v1307_v38 = vpop.f32.mrf.mxu0  ;;  %v2151_v2 = vrot.slane %v2149_v44, 1  ;;  %v833_v23 = vpop.permute.xlu1 %832  ;;  %v1051_v22 = vsel %vm1019_vm4, %v1018_v54, %v4761_v21 }
 0x1d7   : > { %v1552_v11 = vrot.slane %v1550_v0, 7  ;;  %v1308_v34 = vadd.f32 %v5009_v28, %v1307_v38  ;;  %v5207_v62 = vpack.c.b16 %v2081_v40, %v2081_v40  ;;  %v798_v30 = vpop.permute.xlu0 %797 }
 0x1d8   : > { %v2152_v48 = vor.u32 %v2151_v2, %v2147_v5  ;;  %v1084_v37 = vsel %vm1052_vm6, %v1051_v22, %v798_v30  ;;  %v870_v2 = vpop.permute.xlu2 %869 }
 0x1d9   : > { %v1555_v32 = vor.u32 %v1553_v35, %v1552_v11  ;;  %v1557_v33 = vrot.slane %v1552_v11, 4  ;;  %v1375_v42 = vmax.f32 %v1308_v34, 0.0  ;;  %v2154_v60 = vshll.u32 %v5207_v62, 16 }
 0x1da   : > { %v1117_v43 = vsel %vm1085_vm7, %v1084_v37, %v833_v23  ;;  %v1855_v23 = vld [vmem:[#allocation2 + $0x50] sm:$0x1] }
 0x1db   : > { %v1556_v3 = vsel %vm5079_vm1, %v1548_v29, %v1555_v32  ;;  %v1842_v59 = vsel %vm5087_vm0, %v1557_v33, %v1841_v18  ;;  %v1463_v20 = vpack.c.bf16 %v1375_v42, %v1375_v42  ;;  %v2156_v16 = vrot.slane %v2154_v60, 1  ;;  %v1848_v18 = vld [vmem:[#allocation2 + $0x44] sm:$0x1] }
 0x1dc   : > { %1840 = vst.msk [vmem:[#allocation2 + $0x34] sm:$0xf] %vm1399_vm12, %v1556_v3 }
 0x1dd   : > { %1843 = vst [vmem:[#allocation2 + $0x38] sm:$0x1] %v1842_v59  ;;  %v1559_v56 = vshrl.u32 %v1463_v20, 16  ;;  %v5220_v61 = vsel %vm6301_vm2, %v2152_v48, %v2156_v16  ;;  %v1562_v15 = vshll.u32 %v1463_v20, 16  ;;  %v1150_v20 = vsel %vm1118_vm8, %v1117_v43, %v870_v2 }
 0x1de   : > { %v1309_v36 = vpop.f32.mrf.mxu0  ;;  %2308 = vrot.lane.b32.xlu2 %v5220_v61, %s4130_s25  ;;  %v952_v46 = vpop.permute.xlu1 %951 }
 0x1df   : > { %v1561_v58 = vrot.slane %v1559_v56, 7  ;;  %v1310_v12 = vadd.f32 %v5009_v28, %v1309_v36  ;;  %v917_v42 = vpop.permute.xlu0 %916 }
 0x1e0   : > { %v1183_v16 = vsel %vm1151_vm9, %v1150_v20, %v917_v42  ;;  %v1872_v20 = vld [vmem:[#allocation2 + $0x6c] sm:$0xf] }
 0x1e1   : > { %v1564_v17 = vor.u32 %v1562_v15, %v1561_v58  ;;  %v1376_v47 = vmax.f32 %v1310_v12, 0.0  ;;  %3825 = vmatmul.msk.bf16.gmra.mxu2 %vm1241_vm11, %v1214_v27  ;;  %v1565_v34 = vrot.slane %v1561_v58, 4  ;;  %v1216_v30 = vsel %vm1184_vm10, %v1183_v16, %v952_v46 }
 0x1e3   : > { %v1845_v39 = vsel %vm5051_vm15, %v1564_v17, %v1844_v55  ;;  %v1464_v8 = vpack.c.bf16 %v1376_v47, %v1376_v47  ;;  %v5234_v7 = vld [vmem:[#allocation2 + $0x30] sm:$0xff]  ;;  %v1851_v55 = vld [vmem:[#allocation2 + $0x48] sm:$0xf] }
 0x1e4   : > { %1846 = vst [vmem:[#allocation2 + $0x3c] sm:$0xf] %v1845_v39  ;;  %v1942_v25 = vld [vmem:[#allocation2 + $0x38] sm:$0x1]  ;;  %v2161_v4 = vshll.u32 %v5234_v7, 16  ;;  %v2159_v21 = vshrl.u32 %v5234_v7, 16 }
 0x1e5   : > { %v1567_v9 = vshrl.u32 %v1464_v8, 16  ;;  %v2082_v0 = vunpack.c.l.b16 %v1942_v25  ;;  %v1570_v44 = vshll.u32 %v1464_v8, 16 }
 0x1e6   : > { %v1312_v40 = vpop.f32.mrf.mxu0  ;;  %v2163_v5 = vrot.slane %v2161_v4, 1 }
 0x1e7   : > { %v1569_v38 = vrot.slane %v1567_v9, 7  ;;  %v1313_v11 = vadd.f32 %v5009_v28, %v1312_v40  ;;  %v5241_v35 = vpack.c.b16 %v2082_v0, %v2082_v0 }
 0x1e8   : > { %v2164_v57 = vor.u32 %v2163_v5, %v2159_v21  ;;  %v1858_v5 = vld [vmem:[#allocation2 + $0x54] sm:$0xf] }
 0x1e9   : > { %v1572_v29 = vor.u32 %v1570_v44, %v1569_v38  ;;  %v1574_v32 = vrot.slane %v1569_v38, 4  ;;  %v1377_v33 = vmax.f32 %v1313_v11, 0.0  ;;  %v2166_v52 = vshll.u32 %v5241_v35, 16 }
 0x1eb   : > { %v1573_v48 = vsel %vm5079_vm1, %v1565_v34, %v1572_v29  ;;  %v1849_v60 = vsel %vm5087_vm0, %v1574_v32, %v1848_v18  ;;  %v1465_v3 = vpack.c.bf16 %v1377_v33, %v1377_v33  ;;  %v2168_v59 = vrot.slane %v2166_v52, 1 }
 0x1ec   : > { %1847 = vst.msk [vmem:[#allocation2 + $0x40] sm:$0xf] %vm1399_vm12, %v1573_v48 }
 0x1ed   : > { %1850 = vst [vmem:[#allocation2 + $0x44] sm:$0x1] %v1849_v60  ;;  %v1576_v1 = vshrl.u32 %v1465_v3, 16  ;;  %v5254_v56 = vsel %vm6312_vm13, %v2164_v57, %v2168_v59  ;;  %v1579_v15 = vshll.u32 %v1465_v3, 16  ;;  %vm6314_vm13 = vmmov %vm6301_vm2 }
 0x1ee   : > { %2310 = vrot.lane.b32.xlu0 %v5254_v56, %s4130_s25  ;;  %v1314_v36 = vpop.f32.mrf.mxu0 }
 0x1ef   : > { %v1578_v58 = vrot.slane %v1576_v1, 7  ;;  %v1315_v12 = vadd.f32 %v5009_v28, %v1314_v36 }
 0x1f1   : > { %v1581_v27 = vor.u32 %v1579_v15, %v1578_v58  ;;  %v1378_v17 = vmax.f32 %v1315_v12, 0.0  ;;  %3826 = vmatmul.msk.bf16.gmra.mxu2 %vm1241_vm11, %v1216_v30  ;;  %v1582_v8 = vrot.slane %v1578_v58, 4  ;;  %v1862_v15 = vld [vmem:[#allocation2 + $0x5c] sm:$0x1] }
 0x1f3   : > { %v1852_v47 = vsel %vm5051_vm15, %v1581_v27, %v1851_v55  ;;  %v1466_v53 = vpack.c.bf16 %v1378_v17, %v1378_v17 }
 0x1f4   : > { %1853 = vst [vmem:[#allocation2 + $0x48] sm:$0xf] %v1852_v47 }
 0x1f5   : > { %v1584_v51 = vshrl.u32 %v1466_v53, 16  ;;  %v1587_v54 = vshll.u32 %v1466_v53, 16 }
 0x1f6   : > { %v1317_v26 = vpop.f32.mrf.mxu0 }
 0x1f7   : > { %v1586_v10 = vrot.slane %v1584_v51, 7  ;;  %v1318_v39 = vadd.f32 %v5009_v28, %v1317_v26 }
 0x1f9   : > { %v1589_v22 = vor.u32 %v1587_v54, %v1586_v10  ;;  %v1591_v25 = vrot.slane %v1586_v10, 4  ;;  %v1379_v37 = vmax.f32 %v1318_v39, 0.0  ;;  %v1876_v10 = vld [vmem:[#allocation2 + $0x74] sm:$0x1] }
 0x1fb   : > { %v1590_v9 = vsel %vm5079_vm1, %v1582_v8, %v1589_v22  ;;  %v1856_v0 = vsel %vm5087_vm0, %v1591_v25, %v1855_v23  ;;  %v1467_v40 = vpack.c.bf16 %v1379_v37, %v1379_v37 }
 0x1fc   : > { %1854 = vst.msk [vmem:[#allocation2 + $0x4c] sm:$0xf] %vm1399_vm12, %v1590_v9  ;;  %v1327_v4 = vpop.f32.mrf.mxu2 }
 0x1fd   : > { %1857 = vst [vmem:[#allocation2 + $0x50] sm:$0x1] %v1856_v0  ;;  %v1593_v38 = vshrl.u32 %v1467_v40, 16  ;;  %v1328_v44 = vadd.f32 %v5009_v28, %v1327_v4  ;;  %v1596_v43 = vshll.u32 %v1467_v40, 16 }
 0x1fe   : > { %v1319_v11 = vpop.f32.mrf.mxu0 }
 0x1ff   : > { %v1595_v34 = vrot.slane %v1593_v38, 7  ;;  %v1383_v18 = vmax.f32 %v1328_v44, 0.0  ;;  %v1320_v21 = vadd.f32 %v5009_v28, %v1319_v11 }
 0x201   : > { %v1598_v2 = vor.u32 %v1596_v43, %v1595_v34  ;;  %v1471_v29 = vpack.c.bf16 %v1383_v18, %v1383_v18  ;;  %v1380_v32 = vmax.f32 %v1320_v21, 0.0  ;;  %v1599_v58 = vrot.slane %v1595_v34, 4  ;;  %v1865_v21 = vld [vmem:[#allocation2 + $0x60] sm:$0xf] }
 0x203   : > { %v1859_v33 = vsel %vm5051_vm15, %v1598_v2, %v1858_v5  ;;  %v1627_v52 = vshrl.u32 %v1471_v29, 16  ;;  %v1468_v42 = vpack.c.bf16 %v1380_v32, %v1380_v32  ;;  %v1630_v60 = vshll.u32 %v1471_v29, 16 }
 0x204   : > { %1860 = vst [vmem:[#allocation2 + $0x54] sm:$0xf] %v1859_v33  ;;  %v1329_v57 = vpop.f32.mrf.mxu2 }
 0x205   : > { %v1629_v48 = vrot.slane %v1627_v52, 7  ;;  %v1601_v3 = vshrl.u32 %v1468_v42, 16  ;;  %v1330_v59 = vadd.f32 %v5009_v28, %v1329_v57  ;;  %v1604_v1 = vshll.u32 %v1468_v42, 16 }
 0x207   : > { %v1632_v16 = vor.u32 %v1630_v60, %v1629_v48  ;;  %v1603_v46 = vrot.slane %v1601_v3, 7  ;;  %v1384_v36 = vmax.f32 %v1330_v59, 0.0  ;;  %v1633_v39 = vrot.slane %v1629_v48, 4 }
 0x209   : > { %v1873_v12 = vsel %vm5051_vm15, %v1632_v16, %v1872_v20  ;;  %v1606_v55 = vor.u32 %v1604_v1, %v1603_v46  ;;  %v1608_v30 = vrot.slane %v1603_v46, 4  ;;  %v1472_v27 = vpack.c.bf16 %v1384_v36, %v1384_v36  ;;  %v1879_v46 = vld [vmem:[#allocation2 + $0x78] sm:$0xf] }
 0x20a   : > { %1874 = vst [vmem:[#allocation2 + $0x6c] sm:$0xf] %v1873_v12 }
 0x20b   : > { %v1607_v17 = vsel %vm5079_vm1, %v1599_v58, %v1606_v55  ;;  %v1863_v47 = vsel %vm5087_vm0, %v1608_v30, %v1862_v15  ;;  %v1635_v53 = vshrl.u32 %v1472_v27, 16  ;;  %v1638_v26 = vshll.u32 %v1472_v27, 16 }
 0x20c   : > { %1861 = vst.msk [vmem:[#allocation2 + $0x58] sm:$0xf] %vm1399_vm12, %v1607_v17 }
 0x20d   : > { %1864 = vst [vmem:[#allocation2 + $0x5c] sm:$0x1] %v1863_v47  ;;  %v1637_v51 = vrot.slane %v1635_v53, 7  ;;  %v1869_v53 = vld [vmem:[#allocation2 + $0x68] sm:$0x1] }
 0x20e   : > { %v1322_v54 = vpop.f32.mrf.mxu0 }
 0x20f   : > { %v1640_v23 = vor.u32 %v1638_v26, %v1637_v51  ;;  %v1642_v8 = vrot.slane %v1637_v51, 4  ;;  %v1323_v22 = vadd.f32 %v5009_v28, %v1322_v54 }
 0x211   : > { %v1641_v25 = vsel %vm5079_vm1, %v1633_v39, %v1640_v23  ;;  %v1877_v37 = vsel %vm5087_vm0, %v1642_v8, %v1876_v10  ;;  %v1381_v9 = vmax.f32 %v1323_v22, 0.0 }
 0x212   : > { %1875 = vst.msk [vmem:[#allocation2 + $0x70] sm:$0xf] %vm1399_vm12, %v1641_v25 }
 0x213   : > { %1878 = vst [vmem:[#allocation2 + $0x74] sm:$0x1] %v1877_v37  ;;  %v1469_v0 = vpack.c.bf16 %v1381_v9, %v1381_v9  ;;  %v1332_v40 = vpop.f32.mrf.mxu2 }
 0x214   : > { %v1333_v4 = vadd.f32 %v5009_v28, %v1332_v40 }
 0x215   : > { %v1610_v38 = vshrl.u32 %v1469_v0, 16  ;;  %v1613_v43 = vshll.u32 %v1469_v0, 16 }
 0x216   : > { %v1385_v44 = vmax.f32 %v1333_v4, 0.0  ;;  %v1324_v11 = vpop.f32.mrf.mxu0  ;;  %v1883_v4 = vld [vmem:[#allocation2 + $0x80] sm:$0x1] }
 0x217   : > { %v1612_v34 = vrot.slane %v1610_v38, 7  ;;  %v1325_v18 = vadd.f32 %v5009_v28, %v1324_v11 }
 0x218   : > { %v1473_v5 = vpack.c.bf16 %v1385_v44, %v1385_v44 }
 0x219   : > { %v1615_v2 = vor.u32 %v1613_v43, %v1612_v34  ;;  %v1382_v29 = vmax.f32 %v1325_v18, 0.0  ;;  %v5289_v32 = vld [vmem:[#allocation2 + $0x6c] sm:$0xff]  ;;  %v1616_v10 = vrot.slane %v1612_v34, 4 }
 0x21a   : > { %v1644_v33 = vshrl.u32 %v1473_v5, 16  ;;  %v1957_v52 = vld [vmem:[#allocation2 + $0x74] sm:$0x1]  ;;  %v1647_v59 = vshll.u32 %v1473_v5, 16  ;;  %v2221_v16 = vshll.u32 %v5289_v32, 16  ;;  %v2219_v12 = vshrl.u32 %v5289_v32, 16 }
 0x21b   : > { %v1866_v42 = vsel %vm5051_vm15, %v1615_v2, %v1865_v21  ;;  %v1470_v57 = vpack.c.bf16 %v1382_v29, %v1382_v29  ;;  %v1334_v48 = vpop.f32.mrf.mxu2  ;;  %v2087_v60 = vunpack.c.l.b16 %v1957_v52 }
 0x21c   : > { %1867 = vst [vmem:[#allocation2 + $0x60] sm:$0xf] %v1866_v42  ;;  %v1646_v3 = vrot.slane %v1644_v33, 7  ;;  %v1335_v20 = vadd.f32 %v5009_v28, %v1334_v48  ;;  %v2223_v55 = vrot.slane %v2221_v16, 1 }
 0x21d   : > { %v1618_v1 = vshrl.u32 %v1470_v57, 16  ;;  %v5295_v36 = vpack.c.b16 %v2087_v60, %v2087_v60  ;;  %v1621_v27 = vshll.u32 %v1470_v57, 16  ;;  %v1886_v57 = vld [vmem:[#allocation2 + $0x84] sm:$0xf] }
 0x21e   : > { %v1649_v58 = vor.u32 %v1647_v59, %v1646_v3  ;;  %v1386_v15 = vmax.f32 %v1335_v20, 0.0  ;;  %v2224_v26 = vor.u32 %v2223_v55, %v2219_v12  ;;  %v1650_v44 = vrot.slane %v1646_v3, 4 }
 0x21f   : > { %v1620_v30 = vrot.slane %v1618_v1, 7  ;;  %v2226_v17 = vshll.u32 %v5295_v36, 16 }
 0x220   : > { %v1880_v47 = vsel %vm5051_vm15, %v1649_v58, %v1879_v46  ;;  %v1474_v51 = vpack.c.bf16 %v1386_v15, %v1386_v15 }
 0x221   : > { %1881 = vst [vmem:[#allocation2 + $0x78] sm:$0xf] %v1880_v47  ;;  %v1623_v54 = vor.u32 %v1621_v27, %v1620_v30  ;;  %v1625_v39 = vrot.slane %v1620_v30, 4  ;;  %v2228_v23 = vrot.slane %v2226_v17, 1 }
 0x222   : > { %v1652_v8 = vshrl.u32 %v1474_v51, 16  ;;  %v1655_v0 = vshll.u32 %v1474_v51, 16 }
 0x223   : > { %v1624_v22 = vsel %vm5079_vm1, %v1616_v10, %v1623_v54  ;;  %v1870_v25 = vsel %vm5087_vm0, %v1625_v39, %v1869_v53  ;;  %v5306_v37 = vsel %vm6313_vm14, %v2224_v26, %v2228_v23  ;;  %v1890_v53 = vld [vmem:[#allocation2 + $0x8c] sm:$0x1]  ;;  %vm6315_vm14 = vmmov %vm6301_vm2 }
 0x224   : > { %1868 = vst.msk [vmem:[#allocation2 + $0x64] sm:$0xf] %vm1399_vm12, %v1624_v22  ;;  %v1654_v9 = vrot.slane %v1652_v8, 7  ;;  %2320 = vrot.lane.b32.xlu2 %v5306_v37, %s4130_s25  ;;  %v1337_v40 = vpop.f32.mrf.mxu2 }
 0x225   : > { %1871 = vst [vmem:[#allocation2 + $0x68] sm:$0x1] %v1870_v25  ;;  %v1338_v38 = vadd.f32 %v5009_v28, %v1337_v40 }
 0x226   : > { %v1657_v11 = vor.u32 %v1655_v0, %v1654_v9  ;;  %v1659_v34 = vrot.slane %v1654_v9, 4 }
 0x227   : > { %v1387_v43 = vmax.f32 %v1338_v38, 0.0 }
 0x228   : > { %v1658_v18 = vsel %vm5079_vm1, %v1650_v44, %v1657_v11  ;;  %v1884_v21 = vsel %vm5087_vm0, %v1659_v34, %v1883_v4  ;;  %v1893_v34 = vld [vmem:[#allocation2 + $0x90] sm:$0xf] }
 0x229   : > { %1882 = vst.msk [vmem:[#allocation2 + $0x7c] sm:$0xf] %vm1399_vm12, %v1658_v18  ;;  %v1475_v5 = vpack.c.bf16 %v1387_v43, %v1387_v43 }
 0x22a   : > { %1885 = vst [vmem:[#allocation2 + $0x80] sm:$0x1] %v1884_v21  ;;  %v1945_v21 = vld [vmem:[#allocation2 + $0x44] sm:$0x1] }
 0x22b   : > { %v1661_v2 = vshrl.u32 %v1475_v5, 16  ;;  %v1664_v52 = vshll.u32 %v1475_v5, 16  ;;  %v5339_v5 = vld [vmem:[#allocation2 + $0x3c] sm:$0xff] }
 0x22c   : > { %v1339_v29 = vpop.f32.mrf.mxu2  ;;  %v1954_v41 = vld [vmem:[#allocation2 + $0x68] sm:$0x1]  ;;  %v5539_v13 = vld [vmem:[#allocation2 + $0x60] sm:$0xff] }
 0x22d   : > { %v1663_v33 = vrot.slane %v1661_v2, 7  ;;  %v1340_v42 = vadd.f32 %v5009_v28, %v1339_v29 }
 0x22f   : > { %v1666_v48 = vor.u32 %v1664_v52, %v1663_v33  ;;  %v1388_v60 = vmax.f32 %v1340_v42, 0.0  ;;  %v1667_v10 = vrot.slane %v1663_v33, 4  ;;  %v2083_v42 = vunpack.c.l.b16 %v1945_v21 }
 0x230   : > { %v5318_v3 = vld [vmem:[#allocation2 + $0x78] sm:$0xff] }
 0x231   : > { %v1887_v59 = vsel %vm5051_vm15, %v1666_v48, %v1886_v57  ;;  %v1476_v20 = vpack.c.bf16 %v1388_v60, %v1388_v60  ;;  %v1960_v16 = vld [vmem:[#allocation2 + $0x80] sm:$0x1]  ;;  %v2233_v1 = vshll.u32 %v5318_v3, 16  ;;  %v2231_v55 = vshrl.u32 %v5318_v3, 16 }
 0x232   : > { %1888 = vst [vmem:[#allocation2 + $0x84] sm:$0xf] %v1887_v59  ;;  %v2088_v46 = vunpack.c.l.b16 %v1960_v16  ;;  %v2173_v59 = vshll.u32 %v5339_v5, 16 }
 0x233   : > { %v1669_v58 = vshrl.u32 %v1476_v20, 16  ;;  %v2235_v30 = vrot.slane %v2233_v1, 1  ;;  %v1672_v17 = vshll.u32 %v1476_v20, 16 }
 0x234   : > { %v1342_v15 = vpop.f32.mrf.mxu2  ;;  %v5323_v12 = vpack.c.b16 %v2088_v46, %v2088_v46  ;;  %v5350_v46 = vld [vmem:[%s6252_s2] ss:$0 sm:$0xff] }
 0x235   : > { %v1671_v27 = vrot.slane %v1669_v58, 7  ;;  %v1343_v47 = vadd.f32 %v5009_v28, %v1342_v15  ;;  %v2236_v51 = vor.u32 %v2235_v30, %v2231_v55  ;;  %v1897_v55 = vld [vmem:[#allocation2 + $0x98] sm:$0x1] }
 0x236   : > { %v2238_v26 = vshll.u32 %v5323_v12, 16 }
 0x237   : > { %v1674_v54 = vor.u32 %v1672_v17, %v1671_v27  ;;  %v1676_v39 = vrot.slane %v1671_v27, 4  ;;  %v1389_v23 = vmax.f32 %v1343_v47, 0.0  ;;  %v5356_v17 = vpack.c.b16 %v2083_v42, %v2083_v42 }
 0x238   : > { %v2240_v8 = vrot.slane %v2238_v26, 1 }
 0x239   : > { %v1675_v22 = vsel %vm5079_vm1, %v1667_v10, %v1674_v54  ;;  %v1891_v25 = vsel %vm5087_vm0, %v1676_v39, %v1890_v53  ;;  %v1477_v9 = vpack.c.bf16 %v1389_v23, %v1389_v23 }
 0x23a   : > { %1889 = vst.msk [vmem:[#allocation2 + $0x88] sm:$0xf] %vm1399_vm12, %v1675_v22  ;;  %v5334_v0 = vsel %vm6301_vm2, %v2236_v51, %v2240_v8  ;;  %vm6316_vm2 = vcmask 1046528  }
 0x23b   : > { %1892 = vst [vmem:[#allocation2 + $0x8c] sm:$0x1] %v1891_v25  ;;  %v1678_v40 = vshrl.u32 %v1477_v9, 16  ;;  %2322 = vrot.lane.b32.xlu0 %v5334_v0, %s4130_s25  ;;  %v1681_v44 = vshll.u32 %v1477_v9, 16  ;;  %v2175_v9 = vrot.slane %v2173_v59, 1 }
 0x23c   : > { %v1344_v4 = vpop.f32.mrf.mxu2 }
 0x23d   : > { %v1680_v38 = vrot.slane %v1678_v40, 7  ;;  %v1345_v11 = vadd.f32 %v5009_v28, %v1344_v4  ;;  %v2178_v40 = vshll.u32 %v5356_v17, 16 }
 0x23f   : > { %v1683_v43 = vor.u32 %v1681_v44, %v1680_v38  ;;  %v1390_v18 = vmax.f32 %v1345_v11, 0.0  ;;  %v1684_v15 = vrot.slane %v1680_v38, 4 }
 0x241   : > { %v1894_v2 = vsel %vm5051_vm15, %v1683_v43, %v1893_v34  ;;  %v1478_v29 = vpack.c.bf16 %v1390_v18, %v1390_v18  ;;  %v5343_v33 = vld [vmem:[#allocation2 + $0x84] sm:$0xff]  ;;  %v2171_v34 = vshrl.u32 %v5339_v5, 16  ;;  %v1900_v43 = vld [vmem:[#allocation2 + $0x9c] sm:$0xf] }
 0x242   : > { %1895 = vst [vmem:[#allocation2 + $0x90] sm:$0xf] %v1894_v2  ;;  %v1963_v52 = vld [vmem:[#allocation2 + $0x8c] sm:$0x1]  ;;  %v2245_v28 = vshll.u32 %v5343_v33, 16  ;;  %v2243_v30 = vshrl.u32 %v5343_v33, 16 }
 0x243   : > { %v1686_v57 = vshrl.u32 %v1478_v29, 16  ;;  %v2089_v48 = vunpack.c.l.b16 %v1963_v52  ;;  %v1689_v16 = vshll.u32 %v1478_v29, 16  ;;  %v2176_v2 = vor.u32 %v2175_v9, %v2171_v34 }
 0x244   : > { %v1347_v60 = vpop.f32.mrf.mxu2  ;;  %v2247_v27 = vrot.slane %v2245_v28, 1  ;;  %v2180_v29 = vrot.slane %v2178_v40, 1 }
 0x245   : > { %v1688_v20 = vrot.slane %v1686_v57, 7  ;;  %v1348_v1 = vadd.f32 %v5350_v46, %v1347_v60  ;;  %v5353_v58 = vpack.c.b16 %v2089_v48, %v2089_v48 }
 0x246   : > { %v2248_v10 = vor.u32 %v2247_v27, %v2243_v30  ;;  %v5377_v28 = vsel %vm6315_vm14, %v2176_v2, %v2180_v29  ;;  %vm6317_vm14 = vmmov %vm6316_vm2 }
 0x247   : > { %v1691_v47 = vor.u32 %v1689_v16, %v1688_v20  ;;  %v1693_v53 = vrot.slane %v1688_v20, 4  ;;  %v1391_v51 = vmax.f32 %v1348_v1, 0.0  ;;  %v2250_v26 = vshll.u32 %v5353_v58, 16 }
 0x249   : > { %v1692_v54 = vsel %vm5079_vm1, %v1684_v15, %v1691_v47  ;;  %v1898_v39 = vsel %vm5087_vm0, %v1693_v53, %v1897_v55  ;;  %v1479_v23 = vpack.c.bf16 %v1391_v51, %v1391_v51  ;;  %v2252_v8 = vrot.slane %v2250_v26, 1  ;;  %v1904_v47 = vld [vmem:[#allocation2 + $0xa4] sm:$0x1] }
 0x24a   : > { %1896 = vst.msk [vmem:[#allocation2 + $0x94] sm:$0xf] %vm1399_vm12, %v1692_v54  ;;  %v2338_v53 = vrot.slane %v5138_v49, 1 }
 0x24b   : > { %1899 = vst [vmem:[#allocation2 + $0x98] sm:$0x1] %v1898_v39  ;;  %v1695_v22 = vshrl.u32 %v1479_v23, 16  ;;  %v5365_v25 = vsel %vm6314_vm13, %v2248_v10, %v2252_v8  ;;  %v1698_v44 = vshll.u32 %v1479_v23, 16  ;;  %v2337_v8 = vrot.slane %v5130_v19, 1 }
 0x24c   : > { %2324 = vrot.lane.b32.xlu1 %v5365_v25, %s4130_s25  ;;  %v1349_v4 = vpop.f32.mrf.mxu2 }
 0x24d   : > { %v1697_v38 = vrot.slane %v1695_v22, 7  ;;  %v1350_v11 = vadd.f32 %v5350_v46, %v1349_v4 }
 0x24f   : > { %v1700_v18 = vor.u32 %v1698_v44, %v1697_v38  ;;  %v1392_v21 = vmax.f32 %v1350_v11, 0.0  ;;  %v1701_v27 = vrot.slane %v1697_v38, 4  ;;  %v5395_v44 = vsel %vm6316_vm2, %v2337_v8, %v2338_v53 }
 0x251   : > { %v1901_v52 = vsel %vm5051_vm15, %v1700_v18, %v1900_v43  ;;  %v1480_v42 = vpack.c.bf16 %v1392_v21, %v1392_v21  ;;  %v5374_v57 = vld [vmem:[#allocation2 + $0x90] sm:$0xff]  ;;  %v1907_v21 = vld [vmem:[#allocation2 + $0xa8] sm:$0xf] }
 0x252   : > { %1902 = vst [vmem:[#allocation2 + $0x9c] sm:$0xf] %v1901_v52  ;;  %v1966_v48 = vld [vmem:[#allocation2 + $0x98] sm:$0x1]  ;;  %v2257_v16 = vshll.u32 %v5374_v57, 16  ;;  %v2255_v51 = vshrl.u32 %v5374_v57, 16 }
 0x253   : > { %v1703_v60 = vshrl.u32 %v1480_v42, 16  ;;  %v2090_v59 = vunpack.c.l.b16 %v1966_v48  ;;  %v1706_v15 = vshll.u32 %v1480_v42, 16  ;;  %v2347_v52 = vrot.slane %v5241_v35, 1  ;;  %v1948_v48 = vld [vmem:[#allocation2 + $0x50] sm:$0x1] }
 0x254   : > { %2312 = vrot.lane.b32.xlu1 %v5377_v28, %s4130_s25  ;;  %v1352_v20 = vpop.f32.mrf.mxu2  ;;  %v2259_v26 = vrot.slane %v2257_v16, 1  ;;  %v2341_v42 = vrot.slane %v5173_v6, 1  ;;  %v2346_v16 = vrot.slane %v5234_v7, 1  ;;  %v2350_v7 = vrot.slane %v5356_v17, 1 }
 0x255   : > { %v1705_v1 = vrot.slane %v1703_v60, 7  ;;  %v1353_v55 = vadd.f32 %v5350_v46, %v1352_v20  ;;  %v5383_v30 = vpack.c.b16 %v2090_v59, %v2090_v59  ;;  %v5407_v60 = vld [vmem:[#allocation2 + $0x48] sm:$0xff] }
 0x256   : > { %v2260_v22 = vor.u32 %v2259_v26, %v2255_v51  ;;  %v5416_v35 = vsel %vm6317_vm14, %v2346_v16, %v2347_v52  ;;  %v2185_v26 = vshll.u32 %v5407_v60, 16  ;;  %vm6319_vm14 = vsmask.f32 7424 }
 0x257   : > { %v1708_v10 = vor.u32 %v1706_v15, %v1705_v1  ;;  %v1710_v54 = vrot.slane %v1705_v1, 4  ;;  %v1393_v39 = vmax.f32 %v1353_v55, 0.0  ;;  %v2262_v23 = vshll.u32 %v5383_v30, 16 }
 0x258   : > { %v2340_v1 = vrot.slane %v5164_v45, 1 }
 0x259   : > { %v1709_v9 = vsel %vm5079_vm1, %v1701_v27, %v1708_v10  ;;  %v1905_v40 = vsel %vm5087_vm0, %v1710_v54, %v1904_v47  ;;  %v1481_v4 = vpack.c.bf16 %v1393_v39, %v1393_v39  ;;  %v2264_v38 = vrot.slane %v2262_v23, 1 }
 0x25a   : > { %1903 = vst.msk [vmem:[#allocation2 + $0xa0] sm:$0xf] %vm1399_vm12, %v1709_v9  ;;  %v2084_v27 = vunpack.c.l.b16 %v1948_v48  ;;  %v5419_v6 = vsel %vm6316_vm2, %v2340_v1, %v2341_v42  ;;  %v2183_v1 = vshrl.u32 %v5407_v60, 16 }
 0x25b   : > { %1906 = vst [vmem:[#allocation2 + $0xa4] sm:$0x1] %v1905_v40  ;;  %v1712_v49 = vshrl.u32 %v1481_v4, 16  ;;  %v5398_v11 = vsel %vm6314_vm13, %v2260_v22, %v2264_v38  ;;  %v1715_v43 = vshll.u32 %v1481_v4, 16  ;;  %v1911_v22 = vld [vmem:[#allocation2 + $0xb0] sm:$0x1]  ;;  %vm6318_vm13 = vmmov %vm6316_vm2 }
 0x25c   : > { %2384 = vrot.lane.b32.xlu1 %v5395_v44, %s4131_s26  ;;  %2326 = vrot.lane.b32.xlu2 %v5398_v11, %s4130_s25  ;;  %v1354_v19 = vpop.f32.mrf.mxu2  ;;  %v5432_v4 = vpack.c.b16 %v2084_v27, %v2084_v27 }
 0x25d   : > { %v1714_v34 = vrot.slane %v1712_v49, 7  ;;  %v1355_v18 = vadd.f32 %v5350_v46, %v1354_v19 }
 0x25f   : > { %v1717_v2 = vor.u32 %v1715_v43, %v1714_v34  ;;  %v1394_v29 = vmax.f32 %v1355_v18, 0.0  ;;  %v1718_v8 = vrot.slane %v1714_v34, 4  ;;  %v2349_v43 = vrot.slane %v5339_v5, 1 }
 0x261   : > { %v1908_v59 = vsel %vm5051_vm15, %v1717_v2, %v1907_v21  ;;  %v1482_v20 = vpack.c.bf16 %v1394_v29, %v1394_v29  ;;  %v5413_v15 = vld [vmem:[#allocation2 + $0x9c] sm:$0xff]  ;;  %v5442_v52 = vsel %vm6318_vm13, %v2349_v43, %v2350_v7  ;;  %v2335_v7 = vrot.slane %v5112_v14, 1  ;;  %vm6320_vm13 = vmmov %vm6319_vm14 }
 0x262   : > { %1909 = vst [vmem:[#allocation2 + $0xa8] sm:$0xf] %v1908_v59  ;;  %v1969_v55 = vld [vmem:[#allocation2 + $0xa4] sm:$0x1]  ;;  %v2269_v51 = vshll.u32 %v5413_v15, 16  ;;  %v2267_v9 = vshrl.u32 %v5413_v15, 16 }
 0x263   : > { %v1720_v47 = vshrl.u32 %v1482_v20, 16  ;;  %v2091_v53 = vunpack.c.l.b16 %v1969_v55  ;;  %v1723_v54 = vshll.u32 %v1482_v20, 16  ;;  %v2187_v59 = vrot.slane %v2185_v26, 1  ;;  %v5453_v55 = vld [vmem:[#allocation2] sm:$0xff] }
 0x264   : > { %2390 = vrot.lane.b32.xlu1 %v5416_v35, %s4131_s26  ;;  %2386 = vrot.lane.b32.xlu2 %v5419_v6, %s4131_s26  ;;  %v1357_v45 = vpop.f32.mrf.mxu2  ;;  %v2271_v40 = vrot.slane %v2269_v51, 1  ;;  %v2190_v20 = vshll.u32 %v5432_v4, 16  ;;  %v2334_v27 = vrot.slane %v5453_v55, 1  ;;  %v1914_v51 = vld [vmem:[#allocation2 + $0xb4] sm:$0xf] }
 0x265   : > { %v1722_v10 = vrot.slane %v1720_v47, 7  ;;  %v1358_v39 = vadd.f32 %v5350_v46, %v1357_v45  ;;  %v5429_v23 = vpack.c.b16 %v2091_v53, %v2091_v53 }
 0x266   : > { %v2272_v18 = vor.u32 %v2271_v40, %v2267_v9  ;;  %v2336_v9 = vsel %vm6316_vm2, %v2334_v27, %v2335_v7 }
 0x267   : > { %v1725_v38 = vor.u32 %v1723_v54, %v1722_v10  ;;  %v1727_v49 = vrot.slane %v1722_v10, 4  ;;  %v1395_v17 = vmax.f32 %v1358_v39, 0.0  ;;  %v2274_v19 = vshll.u32 %v5429_v23, 16 }
 0x268   : > { %v2188_v54 = vor.u32 %v2187_v59, %v2183_v1  ;;  %v2192_v39 = vrot.slane %v2190_v20, 1  ;;  %v1918_v59 = vld [vmem:[#allocation2 + $0xbc] sm:$0x1]  ;;  %v2344_v20 = vrot.slane %v5207_v62, 1 }
 0x269   : > { %v1726_v21 = vsel %vm5079_vm1, %v1718_v8, %v1725_v38  ;;  %v1912_v34 = vsel %vm5087_vm0, %v1727_v49, %v1911_v22  ;;  %v1483_v2 = vpack.c.bf16 %v1395_v17, %v1395_v17  ;;  %v2276_v29 = vrot.slane %v2274_v19, 1 }
 0x26a   : > { %1910 = vst.msk [vmem:[#allocation2 + $0xac] sm:$0xf] %vm1399_vm12, %v1726_v21  ;;  %v5464_v17 = vsel %vm6320_vm13, %v2188_v54, %v2192_v39 }
 0x26b   : > { %1913 = vst [vmem:[#allocation2 + $0xb0] sm:$0x1] %v1912_v34  ;;  %v1729_v42 = vshrl.u32 %v1483_v2, 16  ;;  %v5445_v48 = vsel %vm6319_vm14, %v2272_v18, %v2276_v29  ;;  %v1732_v53 = vshll.u32 %v1483_v2, 16  ;;  %v1951_v29 = vld [vmem:[#allocation2 + $0x5c] sm:$0x1]  ;;  %vm6321_vm14 = vmmov %vm6316_vm2 }
 0x26c   : > { %2392 = vrot.lane.b32.xlu2 %v5442_v52, %s4131_s26  ;;  %2328 = vrot.lane.b32.xlu0 %v5445_v48, %s4130_s25  ;;  %v1359_v16 = vpop.f32.mrf.mxu2  ;;  %vm6322_vm2 = vmmov %vm6320_vm13 }
 0x26d   : > { %v1731_v47 = vrot.slane %v1729_v42, 7  ;;  %v1360_v45 = vadd.f32 %v5350_v46, %v1359_v16  ;;  %vm6323_vm13 = vmmov %vm6321_vm14 }
 0x26f   : > { %v1734_v26 = vor.u32 %v1732_v53, %v1731_v47  ;;  %v1396_v10 = vmax.f32 %v1360_v45, 0.0  ;;  %v1735_v42 = vrot.slane %v1731_v47, 4 }
 0x271   : > { %v1915_v8 = vsel %vm5051_vm15, %v1734_v26, %v1914_v51  ;;  %v1484_v22 = vpack.c.bf16 %v1396_v10, %v1396_v10  ;;  %v5461_v40 = vld [vmem:[#allocation2 + $0xa8] sm:$0xff]  ;;  %v2343_v51 = vrot.slane %v5200_v50, 1  ;;  %v2085_v10 = vunpack.c.l.b16 %v1951_v29 }
 0x272   : > { %1916 = vst [vmem:[#allocation2 + $0xb4] sm:$0xf] %v1915_v8  ;;  %v1972_v38 = vld [vmem:[#allocation2 + $0xb0] sm:$0x1]  ;;  %v2281_v43 = vshll.u32 %v5461_v40, 16  ;;  %v2279_v16 = vshrl.u32 %v5461_v40, 16 }
 0x273   : > { %v1737_v49 = vshrl.u32 %v1484_v22, 16  ;;  %v2092_v14 = vunpack.c.l.b16 %v1972_v38  ;;  %v1740_v21 = vshll.u32 %v1484_v22, 16  ;;  %v5481_v8 = vld [vmem:[#allocation2 + $0x54] sm:$0xff] }
 0x274   : > { %2314 = vrot.lane.b32.xlu2 %v5464_v17, %s4130_s25  ;;  %2382 = vrot.lane.b32.xlu0 %v2336_v9, %s4131_s26  ;;  %v1362_v19 = vpop.f32.mrf.mxu2  ;;  %v2283_v1 = vrot.slane %v2281_v43, 1  ;;  %v5485_v9 = vsel %vm6321_vm14, %v2343_v51, %v2344_v20  ;;  %vm6325_vm14 = vmmov %vm6322_vm2 }
 0x275   : > { %v1739_v18 = vrot.slane %v1737_v49, 7  ;;  %v1363_v34 = vadd.f32 %v5350_v46, %v1362_v19  ;;  %v5471_v2 = vpack.c.b16 %v2092_v14, %v2092_v14  ;;  %v2101_v49 = vpack.c.b16 %v2085_v10, %v2085_v10 }
 0x276   : > { %v2284_v26 = vor.u32 %v2283_v1, %v2279_v16  ;;  %v2352_v1 = vrot.slane %v5407_v60, 1 }
 0x277   : > { %v1742_v27 = vor.u32 %v1740_v21, %v1739_v18  ;;  %v1744_v53 = vrot.slane %v1739_v18, 4  ;;  %v1397_v45 = vmax.f32 %v1363_v34, 0.0  ;;  %v2286_v7 = vshll.u32 %v5471_v2, 16  ;;  %v1921_v21 = vld [vmem:[#allocation2 + $0xc0] sm:$0xf] }
 0x278   : > { %v2197_v18 = vshll.u32 %v5481_v8, 16 }
 0x279   : > { %v1743_v54 = vsel %vm5079_vm1, %v1735_v42, %v1742_v27  ;;  %v1919_v47 = vsel %vm5087_vm0, %v1744_v53, %v1918_v59  ;;  %v1485_v39 = vpack.c.bf16 %v1397_v45, %v1397_v45  ;;  %v2288_v62 = vrot.slane %v2286_v7, 1 }
 0x27a   : > { %1917 = vst.msk [vmem:[#allocation2 + $0xb8] sm:$0xf] %vm1399_vm12, %v1743_v54  ;;  %v2353_v42 = vrot.slane %v5432_v4, 1  ;;  %v2356_v59 = vrot.slane %v2101_v49, 1  ;;  %v2199_v27 = vrot.slane %v2197_v18, 1  ;;  %v2202_v45 = vshll.u32 %v2101_v49, 16 }
 0x27b   : > { %1920 = vst [vmem:[#allocation2 + $0xbc] sm:$0x1] %v1919_v47  ;;  %v1746_v22 = vshrl.u32 %v1485_v39, 16  ;;  %v5488_v50 = vsel %vm6322_vm2, %v2284_v26, %v2288_v62  ;;  %v1749_v19 = vshll.u32 %v1485_v39, 16  ;;  %v2195_v4 = vshrl.u32 %v5481_v8, 16 }
 0x27c   : > { %2435 = vrot.lane.b32.xlu2 %v5289_v32, %s4132_s27  ;;  %2388 = vrot.lane.b32.xlu0 %v5485_v9, %s4131_s26  ;;  %v1364_v38 = vpop.f32.mrf.mxu2  ;;  %v5506_v26 = vsel %vm6323_vm13, %v2352_v1, %v2353_v42  ;;  %v1925_v49 = vld [vmem:[#allocation2 + $0xc8] sm:$0x1] }
 0x27d   : > { %v1748_v14 = vrot.slane %v1746_v22, 7  ;;  %2330 = vrot.lane.b32.xlu1 %v5488_v50, %s4130_s25  ;;  %v1365_v43 = vadd.f32 %v5350_v46, %v1364_v38  ;;  %v2355_v46 = vrot.slane %v5481_v8, 1  ;;  %v2200_v22 = vor.u32 %v2199_v27, %v2195_v4 }
 0x27f   : > { %v1751_v34 = vor.u32 %v1749_v19, %v1748_v14  ;;  %v1398_v29 = vmax.f32 %v1365_v43, 0.0  ;;  %v2204_v19 = vrot.slane %v2202_v45, 1  ;;  %v2364_v45 = vrot.slane %v5318_v3, 1 }
 0x281   : > { %v1922_v20 = vsel %vm5051_vm15, %v1751_v34, %v1921_v21  ;;  %v1486_v16 = vpack.c.bf16 %v1398_v29, %v1398_v29  ;;  %v5502_v53 = vld [vmem:[#allocation2 + $0xb4] sm:$0xff]  ;;  %vm6324_vm15 = vmmov %vm6323_vm13  ;;  %v2086_v21 = vunpack.c.l.b16 %v1954_v41  ;;  %v1752_v34 = vrot.slane %v1748_v14, 4 }
 0x282   : > { %1923 = vst [vmem:[#allocation2 + $0xc0] sm:$0xf] %v1922_v20  ;;  %v1975_v7 = vld [vmem:[#allocation2 + $0xbc] sm:$0x1]  ;;  %v5512_v54 = vsel %vm6324_vm15, %v2355_v46, %v2356_v59  ;;  %v2293_v47 = vshll.u32 %v5502_v53, 16  ;;  %v2291_v43 = vshrl.u32 %v5502_v53, 16  ;;  %v5529_v14 = vsel %vm6325_vm14, %v2200_v22, %v2204_v19 }
 0x283   : > { %v1754_v51 = vshrl.u32 %v1486_v16, 16  ;;  %v2093_v10 = vunpack.c.l.b16 %v1975_v7  ;;  %v1757_v62 = vshll.u32 %v1486_v16, 16  ;;  %v2365_v20 = vrot.slane %v5323_v12, 1 }
 0x284   : > { %2394 = vrot.lane.b32.xlu0 %v5506_v26, %s4131_s26  ;;  %v2295_v18 = vrot.slane %v2293_v47, 1  ;;  %v2102_v12 = vpack.c.b16 %v2086_v21, %v2086_v21  ;;  %v2361_v41 = vrot.slane %v5289_v32, 1  ;;  %v2358_v47 = vrot.slane %v5539_v13, 1  ;;  %v4095_v21 = vld [vmem:[#allocation2 + $0xc] sm:$0xff] }
 0x285   : > { %v1756_v39 = vrot.slane %v1754_v51, 7  ;;  %2396 = vrot.lane.b32.xlu1 %v5512_v54, %s4131_s26  ;;  %v5517_v38 = vpack.c.b16 %v2093_v10, %v2093_v10  ;;  %v2362_v51 = vrot.slane %v5295_v36, 1  ;;  %v2209_v10 = vshll.u32 %v5539_v13, 16 }
 0x286   : > { %v2296_v16 = vor.u32 %v2295_v18, %v2291_v43  ;;  %v2359_v4 = vrot.slane %v2102_v12, 1  ;;  %v2214_v22 = vshll.u32 %v2102_v12, 16  ;;  %v2207_v32 = vshrl.u32 %v5539_v13, 16  ;;  %v5559_v43 = vpop.permute.xlu2 %2302 }
 0x287   : > { %v1759_v29 = vor.u32 %v1757_v62, %v1756_v39  ;;  %v1761_v42 = vrot.slane %v1756_v39, 4  ;;  %v2298_v59 = vshll.u32 %v5517_v38, 16  ;;  %v2211_v36 = vrot.slane %v2209_v10, 1 }
 0x288   : > { %v2216_v19 = vrot.slane %v2214_v22, 1  ;;  %v2371_v22 = vrot.slane %v5383_v30, 1  ;;  %v5666_v30 = vld [vmem:[#allocation2 + $0x30] sm:$0xff] }
 0x289   : > { %v1760_v1 = vsel %vm5079_vm1, %v1752_v34, %v1759_v29  ;;  %v1926_v27 = vsel %vm5087_vm0, %v1761_v42, %v1925_v49  ;;  %v2300_v46 = vrot.slane %v2298_v59, 1  ;;  %vm6326_vm1 = vmmov %vm6323_vm13  ;;  %v2212_v49 = vor.u32 %v2211_v36, %v2207_v32  ;;  %v5578_v29 = vld [vmem:[#allocation2 + $0x18] sm:$0xff] }
 0x28a   : > { %1924 = vst.msk [vmem:[#allocation2 + $0xc4] sm:$0xf] %vm1399_vm12, %v1760_v1  ;;  %v2366_v63 = vsel %vm6326_vm1, %v2364_v45, %v2365_v20  ;;  %vm6327_vm0 = vmmov %vm6326_vm1  ;;  %v2367_v1 = vrot.slane %v5343_v33, 1 }
 0x28b   : > { %1927 = vst [vmem:[#allocation2 + $0xc8] sm:$0x1] %v1926_v27  ;;  %v5532_v7 = vsel %vm6322_vm2, %v2296_v16, %v2300_v46  ;;  %v5547_v39 = vsel %vm6327_vm0, %v2361_v41, %v2362_v51  ;;  %vm6328_vm12 = vmmov %vm6327_vm0  ;;  %v2368_v16 = vrot.slane %v5353_v58, 1 }
 0x28c   : > { %2316 = vrot.lane.b32.xlu0 %v5529_v14, %s4130_s25  ;;  %2332 = vrot.lane.b32.xlu2 %v5532_v7, %s4130_s25  ;;  %v5550_v62 = vsel %vm6328_vm12, %v2358_v47, %v2359_v4  ;;  %vm6329_vm13 = vmmov %vm6322_vm2  ;;  %vm6332_vm2 = vcmask 1041408  }
 0x28d   : > { %2402 = vrot.lane.b32.xlu1 %v2366_v63, %s4131_s26  ;;  %v5564_v18 = vsel %vm6329_vm13, %v2212_v49, %v2216_v19  ;;  %vm6330_vm15 = vmmov %vm6327_vm0 }
 0x28e   : > { %v5574_v34 = vpop.permute.xlu2 %2308  ;;  %v2369_v27 = vsel %vm6330_vm15, %v2367_v1, %v2368_v16  ;;  %vm6331_vm14 = vmmov %vm6327_vm0  ;;  %vm6336_vm15 = vsmask.f32 7424 }
 0x28f   : > { %vm6333_vm1 = vmmov %vm6327_vm0 }
 0x290   : > { %vm6334_vm12 = vmmov %vm6327_vm0 }
 0x291   : > { %vm6335_vm13 = vmmov %vm6327_vm0 }
 0x294   : > { %2400 = vrot.lane.b32.xlu0 %v5547_v39, %s4131_s26  ;;  %2398 = vrot.lane.b32.xlu2 %v5550_v62, %s4131_s26 }
 0x295   : > { %2517 = vrot.lane.b32.xlu1 %v5547_v39, %s4136_s6 }
 0x296   : > { %v5584_v42 = vpop.permute.xlu2 %2320 }
 0x29c   : > { %2482 = vrot.lane.b32.xlu0 %v5306_v37, %s4133_s28  ;;  %2554 = vrot.lane.b32.xlu2 %v5318_v3, %s4135_s30 }
 0x29d   : > { %2318 = vrot.lane.b32.xlu1 %v5564_v18, %s4130_s25 }
 0x2a4   : > { %2601 = vrot.lane.b32.xlu0 %v5334_v0, %s4134_s29  ;;  %2419 = vrot.lane.b32.xlu2 %v4095_v21, %s4132_s27 }
 0x2a5   : > { %2636 = vrot.lane.b32.xlu1 %v2366_v63, %s4137_s7 }
 0x2ac   : > { %2466 = vrot.lane.b32.xlu0 %v5152_v24, %s4133_s28  ;;  %2538 = vrot.lane.b32.xlu2 %v5578_v29, %s4135_s30  ;;  %v5592_v24 = vpop.permute.xlu1 %2306 }
 0x2ad   : > { %2501 = vrot.lane.b32.xlu1 %v5395_v44, %s4136_s6 }
 0x2b4   : > { %2585 = vrot.lane.b32.xlu0 %v5185_v31, %s4134_s29  ;;  %2437 = vrot.lane.b32.xlu2 %v5318_v3, %s4132_s27 }
 0x2b5   : > { %2620 = vrot.lane.b32.xlu1 %v5419_v6, %s4137_s7 }
 0x2b6   : > { %v5594_v59 = vpop.permute.xlu2 %2326 }
 0x2bc   : > { %2484 = vrot.lane.b32.xlu0 %v5334_v0, %s4133_s28  ;;  %2556 = vrot.lane.b32.xlu2 %v5343_v33, %s4135_s30  ;;  %v2305_v0 = vpop.permute.xlu0 %2304 }
 0x2bd   : > { %2519 = vrot.lane.b32.xlu1 %v2366_v63, %s4136_s6  ;;  %v5620_v63 = vld [vmem:[#allocation2 + $0x24] sm:$0xff]  ;;  %v2655_v51 = vsel %vm953_vm3, %v4095_v21, %v2305_v0  ;;  %v2912_v21 = vld [vmem:[%s6253_s3 + $0x10] sm:$0x3] }
 0x2be   : > { %v5601_v44 = vpop.permute.xlu1 %2324  ;;  %v5603_v20 = vpop.permute.xlu2 %2386  ;;  %v2926_v0 = vunpack.c.l.b16 %v2912_v21 }
 0x2c4   : > { %2603 = vrot.lane.b32.xlu0 %v5365_v25, %s4134_s29  ;;  %2421 = vrot.lane.b32.xlu2 %v5578_v29, %s4132_s27  ;;  %v5627_v4 = vpop.permute.xlu0 %2310 }
 0x2c5   : > { %2638 = vrot.lane.b32.xlu1 %v2369_v27, %s4137_s7 }
 0x2c6   : > { %v2313_v46 = vpop.permute.xlu1 %2312  ;;  %v2393_v45 = vpop.permute.xlu2 %2392 }
 0x2c7   : > { %v2663_v12 = vsel %vm953_vm3, %v5339_v5, %v2313_v46 }
 0x2c8   : > { %v5616_v58 = vsel %vm986_vm5, %v2663_v12, %v2393_v45  ;;  %v2929_v45 = vpack.c.b16 %v2926_v0, %v2926_v0 }
 0x2cc   : > { %2468 = vrot.lane.b32.xlu0 %v5185_v31, %s4133_s28  ;;  %2540 = vrot.lane.b32.xlu2 %v5620_v63, %s4135_s30  ;;  %v2323_v31 = vpop.permute.xlu0 %2322 }
 0x2cd   : > { %2503 = vrot.lane.b32.xlu1 %v5419_v6, %s4136_s6  ;;  %v2673_v0 = vsel %vm953_vm3, %v5318_v3, %v2323_v31 }
 0x2ce   : > { %v2385_v10 = vpop.permute.xlu1 %2384  ;;  %v2315_v47 = vpop.permute.xlu2 %2314 }
 0x2cf   : > { %v5630_v41 = vsel %vm986_vm5, %v2655_v51, %v2385_v10  ;;  %v2665_v12 = vsel %vm953_vm3, %v5407_v60, %v2315_v47 }
 0x2d4   : > { %2587 = vrot.lane.b32.xlu0 %v5220_v61, %s4134_s29  ;;  %2439 = vrot.lane.b32.xlu2 %v5343_v33, %s4132_s27  ;;  %v2370_v33 = vrot.slane %v5374_v57, 1 }
 0x2d5   : > { %2622 = vrot.lane.b32.xlu1 %v5485_v9, %s4137_s7 }
 0x2d6   : > { %v5643_v6 = vpop.permute.xlu2 %2435  ;;  %v5652_v32 = vsel %vm6331_vm14, %v2370_v33, %v2371_v22  ;;  %v5662_v19 = vpop.permute.xlu1 %2390  ;;  %vm6337_vm14 = vmmov %vm6336_vm15 }
 0x2dc   : > { %2486 = vrot.lane.b32.xlu0 %v5365_v25, %s4133_s28  ;;  %2558 = vrot.lane.b32.xlu2 %v5374_v57, %s4135_s30 }
 0x2dd   : > { %2521 = vrot.lane.b32.xlu1 %v2369_v27, %s4136_s6 }
 0x2de   : > { %v5645_v36 = vpop.permute.xlu0 %2328 }
 0x2e4   : > { %2605 = vrot.lane.b32.xlu0 %v5398_v11, %s4134_s29  ;;  %2423 = vrot.lane.b32.xlu2 %v5620_v63, %s4132_s27 }
 0x2e5   : > { %2640 = vrot.lane.b32.xlu1 %v5652_v32, %s4137_s7 }
 0x2e6   : > { %v5658_v25 = vpop.permute.xlu2 %2332  ;;  %v5660_v49 = vpop.permute.xlu0 %2382 }
 0x2ec   : > { %2470 = vrot.lane.b32.xlu0 %v5220_v61, %s4133_s28  ;;  %2542 = vrot.lane.b32.xlu2 %v5666_v30, %s4135_s30  ;;  %v2965_v61 = vsel %vm6332_vm2, %v2929_v45, 0  ;;  %vm6338_vm2 = vmmov %vm6327_vm0 }
 0x2ed   : > { %2505 = vrot.lane.b32.xlu1 %v5485_v9, %s4136_s6  ;;  %4063 = vmatpush.bf16.msra.mxu3 %v2965_v61  ;;  %v3964_v9 = vld [vmem:[%s6253_s3 + $0x8] sm:$0xff] }
 0x2ee   : > { %v2399_v16 = vpop.permute.xlu2 %2398  ;;  %v5675_v1 = vpop.permute.xlu0 %2388  ;;  %2972 = vmatpush.bf16.msra.mxu1 %v2965_v61 }
 0x2ef   : > { %v5677_v46 = vpop.permute.xlu1 %2330 }
 0x2f1   : > { %4064 = vmatpush.bf16.msra.mxu3 %v3964_v9 }
 0x2f2   : > { %2973 = vmatpush.bf16.msra.mxu1 %v3964_v9  ;;  %v2374_v9 = vrot.slane %v5429_v23, 1 }
 0x2f4   : > { %2589 = vrot.lane.b32.xlu0 %v5254_v56, %s4134_s29  ;;  %2404 = vrot.lane.b32.xlu2 %v2369_v27, %s4131_s26  ;;  %v3963_v27 = vld [vmem:[%s6253_s3] sm:$0xff] }
 0x2f5   : > { %2624 = vrot.lane.b32.xlu1 %v5416_v35, %s4137_s7  ;;  %4065 = vmatpush.bf16.msra.mxu3 %v3963_v27 }
 0x2f6   : > { %v2555_v51 = vpop.permute.xlu2 %2554  ;;  %v2395_v10 = vpop.permute.xlu0 %2394  ;;  %2974 = vmatpush.bf16.msra.mxu1 %v3963_v27 }
 0x2f7   : > { %v2397_v22 = vpop.permute.xlu1 %2396  ;;  %v5691_v33 = vsel %vm986_vm5, %v2665_v12, %v2395_v10  ;;  %v2373_v10 = vrot.slane %v5413_v15, 1 }
 0x2fc   : > { %2441 = vrot.lane.b32.xlu0 %v5374_v57, %s4132_s27  ;;  %2523 = vrot.lane.b32.xlu2 %v5652_v32, %s4136_s6 }
 0x2fd   : > { %2488 = vrot.lane.b32.xlu1 %v5398_v11, %s4133_s28  ;;  %v5715_v11 = vsel %vm6333_vm1, %v2373_v10, %v2374_v9  ;;  %vm3056_vm1 = vsmask.f32 3328 }
 0x2fe   : > { %v2420_v47 = vpop.permute.xlu2 %2419  ;;  %v2317_v21 = vpop.permute.xlu0 %2316 }
 0x2ff   : > { %v2403_v45 = vpop.permute.xlu1 %2402  ;;  %v2667_v61 = vsel %vm953_vm3, %v5481_v8, %v2317_v21 }
 0x300   : > { %v5708_v12 = vsel %vm986_vm5, %v2673_v0, %v2403_v45  ;;  %v5711_v57 = vsel %vm986_vm5, %v2667_v61, %v2397_v22 }
 0x304   : > { %2560 = vrot.lane.b32.xlu0 %v5413_v15, %s4135_s30  ;;  %2642 = vrot.lane.b32.xlu2 %v5715_v11, %s4137_s7 }
 0x305   : > { %2607 = vrot.lane.b32.xlu1 %v5445_v48, %s4134_s29 }
 0x306   : > { %v2539_v3 = vpop.permute.xlu2 %2538  ;;  %v2401_v23 = vpop.permute.xlu0 %2400 }
 0x307   : > { %v2518_v31 = vpop.permute.xlu1 %2517 }
 0x30c   : > { %2425 = vrot.lane.b32.xlu0 %v5666_v30, %s4132_s27  ;;  %2507 = vrot.lane.b32.xlu2 %v5416_v35, %s4136_s6 }
 0x30d   : > { %2472 = vrot.lane.b32.xlu1 %v5254_v56, %s4133_s28 }
 0x30e   : > { %v2438_v22 = vpop.permute.xlu2 %2437  ;;  %v2483_v27 = vpop.permute.xlu0 %2482 }
 0x30f   : > { %v2319_v21 = vpop.permute.xlu1 %2318 }
 0x310   : > { %v2669_v0 = vsel %vm953_vm3, %v5539_v13, %v2319_v21 }
 0x311   : > { %v2701_v45 = vsel %vm986_vm5, %v2669_v0, %v2399_v16 }
 0x312   : > { %v2733_v61 = vsel %vm1019_vm4, %v2701_v45, %v5643_v6 }
 0x313   : > { %v2765_v9 = vsel %vm1052_vm6, %v2733_v61, %v2483_v27 }
 0x314   : > { %v2797_v10 = vsel %vm1085_vm7, %v2765_v9, %v2518_v31  ;;  %2544 = vrot.lane.b32.xlu0 %v5339_v5, %s4135_s30  ;;  %2626 = vrot.lane.b32.xlu2 %v5442_v52, %s4137_s7  ;;  %v2653_v31 = vsel %vm953_vm3, %v5453_v55, %v5559_v43 }
 0x315   : > { %2591 = vrot.lane.b32.xlu1 %v5377_v28, %s4134_s29  ;;  %v2829_v35 = vsel %vm1118_vm8, %v2797_v10, %v2555_v51  ;;  %v2685_v51 = vsel %vm986_vm5, %v2653_v31, %v5660_v49 }
 0x316   : > { %v2557_v56 = vpop.permute.xlu2 %2556  ;;  %v2602_v16 = vpop.permute.xlu0 %2601  ;;  %v2717_v61 = vsel %vm1019_vm4, %v2685_v51, %v2420_v47  ;;  %v2377_v47 = vrot.slane %v5471_v2, 1 }
 0x317   : > { %v2637_v21 = vpop.permute.xlu1 %2636  ;;  %v2861_v6 = vsel %vm1151_vm9, %v2829_v35, %v2602_v16  ;;  %v2376_v16 = vrot.slane %v5461_v40, 1 }
 0x318   : > { %v2893_v27 = vsel %vm1184_vm10, %v2861_v6, %v2637_v21 }
 0x319   : > { %3915 = vmatmul.msk.bf16.vlgmr.msra.gmra.mxu3 %vm1241_vm11, %v2893_v27  ;;  %v5773_v21 = vsel %vm6327_vm0, %v2376_v16, %v2377_v47  ;;  %vm3057_vm0 = vsmask.f32 7440 }
 0x31c   : > { %2406 = vrot.lane.b32.xlu0 %v5652_v32, %s4131_s26  ;;  %2490 = vrot.lane.b32.xlu2 %v5445_v48, %s4133_s28 }
 0x31d   : > { %2443 = vrot.lane.b32.xlu1 %v5413_v15, %s4132_s27 }
 0x31e   : > { %v2422_v0 = vpop.permute.xlu2 %2421  ;;  %v2467_v45 = vpop.permute.xlu0 %2466 }
 0x31f   : > { %v2502_v9 = vpop.permute.xlu1 %2501  ;;  %v2749_v32 = vsel %vm1052_vm6, %v2717_v61, %v2467_v45 }
 0x320   : > { %v2781_v10 = vsel %vm1085_vm7, %v2749_v32, %v2502_v9 }
 0x321   : > { %v2813_v48 = vsel %vm1118_vm8, %v2781_v10, %v2539_v3  ;;  %v5779_v3 = vld [vmem:[#allocation2 + $0x6c] sm:$0xff] }
 0x322   : > { %v2671_v2 = vsel %vm953_vm3, %v5779_v3, %v5584_v42 }
 0x323   : > { %v2703_v6 = vsel %vm986_vm5, %v2671_v2, %v2401_v23 }
 0x324   : > { %2525 = vrot.lane.b32.xlu0 %v5715_v11, %s4136_s6  ;;  %2609 = vrot.lane.b32.xlu2 %v5488_v50, %s4134_s29  ;;  %v2735_v51 = vsel %vm1019_vm4, %v2703_v6, %v2438_v22 }
 0x325   : > { %2562 = vrot.lane.b32.xlu1 %v5461_v40, %s4135_s30 }
 0x326   : > { %v2541_v15 = vpop.permute.xlu2 %2540  ;;  %v2586_v55 = vpop.permute.xlu0 %2585 }
 0x327   : > { %v2621_v43 = vpop.permute.xlu1 %2620  ;;  %v2845_v49 = vsel %vm1151_vm9, %v2813_v48, %v2586_v55 }
 0x328   : > { %v2877_v35 = vsel %vm1184_vm10, %v2845_v49, %v2621_v43 }
 0x329   : > { %3907 = vmatmul.msk.bf16.vlgmr.msra.gmra.mxu1 %vm1241_vm11, %v2877_v35  ;;  %v2380_v35 = vrot.slane %v5517_v38, 1 }
 0x32c   : > { %2644 = vrot.lane.b32.xlu0 %v5773_v21, %s4137_s7  ;;  %2474 = vrot.lane.b32.xlu2 %v5377_v28, %s4133_s28 }
 0x32d   : > { %2427 = vrot.lane.b32.xlu1 %v5339_v5, %s4132_s27 }
 0x32e   : > { %v2440_v27 = vpop.permute.xlu2 %2439  ;;  %v2485_v31 = vpop.permute.xlu0 %2484 }
 0x32f   : > { %v2520_v45 = vpop.permute.xlu1 %2519  ;;  %v2767_v61 = vsel %vm1052_vm6, %v2735_v51, %v2485_v31  ;;  %v2737_v38 = vsel %vm1019_vm4, %v5708_v12, %v2440_v27 }
 0x330   : > { %v2799_v28 = vsel %vm1085_vm7, %v2767_v61, %v2520_v45 }
 0x331   : > { %v2831_v42 = vsel %vm1118_vm8, %v2799_v28, %v2557_v56  ;;  %v2719_v56 = vsel %vm1019_vm4, %v5630_v41, %v2422_v0 }
 0x334   : > { %2509 = vrot.lane.b32.xlu0 %v5442_v52, %s4136_s6  ;;  %2593 = vrot.lane.b32.xlu2 %v5464_v17, %s4134_s29 }
 0x335   : > { %2546 = vrot.lane.b32.xlu1 %v5407_v60, %s4135_s30 }
 0x336   : > { %v2559_v5 = vpop.permute.xlu2 %2558  ;;  %v2604_v23 = vpop.permute.xlu0 %2603 }
 0x337   : > { %v2639_v9 = vpop.permute.xlu1 %2638  ;;  %v2863_v22 = vsel %vm1151_vm9, %v2831_v42, %v2604_v23  ;;  %v1978_v42 = vld [vmem:[#allocation2 + $0xc8] sm:$0x1] }
 0x338   : > { %v2895_v32 = vsel %vm1184_vm10, %v2863_v22, %v2639_v9 }
 0x339   : > { %3916 = vmatmul.msk.bf16.gmra.mxu3 %vm1241_vm11, %v2895_v32 }
 0x33c   : > { %2628 = vrot.lane.b32.xlu0 %v5506_v26, %s4137_s7  ;;  %2445 = vrot.lane.b32.xlu2 %v5461_v40, %s4132_s27 }
 0x33d   : > { %2408 = vrot.lane.b32.xlu1 %v5715_v11, %s4131_s26 }
 0x33e   : > { %v2424_v52 = vpop.permute.xlu2 %2423  ;;  %v2469_v10 = vpop.permute.xlu0 %2468 }
 0x33f   : > { %v2504_v48 = vpop.permute.xlu1 %2503  ;;  %v2751_v55 = vsel %vm1052_vm6, %v2719_v56, %v2469_v10 }
 0x340   : > { %v2783_v43 = vsel %vm1085_vm7, %v2751_v55, %v2504_v48 }
 0x341   : > { %v2815_v11 = vsel %vm1118_vm8, %v2783_v43, %v2541_v15 }
 0x344   : > { %2492 = vrot.lane.b32.xlu0 %v5488_v50, %s4133_s28  ;;  %2564 = vrot.lane.b32.xlu2 %v5502_v53, %s4135_s30  ;;  %v2379_v50 = vrot.slane %v5502_v53, 1 }
 0x345   : > { %2527 = vrot.lane.b32.xlu1 %v5773_v21, %s4136_s6 }
 0x346   : > { %v2543_v40 = vpop.permute.xlu2 %2542  ;;  %v2588_v49 = vpop.permute.xlu0 %2587  ;;  %v5823_v16 = vsel %vm6334_vm12, %v2379_v50, %v2380_v35  ;;  %vm5950_vm12 = vmor %vm3056_vm1, %vm3057_vm0 }
 0x347   : > { %v2623_v47 = vpop.permute.xlu1 %2622  ;;  %v2847_v41 = vsel %vm1151_vm9, %v2815_v11, %v2588_v49 }
 0x348   : > { %v2879_v0 = vsel %vm1184_vm10, %v2847_v41, %v2623_v47 }
 0x349   : > { %3908 = vmatmul.msk.bf16.gmra.mxu1 %vm1241_vm11, %v2879_v0 }
 0x34c   : > { %2611 = vrot.lane.b32.xlu0 %v5532_v7, %s4134_s29  ;;  %2429 = vrot.lane.b32.xlu2 %v5407_v60, %s4132_s27 }
 0x34d   : > { %2646 = vrot.lane.b32.xlu1 %v5823_v16, %s4137_s7 }
 0x34e   : > { %v2405_v15 = vpop.permute.xlu2 %2404  ;;  %v2487_v2 = vpop.permute.xlu0 %2486 }
 0x34f   : > { %v2522_v6 = vpop.permute.xlu1 %2521  ;;  %v2769_v31 = vsel %vm1052_vm6, %v2737_v38, %v2487_v2  ;;  %v4100_v2 = vld [vmem:[#allocation2 + $0x84] sm:$0xff] }
 0x350   : > { %v2801_v51 = vsel %vm1085_vm7, %v2769_v31, %v2522_v6  ;;  %v2675_v38 = vsel %vm953_vm3, %v4100_v2, %v5601_v44 }
 0x351   : > { %v2833_v45 = vsel %vm1118_vm8, %v2801_v51, %v2559_v5  ;;  %v2657_v5 = vsel %vm953_vm3, %v5578_v29, %v5592_v24  ;;  %v2707_v51 = vsel %vm986_vm5, %v2675_v38, %v2405_v15  ;;  %v1981_v15 = vld [vmem:[#allocation2 + $0xd4] sm:$0x1] }
 0x352   : > { %v2689_v23 = vsel %vm986_vm5, %v2657_v5, %v5603_v20 }
 0x353   : > { %v2721_v32 = vsel %vm1019_vm4, %v2689_v23, %v2424_v52 }
 0x354   : > { %2476 = vrot.lane.b32.xlu0 %v5464_v17, %s4133_s28  ;;  %2548 = vrot.lane.b32.xlu2 %v5481_v8, %s4135_s30  ;;  %v5849_v17 = vld [vmem:[#allocation2 + $0xc0] sm:$0xff] }
 0x355   : > { %2511 = vrot.lane.b32.xlu1 %v5506_v26, %s4136_s6  ;;  %v2452_v26 = vunpack.c.l.b16 %v1978_v42  ;;  %v2457_v48 = vshll.u32 %v5849_v17, 16  ;;  %v2455_v11 = vshrl.u32 %v5849_v17, 16  ;;  %v2498_v50 = vrot.slane %v5849_v17, 1 }
 0x356   : > { %v2524_v60 = vpop.permute.xlu2 %2523  ;;  %v2606_v61 = vpop.permute.xlu0 %2605 }
 0x357   : > { %v2641_v28 = vpop.permute.xlu1 %2640  ;;  %v2865_v12 = vsel %vm1151_vm9, %v2833_v45, %v2606_v61  ;;  %v2453_v56 = vpack.c.b16 %v2452_v26, %v2452_v26  ;;  %v2459_v29 = vrot.slane %v2457_v48, 1 }
 0x358   : > { %v2897_v27 = vsel %vm1184_vm10, %v2865_v12, %v2641_v28 }
 0x359   : > { %3917 = vmatmul.msk.bf16.gmra.mxu3 %vm1241_vm11, %v2897_v27  ;;  %v2462_v24 = vshll.u32 %v2453_v56, 16  ;;  %v2499_v41 = vrot.slane %v2453_v56, 1  ;;  %v2460_v0 = vor.u32 %v2459_v29, %v2455_v11 }
 0x35b   : > { %v2464_v35 = vrot.slane %v2462_v24, 1 }
 0x35c   : > { %2595 = vrot.lane.b32.xlu0 %v5529_v14, %s4134_s29  ;;  %2410 = vrot.lane.b32.xlu2 %v5773_v21, %s4131_s26 }
 0x35d   : > { %2630 = vrot.lane.b32.xlu1 %v5512_v54, %s4137_s7 }
 0x35e   : > { %v2643_v9 = vpop.permute.xlu2 %2642  ;;  %v2471_v22 = vpop.permute.xlu0 %2470 }
 0x35f   : > { %v2506_v10 = vpop.permute.xlu1 %2505  ;;  %v2753_v21 = vsel %vm1052_vm6, %v2721_v32, %v2471_v22  ;;  %v2571_v22 = vunpack.c.l.b16 %v1981_v15 }
 0x360   : > { %v2785_v55 = vsel %vm1085_vm7, %v2753_v21, %v2506_v10 }
 0x361   : > { %v2817_v52 = vsel %vm1118_vm8, %v2785_v55, %v2543_v40  ;;  %v2465_v40 = vsel %vm6336_vm15, %v2460_v0, %v2464_v35 }
 0x364   : > { %2447 = vrot.lane.b32.xlu0 %v5502_v53, %s4132_s27  ;;  %2529 = vrot.lane.b32.xlu2 %v5823_v16, %s4136_s6 }
 0x365   : > { %2494 = vrot.lane.b32.xlu1 %v5532_v7, %s4133_s28  ;;  %v2500_v7 = vsel %vm6335_vm13, %v2498_v50, %v2499_v41 }
 0x366   : > { %v2508_v20 = vpop.permute.xlu2 %2507  ;;  %v2590_v43 = vpop.permute.xlu0 %2589 }
 0x367   : > { %v2625_v49 = vpop.permute.xlu1 %2624  ;;  %v2849_v47 = vsel %vm1151_vm9, %v2817_v52, %v2590_v43 }
 0x368   : > { %v2881_v53 = vsel %vm1184_vm10, %v2849_v47, %v2625_v49  ;;  %v254_v47 = vld [vmem:[%s4184_s24 + $0x6c] sm:$0xf] }
 0x369   : > { %3909 = vmatmul.msk.bf16.gmra.mxu1 %vm1241_vm11, %v2881_v53  ;;  %v3255_v0 = vshll.u32 %v254_v47, 16 }
 0x36c   : > { %2566 = vrot.lane.b32.xlu0 %v5849_v17, %s4135_s30  ;;  %2648 = vrot.lane.b32.xlu2 %v2500_v7, %s4137_s7 }
 0x36d   : > { %2613 = vrot.lane.b32.xlu1 %v2465_v40, %s4134_s29 }
 0x36e   : > { %v2627_v6 = vpop.permute.xlu2 %2626  ;;  %v2442_v31 = vpop.permute.xlu0 %2441 }
 0x36f   : > { %v2489_v45 = vpop.permute.xlu1 %2488  ;;  %v2739_v61 = vsel %vm1019_vm4, %v2707_v51, %v2442_v31  ;;  %v3257_v31 = vrot.slane %v3255_v0, 5 }
 0x370   : > { %v2771_v28 = vsel %vm1052_vm6, %v2739_v61, %v2489_v45  ;;  %v4101_v45 = vld [vmem:[#allocation2 + $0x90] sm:$0xff] }
 0x371   : > { %v2803_v44 = vsel %vm1085_vm7, %v2771_v28, %v2524_v60  ;;  %v2659_v60 = vsel %vm953_vm3, %v5620_v63, %v5574_v34  ;;  %v2677_v61 = vsel %vm953_vm3, %v4101_v45, %v5594_v59 }
 0x372   : > { %v2691_v32 = vsel %vm986_vm5, %v2659_v60, %v5675_v1  ;;  %v231_v60 = vld [vmem:[%s4184_s24 + $0x10] sm:$0xf] }
 0x374   : > { %2431 = vrot.lane.b32.xlu0 %v5481_v8, %s4132_s27  ;;  %2513 = vrot.lane.b32.xlu2 %v5512_v54, %s4136_s6  ;;  %v3962_v8 = vld [vmem:[#allocation2 + $0xcc] sm:$0xff]  ;;  %v2572_v54 = vpack.c.b16 %v2571_v22, %v2571_v22 }
 0x375   : > { %2478 = vrot.lane.b32.xlu1 %v5529_v14, %s4133_s28  ;;  %v2576_v14 = vshll.u32 %v3962_v8, 16  ;;  %v2574_v48 = vshrl.u32 %v3962_v8, 16  ;;  %v2617_v35 = vrot.slane %v3962_v8, 1 }
 0x376   : > { %v5891_v12 = vpop.permute.xlu2 %2490  ;;  %v2561_v27 = vpop.permute.xlu0 %2560  ;;  %v2581_v29 = vshll.u32 %v2572_v54, 16  ;;  %v2618_v50 = vrot.slane %v2572_v54, 1 }
 0x377   : > { %v2608_v42 = vpop.permute.xlu1 %2607  ;;  %v2835_v26 = vsel %vm1118_vm8, %v2803_v44, %v2561_v27  ;;  %v2578_v55 = vrot.slane %v2576_v14, 1  ;;  %v230_v27 = vld [vmem:[%s4184_s24 + $0xc] sm:$0xf] }
 0x378   : > { %v2867_v5 = vsel %vm1151_vm9, %v2835_v26, %v2608_v42  ;;  %v2583_v63 = vrot.slane %v2581_v29, 1  ;;  %v2619_v28 = vsel %vm6338_vm2, %v2617_v35, %v2618_v50  ;;  %v3060_v59 = vshrl.u32 %v230_v27, 16 }
 0x379   : > { %v2899_v23 = vsel %vm1184_vm10, %v2867_v5, %v2643_v9  ;;  %v2579_v34 = vor.u32 %v2578_v55, %v2574_v48  ;;  %v3063_v54 = vshll.u32 %v230_v27, 16 }
 0x37a   : > { %3918 = vmatmul.msk.bf16.gmra.mxu3 %vm1241_vm11, %v2899_v23 }
 0x37c   : > { %2550 = vrot.lane.b32.xlu0 %v5539_v13, %s4135_s30  ;;  %2632 = vrot.lane.b32.xlu2 %v5550_v62, %s4137_s7 }
 0x37d   : > { %2597 = vrot.lane.b32.xlu1 %v5564_v18, %s4134_s29 }
 0x37e   : > { %v2426_v9 = vpop.permute.xlu0 %2425  ;;  %v5909_v21 = vpop.permute.xlu2 %2609 }
 0x37f   : > { %v2473_v10 = vpop.permute.xlu1 %2472  ;;  %v2723_v56 = vsel %vm1019_vm4, %v2691_v32, %v2426_v9 }
 0x380   : > { %v2755_v24 = vsel %vm1052_vm6, %v2723_v56, %v2473_v10  ;;  %v3073_v56 = vshrl.u32 %v231_v60, 16 }
 0x381   : > { %v2787_v1 = vsel %vm1085_vm7, %v2755_v24, %v2508_v20  ;;  %v255_v20 = vld [vmem:[%s4184_s24 + $0x70] sm:$0xf]  ;;  %v3065_v24 = vrot.slane %v3063_v54, 5 }
 0x382   : > { %v3261_v51 = vshll.u32 %v255_v20, 16 }
 0x384   : > { %2412 = vrot.lane.b32.xlu0 %v5823_v16, %s4131_s26  ;;  %2496 = vrot.lane.b32.xlu2 %v2465_v40, %s4133_s28  ;;  %v2584_v16 = vsel %vm6337_vm14, %v2579_v34, %v2583_v63  ;;  %v3265_v40 = vshrl.u32 %v255_v20, 16  ;;  %v3263_v42 = vrot.slane %v3261_v51, 5  ;;  %v3069_v34 = vshll.u32 %v231_v60, 16  ;;  %s3729_s26 = sshll.u32 %s4175_s19, 5  ;;  %v4103_v20 = vld [vmem:[%s4184_s24 + $0x14] sm:$0x1] }
 0x385   : > { %2449 = vrot.lane.b32.xlu1 %v5849_v17, %s4132_s27  ;;  %v3252_v17 = vshrl.u32 %v254_v47, 16  ;;  %p221_p4 = scmp.lt.s32.totalorder %s3729_s26, 63  ;;  %v3079_v35 = vshll.u32 %v4103_v20, 16 }
 0x386   : > { %v2545_v52 = vpop.permute.xlu0 %2544  ;;  %v5924_v53 = vpop.permute.xlu2 %2474  ;;  %v3267_v44 = vrot.slane %v3265_v40, 4  ;;  %v3071_v47 = vrot.slane %v3069_v34, 5 }
 0x387   : > { %v2592_v43 = vpop.permute.xlu1 %2591  ;;  %v2819_v11 = vsel %vm1118_vm8, %v2787_v1, %v2545_v52  ;;  %v3075_v1 = vrot.slane %v3073_v56, 4  ;;  %s6342_s26 = smov (!%p221_p4, %s3729_s26), 63 }
 0x388   : > { %v2851_v49 = vsel %vm1151_vm9, %v2819_v11, %v2592_v43  ;;  %v3268_v23 = vor.u32 %v3267_v44, %v3263_v42  ;;  %v5967_v43 = vld [vmem:[%s6254_s4] ss:$0 sm:$0xff]  ;;  %s3730_s19 = sshll.u32 %s6342_s26, 2 }
 0x389   : > { %v2883_v41 = vsel %vm1184_vm10, %v2851_v49, %v2627_v6  ;;  %v3254_v6 = vrot.slane %v3252_v17, 4  ;;  %v3076_v0 = vor.u32 %v3075_v1, %v3071_v47 }
 0x38a   : > { %3910 = vmatmul.msk.bf16.gmra.mxu1 %vm1241_vm11, %v2883_v41  ;;  %v3269_v55 = vrot.slane %v3268_v23, 4 }
 0x38b   : > { %v3258_v15 = vor.u32 %v3257_v31, %v3254_v6  ;;  %v2661_v6 = vsel %vm953_vm3, %v5666_v30, %v5627_v4  ;;  %v3081_v31 = vrot.slane %v3079_v35, 5 }
 0x38c   : > { %2531 = vrot.lane.b32.xlu0 %v2500_v7, %s4136_s6  ;;  %2615 = vrot.lane.b32.xlu2 %v2584_v16, %s4134_s29  ;;  %v2693_v51 = vsel %vm986_vm5, %v2661_v6, %v5662_v19 }
 0x38d   : > { %2568 = vrot.lane.b32.xlu1 %v3962_v8, %s4135_s30  ;;  %v4102_v8 = vld [vmem:[%s4184_s24 + $0x74] sm:$0x1]  ;;  %v3259_v10 = vrot.slane %v3258_v15, 4 }
 0x38e   : > { %v2407_v2 = vpop.permute.xlu0 %2406  ;;  %v5936_v26 = vpop.permute.xlu2 %2593  ;;  %v3271_v22 = vshll.u32 %v4102_v8, 16 }
 0x38f   : > { %v2444_v38 = vpop.permute.xlu1 %2443  ;;  %v2709_v7 = vsel %vm986_vm5, %v2677_v61, %v2407_v2 }
 0x390   : > { %v2741_v5 = vsel %vm1019_vm4, %v2709_v7, %v2444_v38  ;;  %v3273_v29 = vrot.slane %v3271_v22, 5 }
 0x391   : > { %v2773_v32 = vsel %vm1052_vm6, %v2741_v5, %v5891_v12  ;;  %v3264_v12 = vsel %vm5950_vm12, %v3259_v10, %v3263_v42 }
 0x392   : > { %v3274_v11 = vsel %vm5950_vm12, %v3269_v55, %v3273_v29  ;;  %v3491_v41 = vunpack.c.l.bf16 %v3264_v12 }
 0x393   : > { %v3492_v50 = vunpack.c.l.bf16 %v3274_v11 }
 0x394   : > { %2650 = vrot.lane.b32.xlu0 %v2619_v28, %s4137_s7  ;;  %2480 = vrot.lane.b32.xlu2 %v5564_v18, %s4133_s28  ;;  %v3523_v38 = vsel %vm953_vm3, %v3491_v41, 0.0 }
 0x395   : > { %2433 = vrot.lane.b32.xlu1 %v5539_v13, %s4132_s27  ;;  %v3062_v13 = vrot.slane %v3060_v59, 4  ;;  %v3524_v61 = vsel %vm953_vm3, %v3492_v50, 0.0  ;;  %v4104_v50 = vld [vmem:[#allocation2 + $0x9c] sm:$0xff] }
 0x396   : > { %v2526_v14 = vpop.permute.xlu0 %2525 }
 0x397   : > { %v2563_v9 = vpop.permute.xlu1 %2562  ;;  %v2805_v18 = vsel %vm1085_vm7, %v2773_v32, %v2526_v14  ;;  %v3066_v49 = vor.u32 %v3065_v24, %v3062_v13 }
 0x398   : > { %v2837_v63 = vsel %vm1118_vm8, %v2805_v18, %v2563_v9  ;;  %v258_v18 = vld [vmem:[%s4184_s24 + $0x7c] sm:$0xf] }
 0x399   : > { %v2869_v16 = vsel %vm1151_vm9, %v2837_v63, %v5909_v21  ;;  %v3067_v2 = vrot.slane %v3066_v49, 4  ;;  %v3077_v21 = vrot.slane %v3076_v0, 4  ;;  %v3289_v13 = vshrl.u32 %v258_v18, 16 }
 0x39a   : > { %v3285_v49 = vshll.u32 %v258_v18, 16 }
 0x39b   : > { %v3072_v4 = vsel %vm5950_vm12, %v3067_v2, %v3071_v47  ;;  %v3082_v19 = vsel %vm5950_vm12, %v3077_v21, %v3081_v31  ;;  %v4105_v31 = vld [vmem:[%s4184_s24 + $0x80] sm:$0x1] }
 0x39c   : > { %2515 = vrot.lane.b32.xlu0 %v5550_v62, %s4136_s6  ;;  %2599 = vrot.lane.b32.xlu2 %v5306_v37, %s4134_s29  ;;  %v3016_v52 = vpop.f32.mrf.mxu3  ;;  %v5971_v62 = vpop.permute.xlu2 %2445  ;;  %v3475_v59 = vunpack.c.l.bf16 %v3072_v4  ;;  %s6003_s6 = scalar_lea.vmem %s6255_s5, %s3730_s19  ;;  %v3476_v14 = vunpack.c.l.bf16 %v3082_v19  ;;  %v3287_v35 = vrot.slane %v3285_v49, 5 }
 0x39d   : > { %2552 = vrot.lane.b32.xlu1 %v5779_v3, %s4135_s30  ;;  %v3017_v40 = vadd.f32 %v5967_v43, %v3016_v52 }
 0x39e   : > { %v2645_v37 = vpop.permute.xlu0 %2644  ;;  %v3507_v56 = vsel %vm953_vm3, %v3475_v59, 0.0  ;;  %v3508_v29 = vsel %vm953_vm3, %v3476_v14, 0.0 }
 0x39f   : > { %v2428_v17 = vpop.permute.xlu1 %2427  ;;  %v2901_v3 = vsel %vm1184_vm10, %v2869_v16, %v2645_v37  ;;  %v3555_v7 = vadd.f32 %v3523_v38, %v3017_v40  ;;  %v3291_v37 = vrot.slane %v3289_v13, 4  ;;  %v233_v16 = vld [vmem:[%s4184_s24 + $0x18] sm:$0xf] }
 0x3a0   : > { %3919 = vmatmul.msk.bf16.gmra.mxu3 %vm1241_vm11, %v2901_v3  ;;  %v2725_v28 = vsel %vm1019_vm4, %v2693_v51, %v2428_v17  ;;  %v3084_v40 = vshrl.u32 %v233_v16, 16  ;;  %v3087_v2 = vshll.u32 %v233_v16, 16  ;;  %v3295_v51 = vshll.u32 %v4105_v31, 16 }
 0x3a1   : > { %v2757_v23 = vsel %vm1052_vm6, %v2725_v28, %v5924_v53  ;;  %v3587_v8 = vmax.f32 %v3555_v7, 0.0  ;;  %v3292_v21 = vor.u32 %v3291_v37, %v3287_v35 }
 0x3a4   : > { %2634 = vrot.lane.b32.xlu0 %v5547_v39, %s4137_s7  ;;  %v3018_v45 = vpop.f32.mrf.mxu3  ;;  %v257_v39 = vld [vmem:[%s4184_s24 + $0x78] sm:$0xf]  ;;  %v5995_v5 = vpop.permute.xlu2 %2564 }
 0x3a5   : > { %v3019_v44 = vadd.f32 %v5967_v43, %v3018_v45  ;;  %v3276_v60 = vshrl.u32 %v257_v39, 16  ;;  %v3279_v9 = vshll.u32 %v257_v39, 16  ;;  %v234_v45 = vld [vmem:[%s4184_s24 + $0x1c] sm:$0xf] }
 0x3a6   : > { %v2976_v30 = vpop.f32.mrf.mxu1  ;;  %v2510_v42 = vpop.permute.xlu0 %2509  ;;  %v3093_v19 = vshll.u32 %v234_v45, 16 }
 0x3a7   : > { %v3556_v27 = vadd.f32 %v3524_v61, %v3019_v44  ;;  %v2547_v15 = vpop.permute.xlu1 %2546  ;;  %v2789_v54 = vsel %vm1085_vm7, %v2757_v23, %v2510_v42  ;;  %v2977_v10 = vadd.f32 %v5967_v43, %v2976_v30  ;;  %v3278_v24 = vrot.slane %v3276_v60, 4 }
 0x3a8   : > { %v2821_v53 = vsel %vm1118_vm8, %v2789_v54, %v2547_v15  ;;  %v3281_v34 = vrot.slane %v3279_v9, 5  ;;  %v3097_v44 = vshrl.u32 %v234_v45, 16  ;;  %v3086_v30 = vrot.slane %v3084_v40, 4 }
 0x3a9   : > { %v3588_v22 = vmax.f32 %v3556_v27, 0.0  ;;  %v3539_v63 = vadd.f32 %v3507_v56, %v2977_v10  ;;  %v2853_v11 = vsel %vm1151_vm9, %v2821_v53, %v5936_v26  ;;  %v2679_v26 = vsel %vm953_vm3, %v4104_v50, %v5645_v36  ;;  %v4106_v53 = vld [vmem:[%s4184_s24 + $0x20] sm:$0x1] }
 0x3aa   : > { %v3282_v20 = vor.u32 %v3281_v34, %v3278_v24  ;;  %v3089_v27 = vrot.slane %v3087_v2, 5  ;;  %v3293_v15 = vrot.slane %v3292_v21, 4  ;;  %v3297_v42 = vrot.slane %v3295_v51, 5 }
 0x3ab   : > { %v4008_v32 = vpack.c.bf16 %v3588_v22, %v3587_v8  ;;  %v3571_v3 = vmax.f32 %v3539_v63, 0.0  ;;  %v3099_v59 = vrot.slane %v3097_v44, 4  ;;  %v3095_v14 = vrot.slane %v3093_v19, 5 }
 0x3ac   : > { %v6017_v17 = vpop.permute.xlu2 %2429  ;;  %v3283_v28 = vrot.slane %v3282_v20, 4  ;;  %v3298_v54 = vsel %vm5950_vm12, %v3293_v15, %v3297_v42  ;;  %v3103_v18 = vshll.u32 %v4106_v53, 16 }
 0x3ad   : > { %4052 = vst [vmem:[%s6003_s6 + $0x40] sm:$0xff] %v4008_v32   ;;  %v3100_v56 = vor.u32 %v3099_v59, %v3095_v14  ;;  %v2727_v50 = vsel %vm1019_vm4, %v5616_v58, %v6017_v17 }
 0x3ae   : > { %v2978_v55 = vpop.f32.mrf.mxu1  ;;  %v2629_v52 = vpop.permute.xlu0 %2628  ;;  %v3288_v39 = vsel %vm5950_vm12, %v3283_v28, %v3287_v35  ;;  %v260_v35 = vld [vmem:[%s4184_s24 + $0x84] sm:$0xf]  ;;  %v261_v28 = vld [vmem:[%s4184_s24 + $0x88] sm:$0xf] }
 0x3af   : > { %v2409_v12 = vpop.permute.xlu1 %2408  ;;  %v2979_v1 = vadd.f32 %v5967_v43, %v2978_v55  ;;  %v2885_v47 = vsel %vm1184_vm10, %v2853_v11, %v2629_v52  ;;  %v3493_v60 = vunpack.c.l.bf16 %v3288_v39  ;;  %v3494_v55 = vunpack.c.l.bf16 %v3298_v54 }
 0x3b0   : > { %3911 = vmatmul.msk.bf16.gmra.mxu1 %vm1241_vm11, %v2885_v47  ;;  %v2711_v38 = vsel %vm986_vm5, %v2679_v26, %v2409_v12  ;;  %v3101_v12 = vrot.slane %v3100_v56, 4  ;;  %v3300_v21 = vshrl.u32 %v260_v35, 16  ;;  %v3303_v31 = vshll.u32 %v260_v35, 16 }
 0x3b1   : > { %v3540_v41 = vadd.f32 %v3508_v29, %v2979_v1  ;;  %v2743_v4 = vsel %vm1019_vm4, %v2711_v38, %v5971_v62  ;;  %v3090_v62 = vor.u32 %v3089_v27, %v3086_v30  ;;  %v3525_v63 = vsel %vm953_vm3, %v3493_v60, 0.0 }
 0x3b2   : > { %v3105_v1 = vrot.slane %v3103_v18, 5  ;;  %v3526_v52 = vsel %vm953_vm3, %v3494_v55, 0.0  ;;  %v3313_v44 = vshrl.u32 %v261_v28, 16  ;;  %v3305_v30 = vrot.slane %v3303_v31, 5 }
 0x3b3   : > { %v3572_v0 = vmax.f32 %v3540_v41, 0.0  ;;  %v3091_v34 = vrot.slane %v3090_v62, 4  ;;  %v3309_v39 = vshll.u32 %v261_v28, 16 }
 0x3b4   : > { %v2549_v23 = vpop.permute.xlu2 %2548  ;;  %v3106_v20 = vsel %vm5950_vm12, %v3101_v12, %v3105_v1  ;;  %v3315_v62 = vrot.slane %v3313_v44, 4 }
 0x3b5   : > { %v3968_v6 = vpack.c.bf16 %v3572_v0, %v3571_v3  ;;  %v3096_v47 = vsel %vm5950_vm12, %v3091_v34, %v3095_v14  ;;  %v236_v14 = vld [vmem:[%s4184_s24 + $0x24] sm:$0xf] }
 0x3b6   : > { %v2493_v7 = vpop.permute.xlu0 %2492  ;;  %v3477_v26 = vunpack.c.l.bf16 %v3096_v47  ;;  %v3111_v56 = vshll.u32 %v236_v14, 16 }
 0x3b7   : > { %3969 = vst [vmem:[%s6003_s6] sm:$0xff] %v3968_v6   ;;  %v2528_v61 = vpop.permute.xlu1 %2527  ;;  %v2775_v36 = vsel %vm1052_vm6, %v2743_v4, %v2493_v7  ;;  %v3478_v6 = vunpack.c.l.bf16 %v3106_v20  ;;  %v3302_v4 = vrot.slane %v3300_v21, 4 }
 0x3b8   : > { %v2807_v8 = vsel %vm1085_vm7, %v2775_v36, %v2528_v61  ;;  %v3509_v61 = vsel %vm953_vm3, %v3477_v26, 0.0 }
 0x3b9   : > { %v2839_v32 = vsel %vm1118_vm8, %v2807_v8, %v5995_v5  ;;  %v3510_v17 = vsel %vm953_vm3, %v3478_v6, 0.0 }
 0x3bc   : > { %v3021_v22 = vpop.f32.mrf.mxu3  ;;  %v2411_v41 = vpop.permute.xlu2 %2410 }
 0x3bd   : > { %v3022_v29 = vadd.f32 %v5967_v43, %v3021_v22 }
 0x3be   : > { %v2612_v10 = vpop.permute.xlu0 %2611 }
 0x3bf   : > { %v2647_v9 = vpop.permute.xlu1 %2646  ;;  %v2871_v13 = vsel %vm1151_vm9, %v2839_v32, %v2612_v10  ;;  %v3557_v11 = vadd.f32 %v3525_v63, %v3022_v29  ;;  %v3306_v32 = vor.u32 %v3305_v30, %v3302_v4  ;;  %v3311_v10 = vrot.slane %v3309_v39, 5  ;;  %v237_v29 = vld [vmem:[%s4184_s24 + $0x28] sm:$0xf] }
 0x3c0   : > { %v2903_v24 = vsel %vm1184_vm10, %v2871_v13, %v2647_v9  ;;  %v4107_v13 = vld [vmem:[%s4184_s24 + $0x8c] sm:$0x1] }
 0x3c1   : > { %3920 = vmatmul.msk.bf16.gmra.mxu3 %vm1241_vm11, %v2903_v24  ;;  %v3589_v40 = vmax.f32 %v3557_v11, 0.0  ;;  %v3316_v18 = vor.u32 %v3315_v62, %v3311_v10  ;;  %v3319_v55 = vshll.u32 %v4107_v13, 16  ;;  %v4108_v24 = vld [vmem:[#allocation2 + $0xa8] sm:$0xff]  ;;  %v3307_v1 = vrot.slane %v3306_v32, 4 }
 0x3c2   : > { %v2681_v34 = vsel %vm953_vm3, %v4108_v24, %v5677_v46 }
 0x3c3   : > { %v3312_v20 = vsel %vm5950_vm12, %v3307_v1, %v3311_v10 }
 0x3c4   : > { %v3023_v5 = vpop.f32.mrf.mxu3  ;;  %v2530_v59 = vpop.permute.xlu2 %2529 }
 0x3c5   : > { %v3024_v49 = vadd.f32 %v5967_v43, %v3023_v5  ;;  %v3121_v5 = vshrl.u32 %v237_v29, 16 }
 0x3c6   : > { %v2981_v37 = vpop.f32.mrf.mxu1  ;;  %v2477_v0 = vpop.permute.xlu0 %2476 }
 0x3c7   : > { %v3558_v16 = vadd.f32 %v3526_v52, %v3024_v49  ;;  %v2512_v3 = vpop.permute.xlu1 %2511  ;;  %v2759_v38 = vsel %vm1052_vm6, %v2727_v50, %v2477_v0  ;;  %v2982_v45 = vadd.f32 %v5967_v43, %v2981_v37  ;;  %v2713_v52 = vsel %vm986_vm5, %v2681_v34, %v2411_v41  ;;  %v264_v34 = vld [vmem:[%s4184_s24 + $0x94] sm:$0xf] }
 0x3c8   : > { %v2791_v7 = vsel %vm1085_vm7, %v2759_v38, %v2512_v3  ;;  %v3113_v49 = vrot.slane %v3111_v56, 5  ;;  %v3317_v37 = vrot.slane %v3316_v18, 4  ;;  %v3117_v3 = vshll.u32 %v237_v29, 16 }
 0x3c9   : > { %v3590_v2 = vmax.f32 %v3558_v16, 0.0  ;;  %v3541_v27 = vadd.f32 %v3509_v61, %v2982_v45  ;;  %v2823_v42 = vsel %vm1118_vm8, %v2791_v7, %v2549_v23  ;;  %v3108_v23 = vshrl.u32 %v236_v14, 16 }
 0x3ca   : > { %v3321_v16 = vrot.slane %v3319_v55, 5  ;;  %v3123_v46 = vrot.slane %v3121_v5, 4  ;;  %v3337_v5 = vshrl.u32 %v264_v34, 16 }
 0x3cb   : > { %v4013_v51 = vpack.c.bf16 %v3590_v2, %v3589_v40  ;;  %v3573_v60 = vmax.f32 %v3541_v27, 0.0  ;;  %v3110_v11 = vrot.slane %v3108_v23, 4  ;;  %v3119_v40 = vrot.slane %v3117_v3, 5  ;;  %v263_v23 = vld [vmem:[%s4184_s24 + $0x90] sm:$0xf] }
 0x3cc   : > { %v2649_v0 = vpop.permute.xlu2 %2648  ;;  %v3322_v26 = vsel %vm5950_vm12, %v3317_v37, %v3321_v16  ;;  %v3495_v2 = vunpack.c.l.bf16 %v3312_v20  ;;  %v3324_v29 = vshrl.u32 %v263_v23, 16  ;;  %v3327_v24 = vshll.u32 %v263_v23, 16 }
 0x3cd   : > { %4053 = vst [vmem:[%s6003_s6 + $0x48] sm:$0xff] %v4013_v51   ;;  %v3114_v41 = vor.u32 %v3113_v49, %v3110_v11  ;;  %v3124_v31 = vor.u32 %v3123_v46, %v3119_v40  ;;  %v4109_v51 = vld [vmem:[%s4184_s24 + $0x2c] sm:$0x1]  ;;  %v3496_v7 = vunpack.c.l.bf16 %v3322_v26 }
 0x3ce   : > { %v2983_v58 = vpop.f32.mrf.mxu1  ;;  %v2596_v19 = vpop.permute.xlu0 %2595  ;;  %v3127_v45 = vshll.u32 %v4109_v51, 16  ;;  %v3326_v16 = vrot.slane %v3324_v29, 4  ;;  %v3329_v3 = vrot.slane %v3327_v24, 5 }
 0x3cf   : > { %v2631_v36 = vpop.permute.xlu1 %2630  ;;  %v2984_v15 = vadd.f32 %v5967_v43, %v2983_v58  ;;  %v2855_v8 = vsel %vm1151_vm9, %v2823_v42, %v2596_v19  ;;  %v3115_v58 = vrot.slane %v3114_v41, 4  ;;  %v3125_v30 = vrot.slane %v3124_v31, 4  ;;  %v4110_v31 = vld [vmem:[%s4184_s24 + $0x98] sm:$0x1] }
 0x3d0   : > { %v2887_v54 = vsel %vm1184_vm10, %v2855_v8, %v2631_v36  ;;  %v3129_v27 = vrot.slane %v3127_v45, 5  ;;  %v3528_v42 = vsel %vm953_vm3, %v3496_v7, 0.0  ;;  %v3343_v51 = vshll.u32 %v4110_v31, 16 }
 0x3d1   : > { %v3542_v22 = vadd.f32 %v3510_v17, %v2984_v15  ;;  %3912 = vmatmul.msk.bf16.gmra.mxu1 %vm1241_vm11, %v2887_v54  ;;  %v3527_v17 = vsel %vm953_vm3, %v3495_v2, 0.0 }
 0x3d2   : > { %v3130_v14 = vsel %vm5950_vm12, %v3125_v30, %v3129_v27 }
 0x3d3   : > { %v3574_v9 = vmax.f32 %v3542_v22, 0.0  ;;  %v3480_v56 = vunpack.c.l.bf16 %v3130_v14 }
 0x3d4   : > { %v2514_v36 = vpop.permute.xlu2 %2513 }
 0x3d5   : > { %v3973_v53 = vpack.c.bf16 %v3574_v9, %v3573_v60  ;;  %v3512_v1 = vsel %vm953_vm3, %v3480_v56, 0.0 }
 0x3d6   : > { %v2448_v12 = vpop.permute.xlu0 %2447 }
 0x3d7   : > { %4045 = vst [vmem:[%s6003_s6 + $0x8] sm:$0xff] %v3973_v53   ;;  %v2495_v63 = vpop.permute.xlu1 %2494  ;;  %v2745_v47 = vsel %vm1019_vm4, %v2713_v52, %v2448_v12 }
 0x3d8   : > { %v2777_v35 = vsel %vm1052_vm6, %v2745_v47, %v2495_v63 }
 0x3d9   : > { %v2809_v6 = vsel %vm1085_vm7, %v2777_v35, %v2530_v59  ;;  %v3120_v59 = vsel %vm5950_vm12, %v3115_v58, %v3119_v40  ;;  %v3330_v40 = vor.u32 %v3329_v3, %v3326_v16 }
 0x3da   : > { %v3479_v60 = vunpack.c.l.bf16 %v3120_v59 }
 0x3db   : > { %v3331_v58 = vrot.slane %v3330_v40, 4 }
 0x3dc   : > { %v3026_v50 = vpop.f32.mrf.mxu3  ;;  %v3511_v13 = vsel %vm953_vm3, %v3479_v60, 0.0  ;;  %v2633_v63 = vpop.permute.xlu2 %2632 }
 0x3dd   : > { %v3027_v28 = vadd.f32 %v5967_v43, %v3026_v50  ;;  %v3339_v50 = vrot.slane %v3337_v5, 4 }
 0x3de   : > { %v2567_v21 = vpop.permute.xlu0 %2566 }
 0x3df   : > { %v2614_v38 = vpop.permute.xlu1 %2613  ;;  %v2841_v61 = vsel %vm1118_vm8, %v2809_v6, %v2567_v21  ;;  %v3559_v19 = vadd.f32 %v3527_v17, %v3027_v28  ;;  %v240_v17 = vld [vmem:[%s4184_s24 + $0x34] sm:$0xf] }
 0x3e0   : > { %v2873_v44 = vsel %vm1151_vm9, %v2841_v61, %v2614_v38  ;;  %v239_v38 = vld [vmem:[%s4184_s24 + $0x30] sm:$0xf]  ;;  %v3145_v27 = vshrl.u32 %v240_v17, 16  ;;  %v3141_v59 = vshll.u32 %v240_v17, 16 }
 0x3e1   : > { %v2905_v4 = vsel %vm1184_vm10, %v2873_v44, %v2649_v0  ;;  %v3591_v9 = vmax.f32 %v3559_v19, 0.0  ;;  %v3333_v0 = vshll.u32 %v264_v34, 16  ;;  %v3132_v7 = vshrl.u32 %v239_v38, 16 }
 0x3e2   : > { %3921 = vmatmul.msk.bf16.gmra.mxu3 %vm1241_vm11, %v2905_v4  ;;  %v3135_v28 = vshll.u32 %v239_v38, 16  ;;  %v4111_v4 = vld [vmem:[#allocation2 + $0xb4] sm:$0xff] }
 0x3e3   : > { %v3335_v2 = vrot.slane %v3333_v0, 5  ;;  %v2683_v30 = vsel %vm953_vm3, %v4111_v4, %v5658_v25  ;;  %v3134_v19 = vrot.slane %v3132_v7, 4 }
 0x3e4   : > { %v3028_v15 = vpop.f32.mrf.mxu3  ;;  %v2497_v44 = vpop.permute.xlu2 %2496 }
 0x3e5   : > { %v3029_v39 = vadd.f32 %v5967_v43, %v3028_v15  ;;  %v3340_v21 = vor.u32 %v3339_v50, %v3335_v2 }
 0x3e6   : > { %v2986_v8 = vpop.f32.mrf.mxu1  ;;  %v2432_v62 = vpop.permute.xlu0 %2431 }
 0x3e7   : > { %v3560_v22 = vadd.f32 %v3528_v42, %v3029_v39  ;;  %v2479_v54 = vpop.permute.xlu1 %2478  ;;  %v2729_v10 = vsel %vm1019_vm4, %v5691_v33, %v2432_v62  ;;  %v2987_v18 = vadd.f32 %v5967_v43, %v2986_v8  ;;  %v3341_v15 = vrot.slane %v3340_v21, 4 }
 0x3e8   : > { %v2761_v55 = vsel %vm1052_vm6, %v2729_v10, %v2479_v54  ;;  %v3345_v42 = vrot.slane %v3343_v51, 5  ;;  %v3137_v39 = vrot.slane %v3135_v28, 5  ;;  %v3336_v8 = vsel %vm5950_vm12, %v3331_v58, %v3335_v2 }
 0x3e9   : > { %v3592_v32 = vmax.f32 %v3560_v22, 0.0  ;;  %v3543_v52 = vadd.f32 %v3511_v13, %v2987_v18  ;;  %v2793_v49 = vsel %vm1085_vm7, %v2761_v55, %v2514_v36  ;;  %v3147_v62 = vrot.slane %v3145_v27, 4  ;;  %v4112_v13 = vld [vmem:[%s4184_s24 + $0x38] sm:$0x1] }
 0x3ea   : > { %v3346_v14 = vsel %vm5950_vm12, %v3341_v15, %v3345_v42  ;;  %v3497_v25 = vunpack.c.l.bf16 %v3336_v8  ;;  %v3143_v10 = vrot.slane %v3141_v59, 5  ;;  %v3151_v55 = vshll.u32 %v4112_v13, 16 }
 0x3eb   : > { %v4018_v53 = vpack.c.bf16 %v3592_v32, %v3591_v9  ;;  %v3575_v26 = vmax.f32 %v3543_v52, 0.0  ;;  %v3138_v32 = vor.u32 %v3137_v39, %v3134_v19 }
 0x3ec   : > { %v3148_v18 = vor.u32 %v3147_v62, %v3143_v10  ;;  %v2616_v29 = vpop.permute.xlu2 %2615  ;;  %v3529_v34 = vsel %vm953_vm3, %v3497_v25, 0.0 }
 0x3ed   : > { %4054 = vst [vmem:[%s6003_s6 + $0x50] sm:$0xff] %v4018_v53   ;;  %v3498_v53 = vunpack.c.l.bf16 %v3346_v14 }
 0x3ee   : > { %v2988_v12 = vpop.f32.mrf.mxu1  ;;  %v2551_v47 = vpop.permute.xlu0 %2550  ;;  %v3149_v52 = vrot.slane %v3148_v18, 4 }
 0x3ef   : > { %v2598_v33 = vpop.permute.xlu1 %2597  ;;  %v2989_v11 = vadd.f32 %v5967_v43, %v2988_v12  ;;  %v2825_v37 = vsel %vm1118_vm8, %v2793_v49, %v2551_v47  ;;  %v3530_v5 = vsel %vm953_vm3, %v3498_v53, 0.0  ;;  %v4113_v53 = vld [vmem:[%s4184_s24 + $0xa4] sm:$0x1] }
 0x3f0   : > { %v2857_v46 = vsel %vm1151_vm9, %v2825_v37, %v2598_v33  ;;  %v3153_v33 = vrot.slane %v3151_v55, 5  ;;  %v3367_v18 = vshll.u32 %v4113_v53, 16 }
 0x3f1   : > { %v3544_v20 = vadd.f32 %v3512_v1, %v2989_v11  ;;  %v2889_v35 = vsel %vm1184_vm10, %v2857_v46, %v2633_v63  ;;  %v3139_v63 = vrot.slane %v3138_v32, 4 }
 0x3f2   : > { %3913 = vmatmul.msk.bf16.gmra.mxu1 %vm1241_vm11, %v2889_v35  ;;  %v3154_v35 = vsel %vm5950_vm12, %v3149_v52, %v3153_v33 }
 0x3f3   : > { %v3576_v41 = vmax.f32 %v3544_v20, 0.0  ;;  %v3144_v16 = vsel %vm5950_vm12, %v3139_v63, %v3143_v10  ;;  %v3482_v38 = vunpack.c.l.bf16 %v3154_v35 }
 0x3f4   : > { %v2481_v40 = vpop.permute.xlu2 %2480 }
 0x3f5   : > { %v3978_v6 = vpack.c.bf16 %v3576_v41, %v3575_v26  ;;  %v3481_v41 = vunpack.c.l.bf16 %v3144_v16  ;;  %v3514_v28 = vsel %vm953_vm3, %v3482_v38, 0.0 }
 0x3f6   : > { %v2413_v61 = vpop.permute.xlu0 %2412 }
 0x3f7   : > { %4046 = vst [vmem:[%s6003_s6 + $0x10] sm:$0xff] %v3978_v6   ;;  %v2450_v45 = vpop.permute.xlu1 %2449  ;;  %v2715_v36 = vsel %vm986_vm5, %v2683_v30, %v2413_v61  ;;  %v3513_v31 = vsel %vm953_vm3, %v3481_v41, 0.0 }
 0x3f8   : > { %v2747_v22 = vsel %vm1019_vm4, %v2715_v36, %v2450_v45  ;;  %v266_v45 = vld [vmem:[%s4184_s24 + $0x9c] sm:$0xf]  ;;  %v267_v36 = vld [vmem:[%s4184_s24 + $0xa0] sm:$0xf] }
 0x3f9   : > { %v2779_v23 = vsel %vm1052_vm6, %v2747_v22, %v2497_v44  ;;  %v3351_v30 = vshll.u32 %v266_v45, 16  ;;  %v3361_v42 = vshrl.u32 %v267_v36, 16 }
 0x3fb   : > { %v3353_v22 = vrot.slane %v3351_v30, 5 }
 0x3fc   : > { %v2600_v59 = vpop.permute.xlu2 %2599 }
 0x3fd   : > { %v3031_v54 = vpop.f32.mrf.mxu3 }
 0x3fe   : > { %v2532_v9 = vpop.permute.xlu0 %2531  ;;  %v3032_v24 = vadd.f32 %v5967_v43, %v3031_v54  ;;  %v3357_v54 = vshll.u32 %v267_v36, 16 }
 0x3ff   : > { %v2569_v60 = vpop.permute.xlu1 %2568  ;;  %v2811_v56 = vsel %vm1085_vm7, %v2779_v23, %v2532_v9  ;;  %v3363_v9 = vrot.slane %v3361_v42, 4  ;;  %v242_v23 = vld [vmem:[%s4184_s24 + $0x3c] sm:$0xf]  ;;  %v270_v42 = vld [vmem:[%s4184_s24 + $0xac] sm:$0xf] }
 0x400   : > { %v2843_v12 = vsel %vm1118_vm8, %v2811_v56, %v2569_v60  ;;  %v3561_v11 = vadd.f32 %v3529_v34, %v3032_v24  ;;  %v3359_v10 = vrot.slane %v3357_v54, 5  ;;  %v3156_v13 = vshrl.u32 %v242_v23, 16  ;;  %v243_v24 = vld [vmem:[%s4184_s24 + $0x40] sm:$0xf] }
 0x401   : > { %v2875_v3 = vsel %vm1151_vm9, %v2843_v12, %v2616_v29  ;;  %v3159_v55 = vshll.u32 %v242_v23, 16  ;;  %v3169_v34 = vshrl.u32 %v243_v24, 16  ;;  %v3369_v12 = vrot.slane %v3367_v18, 5 }
 0x402   : > { %v3593_v50 = vmax.f32 %v3561_v11, 0.0  ;;  %v3364_v56 = vor.u32 %v3363_v9, %v3359_v10  ;;  %v3165_v52 = vshll.u32 %v243_v24, 16  ;;  %v245_v9 = vld [vmem:[%s4184_s24 + $0x48] sm:$0xf] }
 0x403   : > { %v3180_v18 = vshrl.u32 %v245_v9, 16  ;;  %v3183_v24 = vshll.u32 %v245_v9, 16 }
 0x404   : > { %v3365_v63 = vrot.slane %v3364_v56, 4 }
 0x405   : > { %v3033_v1 = vpop.f32.mrf.mxu3 }
 0x406   : > { %v3034_v49 = vadd.f32 %v5967_v43, %v3033_v1  ;;  %v2651_v37 = vpop.permute.xlu0 %2650  ;;  %v3158_v1 = vrot.slane %v3156_v13, 4 }
 0x407   : > { %v2434_v47 = vpop.permute.xlu1 %2433  ;;  %v2991_v20 = vpop.f32.mrf.mxu1  ;;  %v2907_v46 = vsel %vm1184_vm10, %v2875_v3, %v2651_v37  ;;  %v3167_v3 = vrot.slane %v3165_v52, 5 }
 0x408   : > { %v3562_v0 = vadd.f32 %v3530_v5, %v3034_v49  ;;  %3922 = vmatmul.msk.bf16.gmra.mxu3 %vm1241_vm11, %v2907_v46  ;;  %v2731_v6 = vsel %vm1019_vm4, %v5711_v57, %v2434_v47  ;;  %v2992_v21 = vadd.f32 %v5967_v43, %v2991_v20  ;;  %v3348_v57 = vshrl.u32 %v266_v45, 16  ;;  %v4114_v46 = vld [vmem:[%s4184_s24 + $0x44] sm:$0x1] }
 0x409   : > { %v2763_v61 = vsel %vm1052_vm6, %v2731_v6, %v2481_v40  ;;  %v3161_v5 = vrot.slane %v3159_v55, 5  ;;  %v3171_v49 = vrot.slane %v3169_v34, 4  ;;  %v3370_v47 = vsel %vm5950_vm12, %v3365_v63, %v3369_v12  ;;  %v4115_v55 = vld [vmem:[%s4184_s24 + $0xb0] sm:$0x1]  ;;  %v246_v34 = vld [vmem:[%s4184_s24 + $0x4c] sm:$0xf] }
 0x40a   : > { %v3594_v26 = vmax.f32 %v3562_v0, 0.0  ;;  %v3545_v44 = vadd.f32 %v3513_v31, %v2992_v21  ;;  %v3350_v8 = vrot.slane %v3348_v57, 4  ;;  %v3500_v0 = vunpack.c.l.bf16 %v3370_v47 }
 0x40b   : > { %v3162_v16 = vor.u32 %v3161_v5, %v3158_v1  ;;  %v3172_v20 = vor.u32 %v3171_v49, %v3167_v3  ;;  %v3175_v35 = vshll.u32 %v4114_v46, 16  ;;  %v3193_v12 = vshrl.u32 %v246_v34, 16 }
 0x40c   : > { %v4023_v2 = vpack.c.bf16 %v3594_v26, %v3593_v50  ;;  %v3577_v19 = vmax.f32 %v3545_v44, 0.0  ;;  %v3354_v32 = vor.u32 %v3353_v22, %v3350_v8  ;;  %v3182_v1 = vrot.slane %v3180_v18, 4 }
 0x40d   : > { %v3163_v41 = vrot.slane %v3162_v16, 4  ;;  %v3173_v38 = vrot.slane %v3172_v20, 4  ;;  %v3177_v6 = vrot.slane %v3175_v35, 5  ;;  %v3195_v47 = vrot.slane %v3193_v12, 4  ;;  %v4116_v35 = vld [vmem:[%s4184_s24 + $0x50] sm:$0x1] }
 0x40e   : > { %4055 = vst [vmem:[%s6003_s6 + $0x58] sm:$0xff] %v4023_v2   ;;  %v2516_v51 = vpop.permute.xlu0 %2515  ;;  %v3355_v29 = vrot.slane %v3354_v32, 4  ;;  %v3532_v2 = vsel %vm953_vm3, %v3500_v0, 0.0  ;;  %v249_v12 = vld [vmem:[%s4184_s24 + $0x58] sm:$0xf] }
 0x40f   : > { %v2993_v7 = vpop.f32.mrf.mxu1  ;;  %v2553_v58 = vpop.permute.xlu1 %2552  ;;  %v2795_v17 = vsel %vm1085_vm7, %v2763_v61, %v2516_v51  ;;  %v3168_v51 = vsel %vm5950_vm12, %v3163_v41, %v3167_v3 }
 0x410   : > { %v2994_v4 = vadd.f32 %v5967_v43, %v2993_v7  ;;  %v2827_v15 = vsel %vm1118_vm8, %v2795_v17, %v2553_v58  ;;  %v3360_v33 = vsel %vm5950_vm12, %v3355_v29, %v3359_v10  ;;  %v3178_v7 = vsel %vm5950_vm12, %v3173_v38, %v3177_v6  ;;  %v269_v17 = vld [vmem:[%s4184_s24 + $0xa8] sm:$0xf] }
 0x411   : > { %v2859_v25 = vsel %vm1151_vm9, %v2827_v15, %v2600_v59  ;;  %v3499_v37 = vunpack.c.l.bf16 %v3360_v33  ;;  %v3483_v58 = vunpack.c.l.bf16 %v3168_v51  ;;  %v3484_v57 = vunpack.c.l.bf16 %v3178_v7 }
 0x412   : > { %v3546_v27 = vadd.f32 %v3514_v28, %v2994_v4  ;;  %v3372_v36 = vshrl.u32 %v269_v17, 16  ;;  %v3375_v15 = vshll.u32 %v269_v17, 16  ;;  %v3385_v59 = vshrl.u32 %v270_v42, 16 }
 0x413   : > { %v3531_v26 = vsel %vm953_vm3, %v3499_v37, 0.0  ;;  %v3391_v29 = vshll.u32 %v4115_v55, 16  ;;  %v3185_v33 = vrot.slane %v3183_v24, 5  ;;  %v4117_v24 = vld [vmem:[%s4184_s24 + $0xbc] sm:$0x1] }
 0x414   : > { %v3578_v39 = vmax.f32 %v3546_v27, 0.0  ;;  %v3515_v27 = vsel %vm953_vm3, %v3483_v58, 0.0  ;;  %v3374_v54 = vrot.slane %v3372_v36, 4 }
 0x415   : > { %v3393_v52 = vrot.slane %v3391_v29, 5  ;;  %v3186_v3 = vor.u32 %v3185_v33, %v3182_v1 }
 0x416   : > { %v3983_v62 = vpack.c.bf16 %v3578_v39, %v3577_v19  ;;  %v2635_v14 = vpop.permute.xlu0 %2634  ;;  %v3516_v39 = vsel %vm953_vm3, %v3484_v57, 0.0  ;;  %v272_v57 = vld [vmem:[%s4184_s24 + $0xb4] sm:$0xf] }
 0x417   : > { %v2891_v60 = vsel %vm1184_vm10, %v2859_v25, %v2635_v14  ;;  %v3381_v14 = vshll.u32 %v270_v42, 16  ;;  %v3396_v42 = vshrl.u32 %v272_v57, 16 }
 0x418   : > { %4047 = vst [vmem:[%s6003_s6 + $0x18] sm:$0xff] %v3983_v62   ;;  %3914 = vmatmul.msk.bf16.gmra.mxu1 %vm1241_vm11, %v2891_v60  ;;  %v3377_v62 = vrot.slane %v3375_v15, 5  ;;  %v3387_v60 = vrot.slane %v3385_v59, 4 }
 0x419   : > { %v3383_v56 = vrot.slane %v3381_v14, 5  ;;  %v3398_v14 = vrot.slane %v3396_v42, 4 }
 0x41a   : > { %v3378_v23 = vor.u32 %v3377_v62, %v3374_v54 }
 0x41b   : > { %v3388_v13 = vor.u32 %v3387_v60, %v3383_v56 }
 0x41c   : > { %v3379_v63 = vrot.slane %v3378_v23, 4 }
 0x41d   : > { %v3389_v5 = vrot.slane %v3388_v13, 4 }
 0x41e   : > { %v3384_v49 = vsel %vm5950_vm12, %v3379_v63, %v3383_v56 }
 0x41f   : > { %v3394_v16 = vsel %vm5950_vm12, %v3389_v5, %v3393_v52  ;;  %v3501_v20 = vunpack.c.l.bf16 %v3384_v49  ;;  %v3217_v5 = vshrl.u32 %v249_v12, 16 }
 0x423   : > { %v3036_v11 = vpop.f32.mrf.mxu3 }
 0x424   : > { %v3037_v50 = vadd.f32 %v5967_v43, %v3036_v11  ;;  %v3189_v11 = vshll.u32 %v246_v34, 16  ;;  %v3415_v34 = vshll.u32 %v4117_v24, 16 }
 0x426   : > { %v3563_v21 = vadd.f32 %v3531_v26, %v3037_v50  ;;  %v3191_v0 = vrot.slane %v3189_v11, 5  ;;  %v3199_v50 = vshll.u32 %v4116_v35, 16  ;;  %v3502_v26 = vunpack.c.l.bf16 %v3394_v16 }
 0x427   : > { %v3417_v11 = vrot.slane %v3415_v34, 5  ;;  %v3219_v16 = vrot.slane %v3217_v5, 4  ;;  %v252_v5 = vld [vmem:[%s4184_s24 + $0x64] sm:$0xf] }
 0x428   : > { %v3595_v28 = vmax.f32 %v3563_v21, 0.0  ;;  %v3196_v46 = vor.u32 %v3195_v47, %v3191_v0  ;;  %v3201_v6 = vrot.slane %v3199_v50, 5  ;;  %v3213_v47 = vshll.u32 %v249_v12, 16 }
 0x42a   : > { %v3197_v38 = vrot.slane %v3196_v46, 4  ;;  %v3215_v46 = vrot.slane %v3213_v47, 5 }
 0x42b   : > { %v3038_v40 = vpop.f32.mrf.mxu3 }
 0x42c   : > { %v3039_v31 = vadd.f32 %v5967_v43, %v3038_v40  ;;  %v3187_v40 = vrot.slane %v3186_v3, 4  ;;  %v3220_v50 = vor.u32 %v3219_v16, %v3215_v46  ;;  %v3237_v16 = vshll.u32 %v252_v5, 16 }
 0x42d   : > { %v2996_v61 = vpop.f32.mrf.mxu1 }
 0x42e   : > { %v3564_v45 = vadd.f32 %v3532_v2, %v3039_v31  ;;  %v2997_v30 = vadd.f32 %v5967_v43, %v2996_v61  ;;  %v3533_v2 = vsel %vm953_vm3, %v3501_v20, 0.0  ;;  %v3534_v31 = vsel %vm953_vm3, %v3502_v26, 0.0  ;;  %v4118_v26 = vld [vmem:[%s4184_s24 + $0x5c] sm:$0x1] }
 0x42f   : > { %v3192_v61 = vsel %vm5950_vm12, %v3187_v40, %v3191_v0 }
 0x430   : > { %v3596_v44 = vmax.f32 %v3564_v45, 0.0  ;;  %v3547_v8 = vadd.f32 %v3515_v27, %v2997_v30  ;;  %v3485_v58 = vunpack.c.l.bf16 %v3192_v61 }
 0x432   : > { %v4028_v4 = vpack.c.bf16 %v3596_v44, %v3595_v28  ;;  %v3579_v32 = vmax.f32 %v3547_v8, 0.0  ;;  %v3202_v44 = vsel %vm5950_vm12, %v3197_v38, %v3201_v6  ;;  %v3517_v15 = vsel %vm953_vm3, %v3485_v58, 0.0 }
 0x433   : > { %v3486_v30 = vunpack.c.l.bf16 %v3202_v44 }
 0x434   : > { %4056 = vst [vmem:[%s6003_s6 + $0x60] sm:$0xff] %v4028_v4  }
 0x435   : > { %v2998_v19 = vpop.f32.mrf.mxu1  ;;  %v3518_v8 = vsel %vm953_vm3, %v3486_v30, 0.0 }
 0x436   : > { %v2999_v22 = vadd.f32 %v5967_v43, %v2998_v19  ;;  %v3399_v19 = vshll.u32 %v272_v57, 16 }
 0x438   : > { %v3548_v25 = vadd.f32 %v3516_v39, %v2999_v22  ;;  %v273_v39 = vld [vmem:[%s4184_s24 + $0xb8] sm:$0xf] }
 0x439   : > { %v3409_v22 = vshrl.u32 %v273_v39, 16  ;;  %v3405_v60 = vshll.u32 %v273_v39, 16 }
 0x43a   : > { %v3580_v10 = vmax.f32 %v3548_v25, 0.0  ;;  %v3401_v25 = vrot.slane %v3399_v19, 5 }
 0x43b   : > { %v3407_v18 = vrot.slane %v3405_v60, 5 }
 0x43c   : > { %v3988_v53 = vpack.c.bf16 %v3580_v10, %v3579_v32  ;;  %v3411_v32 = vrot.slane %v3409_v22, 4  ;;  %v248_v10 = vld [vmem:[%s4184_s24 + $0x54] sm:$0xf] }
 0x43d   : > { %v3204_v55 = vshrl.u32 %v248_v10, 16  ;;  %v3207_v63 = vshll.u32 %v248_v10, 16 }
 0x43e   : > { %4048 = vst [vmem:[%s6003_s6 + $0x20] sm:$0xff] %v3988_v53   ;;  %v3402_v53 = vor.u32 %v3401_v25, %v3398_v14  ;;  %v3412_v29 = vor.u32 %v3411_v32, %v3407_v18  ;;  %v276_v25 = vld [vmem:[%s4184_s24 + $0xc4] sm:$0xf] }
 0x43f   : > { %v3206_v52 = vrot.slane %v3204_v55, 4  ;;  %v3209_v49 = vrot.slane %v3207_v63, 5  ;;  %v3433_v32 = vshrl.u32 %v276_v25, 16  ;;  %v4120_v63 = vld [vmem:[%s4184_s24 + $0xc8] sm:$0x1] }
 0x440   : > { %v3403_v1 = vrot.slane %v3402_v53, 4  ;;  %v3413_v33 = vrot.slane %v3412_v29, 4  ;;  %v3429_v53 = vshll.u32 %v276_v25, 16  ;;  %v3439_v12 = vshll.u32 %v4120_v63, 16 }
 0x441   : > { %v3210_v20 = vor.u32 %v3209_v49, %v3206_v52 }
 0x442   : > { %v3418_v0 = vsel %vm5950_vm12, %v3413_v33, %v3417_v11  ;;  %v3431_v29 = vrot.slane %v3429_v53, 5  ;;  %v3241_v33 = vshrl.u32 %v252_v5, 16  ;;  %v3441_v47 = vrot.slane %v3439_v12, 5 }
 0x443   : > { %v3504_v40 = vunpack.c.l.bf16 %v3418_v0  ;;  %v3211_v38 = vrot.slane %v3210_v20, 4 }
 0x444   : > { %v3041_v37 = vpop.f32.mrf.mxu3  ;;  %v3243_v0 = vrot.slane %v3241_v33, 4 }
 0x445   : > { %v3042_v41 = vadd.f32 %v5967_v43, %v3041_v37  ;;  %v3408_v37 = vsel %vm5950_vm12, %v3403_v1, %v3407_v18  ;;  %v3435_v18 = vrot.slane %v3433_v32, 4 }
 0x446   : > { %v3503_v35 = vunpack.c.l.bf16 %v3408_v37 }
 0x447   : > { %v3565_v51 = vadd.f32 %v3533_v2, %v3042_v41  ;;  %v3223_v41 = vshll.u32 %v4118_v26, 16  ;;  %v3436_v34 = vor.u32 %v3435_v18, %v3431_v29 }
 0x448   : > { %v3535_v6 = vsel %vm953_vm3, %v3503_v35, 0.0 }
 0x449   : > { %v3597_v17 = vmax.f32 %v3565_v51, 0.0  ;;  %v3437_v49 = vrot.slane %v3436_v34, 4 }
 0x44c   : > { %v3043_v21 = vpop.f32.mrf.mxu3 }
 0x44d   : > { %v3044_v45 = vadd.f32 %v5967_v43, %v3043_v21  ;;  %v3221_v21 = vrot.slane %v3220_v50, 4  ;;  %v3239_v50 = vrot.slane %v3237_v16, 5 }
 0x44e   : > { %v3001_v7 = vpop.f32.mrf.mxu1 }
 0x44f   : > { %v3566_v28 = vadd.f32 %v3534_v31, %v3044_v45  ;;  %v3002_v36 = vadd.f32 %v5967_v43, %v3001_v7  ;;  %v3225_v31 = vrot.slane %v3223_v41, 5  ;;  %v3536_v45 = vsel %vm953_vm3, %v3504_v40, 0.0  ;;  %v4121_v40 = vld [vmem:[%s4184_s24 + $0x68] sm:$0x1] }
 0x450   : > { %v3244_v41 = vor.u32 %v3243_v0, %v3239_v50 }
 0x451   : > { %v3598_v4 = vmax.f32 %v3566_v28, 0.0  ;;  %v3549_v54 = vadd.f32 %v3517_v15, %v3002_v36  ;;  %v3216_v28 = vsel %vm5950_vm12, %v3211_v38, %v3215_v46  ;;  %v6215_v15 = vld [vmem:[%s6254_s4] ss:$0 sm:$0xff]  ;;  %v3442_v46 = vsel %vm5950_vm12, %v3437_v49, %v3441_v47 }
 0x452   : > { %v3506_v38 = vunpack.c.l.bf16 %v3442_v46 }
 0x453   : > { %v4033_v27 = vpack.c.bf16 %v3598_v4, %v3597_v17  ;;  %v3581_v23 = vmax.f32 %v3549_v54, 0.0  ;;  %v3226_v17 = vsel %vm5950_vm12, %v3221_v21, %v3225_v31  ;;  %v3487_v4 = vunpack.c.l.bf16 %v3216_v28 }
 0x455   : > { %4057 = vst [vmem:[%s6003_s6 + $0x68] sm:$0xff] %v4033_v27   ;;  %v3488_v27 = vunpack.c.l.bf16 %v3226_v17  ;;  %v3519_v42 = vsel %vm953_vm3, %v3487_v4, 0.0 }
 0x456   : > { %v3003_v59 = vpop.f32.mrf.mxu1 }
 0x457   : > { %v3004_v62 = vadd.f32 %v5967_v43, %v3003_v59  ;;  %v3520_v39 = vsel %vm953_vm3, %v3488_v27, 0.0  ;;  %v275_v59 = vld [vmem:[%s4184_s24 + $0xc0] sm:$0xf] }
 0x458   : > { %v3423_v14 = vshll.u32 %v275_v59, 16 }
 0x459   : > { %v3550_v9 = vadd.f32 %v3518_v8, %v3004_v62  ;;  %v3420_v62 = vshrl.u32 %v275_v59, 16 }
 0x45b   : > { %v3582_v56 = vmax.f32 %v3550_v9, 0.0 }
 0x45d   : > { %v3993_v13 = vpack.c.bf16 %v3582_v56, %v3581_v23  ;;  %v3422_v23 = vrot.slane %v3420_v62, 4  ;;  %v3425_v56 = vrot.slane %v3423_v14, 5 }
 0x45f   : > { %4049 = vst [vmem:[%s6003_s6 + $0x28] sm:$0xff] %v3993_v13   ;;  %v251_v13 = vld [vmem:[%s4184_s24 + $0x60] sm:$0xf]  ;;  %v3426_v55 = vor.u32 %v3425_v56, %v3422_v23 }
 0x460   : > { %v3228_v24 = vshrl.u32 %v251_v13, 16  ;;  %v3231_v1 = vshll.u32 %v251_v13, 16 }
 0x461   : > { %v3427_v52 = vrot.slane %v3426_v55, 4 }
 0x462   : > { %v3230_v11 = vrot.slane %v3228_v24, 4  ;;  %v3233_v37 = vrot.slane %v3231_v1, 5 }
 0x464   : > { %v3234_v35 = vor.u32 %v3233_v37, %v3230_v11 }
 0x465   : > { %v3046_v3 = vpop.f32.mrf.mxu3 }
 0x466   : > { %v3047_v2 = vadd.f32 %v5967_v43, %v3046_v3  ;;  %v3432_v3 = vsel %vm5950_vm12, %v3427_v52, %v3431_v29  ;;  %v3235_v21 = vrot.slane %v3234_v35, 4 }
 0x467   : > { %v3505_v26 = vunpack.c.l.bf16 %v3432_v3 }
 0x468   : > { %v3567_v61 = vadd.f32 %v3535_v6, %v3047_v2  ;;  %v3247_v2 = vshll.u32 %v4121_v40, 16 }
 0x469   : > { %v3537_v31 = vsel %vm953_vm3, %v3505_v26, 0.0 }
 0x46a   : > { %v3599_v57 = vmax.f32 %v3567_v61, 0.0 }
 0x46d   : > { %v3048_v51 = vpop.f32.mrf.mxu3 }
 0x46e   : > { %v3049_v7 = vadd.f32 %v5967_v43, %v3048_v51  ;;  %v3245_v51 = vrot.slane %v3244_v41, 4 }
 0x46f   : > { %v3006_v44 = vpop.f32.mrf.mxu1 }
 0x470   : > { %v3568_v58 = vadd.f32 %v3536_v45, %v3049_v7  ;;  %v3007_v43 = vadd.f32 %v6215_v15, %v3006_v44  ;;  %v3249_v45 = vrot.slane %v3247_v2, 5  ;;  %v3538_v7 = vsel %vm953_vm3, %v3506_v38, 0.0 }
 0x472   : > { %v3600_v30 = vmax.f32 %v3568_v58, 0.0  ;;  %v3551_v8 = vadd.f32 %v3519_v42, %v3007_v43  ;;  %v3240_v58 = vsel %vm5950_vm12, %v3235_v21, %v3239_v50 }
 0x474   : > { %v4038_v36 = vpack.c.bf16 %v3600_v30, %v3599_v57  ;;  %v3583_v60 = vmax.f32 %v3551_v8, 0.0  ;;  %v3250_v57 = vsel %vm5950_vm12, %v3245_v51, %v3249_v45  ;;  %v3489_v30 = vunpack.c.l.bf16 %v3240_v58 }
 0x475   : > { %v3490_v43 = vunpack.c.l.bf16 %v3250_v57 }
 0x476   : > { %4058 = vst [vmem:[%s6003_s6 + $0x70] sm:$0xff] %v4038_v36  }
 0x477   : > { %v3008_v19 = vpop.f32.mrf.mxu1  ;;  %v3522_v8 = vsel %vm953_vm3, %v3490_v43, 0.0 }
 0x478   : > { %v3009_v22 = vadd.f32 %v6215_v15, %v3008_v19 }
 0x47a   : > { %v3552_v54 = vadd.f32 %v3520_v39, %v3009_v22  ;;  %v3521_v39 = vsel %vm953_vm3, %v3489_v30, 0.0 }
 0x47c   : > { %v3584_v9 = vmax.f32 %v3552_v54, 0.0 }
 0x47e   : > { %v3998_v10 = vpack.c.bf16 %v3584_v9, %v3583_v60 }
 0x480   : > { %4050 = vst [vmem:[%s6003_s6 + $0x30] sm:$0xff] %v3998_v10  }
 0x48b   : > { %v3051_v20 = vpop.f32.mrf.mxu3 }
 0x48c   : > { %v3052_v6 = vadd.f32 %v6215_v15, %v3051_v20 }
 0x48e   : > { %v3569_v28 = vadd.f32 %v3537_v31, %v3052_v6 }
 0x490   : > { %v3601_v27 = vmax.f32 %v3569_v28, 0.0 }
 0x493   : > { %v3053_v61 = vpop.f32.mrf.mxu3 }
 0x494   : > { %v3054_v44 = vadd.f32 %v6215_v15, %v3053_v61 }
 0x495   : > { %v3011_v17 = vpop.f32.mrf.mxu1 }
 0x496   : > { %v3570_v4 = vadd.f32 %v3538_v7, %v3054_v44  ;;  %v3012_v19 = vadd.f32 %v6215_v15, %v3011_v17 }
 0x498   : > { %v3602_v36 = vmax.f32 %v3570_v4, 0.0  ;;  %v3553_v22 = vadd.f32 %v3521_v39, %v3012_v19 }
 0x49a   : > { %v4043_v42 = vpack.c.bf16 %v3602_v36, %v3601_v27  ;;  %v3585_v48 = vmax.f32 %v3553_v22, 0.0 }
 0x49c   : > { %4059 = vst [vmem:[%s6003_s6 + $0x78] sm:$0xff] %v4043_v42  }
 0x49d   : > { %v3013_v59 = vpop.f32.mrf.mxu1 }
 0x49e   : > { %v3014_v54 = vadd.f32 %v6215_v15, %v3013_v59 }
 0x4a0   : > { %v3554_v62 = vadd.f32 %v3522_v8, %v3014_v54 }
 0x4a2   : > { %v3586_v14 = vmax.f32 %v3554_v62, 0.0 }
 0x4a4   : > { %v4003_v25 = vpack.c.bf16 %v3586_v14, %v3585_v48 }
 0x4a6   : > { %4051 = vst [vmem:[%s6003_s6 + $0x38] sm:$0xff] %v4003_v25  }
 0x4a7 PF: > { %s15_s18 = sadd.s32 1, %s4128_s18  }
 0x4a8   : > { %p12_p5 = scmp.ge.s32.totalorder %s15_s18, 4  }
 0x4aa   :  { %14 = sbr.rel (!%p12_p5) target bundleno = 1 (0x1), region = 71 }

</bundles_post_ra>
